<compile_context>
chip_gen: v7x
topology: tpu7x:2x2x1
jax: 0.10.0
libtpu: 0.0.40
codegen_flags: <defaults>
</compile_context>

<pallas_src>
import functools

import jax
import jax.numpy as jnp
from jax.experimental import pallas as pl
from jax.experimental.pallas import tpu as pltpu


_C1P = 8                 # stage-1 input channels padded 3 -> 8
_CMID = 128              # 65 concat channels padded to the lane width
_K1 = 256                # 25 taps * 8 ch + 1 ones/bias channel, padded to MXU depth
_ONES_CH = 25 * _C1P     # 200: packed-input channel holding the in-image indicator
_IND_CH = _CMID - 1      # 127: h1 channel that carries the indicator (adds b2)


# --------------------------------- kernel ---------------------------------

def _prep2_kernel(x_ref, w1_ref, w2_ref, o_ref, h1p_ref):
    """One grid step = one batch element x one TH-row tile of the output.

    x_ref  : (1, 1, TH+4, W4P, 256) bf16   kh/kw/bias-packed stage-1 input tile
    w1_ref : (256, 128)             bf16   fused conv1|conv2|conv3 (+b1, +indicator)
    w2_ref : (5, 640, 128)          bf16   fused conv4|conv5|conv6, one slab per kh (+b2)
    o_ref  : (1, TH, W, 128)        f32    output tile (channels padded to 128 lanes)
    h1p_ref: (TH+4, W, 640)         bf16   scratch: kw-packed stage-1 activations
    """
    _, _, H4, W4P, K1 = x_ref.shape
    TH, W, C = o_ref.shape[1], o_ref.shape[2], o_ref.shape[3]     # C == 128

    # ---- stage 1: ONE bf16 matmul (K = 256), f32 accumulation.
    #      Bias and out-of-image masking are pre-folded into x/w1 (ones channel),
    #      so no epilogue beyond the ReLU is needed.
    x2d = x_ref[...].reshape(H4 * W4P, K1)
    h1 = jnp.dot(x2d, w1_ref[...], preferred_element_type=jnp.float32)
    h1 = jnp.maximum(h1, 0.0).astype(jnp.bfloat16).reshape(H4, W4P, C)

    # ---- pack the 5 width taps of h1 along channels: (TH+4, W, 5*128), bf16 ----
    for kw in range(5):
        h1p_ref[:, :, kw * C:(kw + 1) * C] = h1[:, kw:kw + W, :]

    # ---- stage 2: 5 kh-tap bf16 matmuls (K = 640), f32 accumulation.
    #      b2 arrives through the indicator channel of the center tap.
    acc = None
    for kh in range(5):
        patch = h1p_ref[kh:kh + TH, :, :].reshape(TH * W, 5 * C)
        contrib = jnp.dot(patch, w2_ref[kh], preferred_element_type=jnp.float32)
        acc = contrib if acc is None else acc + contrib

    out = jnp.maximum(acc, 0.0)
    o_ref[...] = out.reshape(1, TH, W, C).astype(o_ref.dtype)


# ------------------------- parameter construction -------------------------

def _init_conv(key, cout, cin, kh, kw, scale=0.1):
    kw_, kb_ = jax.random.split(key)
    w = scale * jax.random.normal(kw_, (cout, cin, kh, kw), jnp.float32)
    b = scale * jax.random.normal(kb_, (cout,), jnp.float32)
    return w, b


def _pad_to_5x5(w_oihw):
    kh, kw = w_oihw.shape[2], w_oihw.shape[3]
    ph, pw = (5 - kh) // 2, (5 - kw) // 2
    return jnp.pad(w_oihw, ((0, 0), (0, 0), (ph, ph), (pw, pw)))


def _fuse_stage(ws, bs):
    """Fuse three parallel convs into one 5x5 conv: (25, Cin, Cout), (1, Cout)."""
    w_cat = jnp.concatenate([_pad_to_5x5(w) for w in ws], axis=0)   # (Cout,Cin,5,5)
    w_hwio = jnp.transpose(w_cat, (2, 3, 1, 0))                     # (5,5,Cin,Cout)
    cout, cin = w_hwio.shape[-1], w_hwio.shape[2]
    return w_hwio.reshape(25, cin, cout), jnp.concatenate(bs, 0).reshape(1, cout)


def make_params(seed=0):
    keys = jax.random.split(jax.random.PRNGKey(seed), 6)
    w1, b1 = _init_conv(keys[0], 50, 3, 3, 3)
    w2, b2 = _init_conv(keys[1], 10, 3, 3, 3)
    w3, b3 = _init_conv(keys[2], 5, 3, 5, 5)
    w4, b4 = _init_conv(keys[3], 50, 65, 3, 3)
    w5, b5 = _init_conv(keys[4], 10, 65, 3, 3)
    w6, b6 = _init_conv(keys[5], 5, 65, 5, 5)
    w_s1, b_s1 = _fuse_stage([w1, w2, w3], [b1, b2, b3])   # (25, 3, 65), (1, 65)
    w_s2, b_s2 = _fuse_stage([w4, w5, w6], [b4, b5, b6])   # (25, 65, 65), (1, 65)
    return (w_s1, b_s1, w_s2, b_s2)


def _pack_stage1_weights(w_s1, b_s1):
    """(25,3,65),(1,65) -> (256,128) bf16 with b1 + indicator folded into a row."""
    ntap, cin, cout = w_s1.shape
    w = jnp.pad(w_s1, ((0, 0), (0, _C1P - cin), (0, _CMID - cout)))  # (25,8,128)
    w = w.reshape(ntap * _C1P, _CMID)                                # (200,128)
    extra = jnp.pad(b_s1, ((0, 0), (0, _CMID - cout)))               # (1,128): ones-ch row
    extra = extra.at[0, _IND_CH].set(1.0)                            # h1[...,127] = indicator
    w = jnp.concatenate([w, extra], axis=0)                          # (201,128)
    w = jnp.pad(w, ((0, _K1 - w.shape[0]), (0, 0)))                  # (256,128)
    return w.astype(jnp.bfloat16)


def _pack_stage2_weights(w_s2, b_s2):
    """(25,65,65),(1,65) -> (5, 640, 128) bf16; b2 folded through the indicator."""
    ntap, cin, cout = w_s2.shape
    w = jnp.pad(w_s2, ((0, 0), (0, _CMID - cin), (0, _CMID - cout)))  # (25,128,128)
    w = w.reshape(5, 5, _CMID, _CMID).reshape(5, 5 * _CMID, _CMID)    # (kh, kw*128+ci, co)
    b = jnp.pad(b_s2, ((0, 0), (0, _CMID - cout)))[0]                 # (128,)
    w = w.at[2, 2 * _CMID + _IND_CH, :].add(b)                        # center tap, ci=127
    return w.astype(jnp.bfloat16)


def _pack_input(x_nchw, H, W, TH, n_th, W4P):
    """NCHW input -> per-tile, kh/kw/bias-packed bf16 blocks for stage 1.

    Returns (N, n_th, TH+4, W4P, 256).  The extra "ones" channel is 1 inside the
    image and 0 outside; packed vectors at out-of-image output positions are
    fully zeroed so h1 is exactly the zero padding stage 2 expects.
    """
    N, cin = x_nchw.shape[0], x_nchw.shape[1]
    x = jnp.transpose(x_nchw, (0, 2, 3, 1)).astype(jnp.float32)       # NHWC
    x = jnp.pad(x, ((0, 0), (0, 0), (0, 0), (0, _C1P - cin)))         # ch 3 -> 8
    xp = jnp.pad(x, ((0, 0), (4, 4), (4, 4), (0, 0)))                 # (N,H+8,W+8,8)
    taps = [xp[:, kh:kh + H + 4, kw:kw + W + 4, :]
            for kh in range(5) for kw in range(5)]
    packed = jnp.concatenate(taps, axis=-1)                           # (N,H+4,W+4,200)

    rows_ok = (jnp.arange(H + 4) >= 2) & (jnp.arange(H + 4) < H + 2)
    cols_ok = (jnp.arange(W + 4) >= 2) & (jnp.arange(W + 4) < W + 2)
    inside = (rows_ok[:, None] & cols_ok[None, :]).astype(packed.dtype)
    inside = inside[None, :, :, None]                                 # (1,H+4,W+4,1)
    packed = packed * inside                                          # zero h1's pad ring
    packed = jnp.concatenate(
        [packed, jnp.broadcast_to(inside, (N, H + 4, W + 4, 1))], axis=-1)  # ones channel
    packed = jnp.pad(
        packed, ((0, 0), (0, 0), (0, W4P - (W + 4)), (0, _K1 - packed.shape[-1])))
    packed = packed.astype(jnp.bfloat16)

    # Per-tile row slabs with a +-2 row halo; the BlockSpec pipeline then
    # double-buffers the HBM->VMEM DMA automatically.
    xt = jnp.stack([packed[:, t * TH: t * TH + TH + 4] for t in range(n_th)], axis=1)
    return xt                                                         # (N,n_th,TH+4,W4P,256)


def _vmem_limit_bytes(TH, W, W4P):
    """Per-step VMEM footprint estimate (double-buffered blocks + scratch + temps)."""
    bb, bf = 2, 4
    x_blk = (TH + 4) * W4P * _K1 * bb
    o_blk = TH * W * _CMID * bf
    w_byt = _K1 * _CMID * bb + 5 * 5 * _CMID * _CMID * bb
    h1p = (TH + 4) * W * 5 * _CMID * bb
    temps = (TH + 4) * W4P * _CMID * (bf + bb) + 2 * TH * W * _CMID * bf + x_blk
    est = 2 * (x_blk + o_blk + w_byt) + h1p + temps
    # Cap at 56 MB so the request also fits v7x's 64 MiB physical VMEM.
    return int(max(min(est * 3 // 2, 56 * 1024 * 1024), 24 * 1024 * 1024))


# --------------------------------- wrapper ---------------------------------

@functools.partial(jax.jit, static_argnames=("tile_h",))
def prep_network2(secret_image_nchw, w_s1, b_s1, w_s2, b_s2, tile_h=8):
    """Forward pass. Input NCHW (like PyTorch), output NCHW (N, 65, H, W).

    tile_h: rows of output per grid step.  8 is safe everywhere; v6e can use
    16-32, v7x <= 16 (VMEM), and N*(H/tile_h) should be even on v7x.
    """
    N, cin, H, W = secret_image_nchw.shape
    cout_true = b_s2.shape[1]                                   # 65
    tile_h = min(tile_h, H)
    assert H % tile_h == 0, "H must be divisible by tile_h"
    TH, n_th = tile_h, H // tile_h
    W4P = ((W + 4 + 7) // 8) * 8                                # sublane-friendly halo width

    xt = _pack_input(secret_image_nchw, H, W, TH, n_th, W4P)
    w1p = _pack_stage1_weights(w_s1, b_s1)                      # (256, 128) bf16
    w2p = _pack_stage2_weights(w_s2, b_s2)                      # (5, 640, 128) bf16

    out = pl.pallas_call(
        _prep2_kernel,
        out_shape=jax.ShapeDtypeStruct((N, H, W, _CMID), jnp.float32),
        grid=(N, n_th),
        in_specs=[
            pl.BlockSpec((1, 1, TH + 4, W4P, _K1), lambda n, t: (n, t, 0, 0, 0)),
            pl.BlockSpec((_K1, _CMID), lambda n, t: (0, 0)),
            pl.BlockSpec((5, 5 * _CMID, _CMID), lambda n, t: (0, 0, 0)),
        ],
        out_specs=pl.BlockSpec((1, TH, W, _CMID), lambda n, t: (n, t, 0, 0)),
        scratch_shapes=[pltpu.VMEM((TH + 4, W, 5 * _CMID), jnp.bfloat16)],
        compiler_params=pltpu.CompilerParams(
            dimension_semantics=("parallel", "parallel"),
            vmem_limit_bytes=_vmem_limit_bytes(TH, W, W4P)),
    )(xt, w1p, w2p)

    # An NHWC consumer could take out[..., :65] directly and skip the transpose.
    out = out[..., :cout_true]                                  # drop padded lanes
    return jnp.transpose(out, (0, 3, 1, 2))                     # NHWC -> NCHW


# ------------------------------- reference ---------------------------------

def _reference(secret_image_nchw, w_s1, b_s1, w_s2, b_s2):
    """Pure-JAX f32 reference using lax.conv on the fused 5x5 weights."""
    def conv(x_nhwc, w_flat, b):
        cin, cout = w_flat.shape[1], w_flat.shape[2]
        w_hwio = w_flat.reshape(5, 5, cin, cout)
        y = jax.lax.conv_general_dilated(
            x_nhwc, w_hwio, window_strides=(1, 1), padding="SAME",
            dimension_numbers=("NHWC", "HWIO", "NHWC"))
        return jnp.maximum(y + b[0][None, None, None, :], 0.0)

    x = jnp.transpose(secret_image_nchw, (0, 2, 3, 1))
    h1 = conv(x, w_s1, b_s1)
    h2 = conv(h1, w_s2, b_s2)
    return jnp.transpose(h2, (0, 3, 1, 2))


if __name__ == "__main__":
    # Small deterministic example: batch=2, 3-channel 16x16 "secret image".
    key = jax.random.PRNGKey(0)
    x = jax.random.uniform(key, (2, 3, 16, 16), jnp.float32)

    w_s1, b_s1, w_s2, b_s2 = make_params(seed=0)

    out = prep_network2(x, w_s1, b_s1, w_s2, b_s2, tile_h=8)
    out = jax.block_until_ready(out)
    assert out.shape == (2, 65, 16, 16), out.shape

    ref = _reference(x, w_s1, b_s1, w_s2, b_s2)
    # bf16 MXU inputs with f32 accumulation -> tolerance loosened vs f32 path.
    max_err = float(jnp.max(jnp.abs(out - ref)))
    assert jnp.allclose(out, ref, atol=5e-2, rtol=5e-2), max_err

    print("KERNEL_OK")
</pallas_src>

<mosaic_0001>
module attributes {stable_mosaic.version = 11 : i64} {
  func.func @_prep2_kernel(%arg0: i32, %arg1: i32, %arg2: memref<1x1x12x24x256xbf16, #tpu.memory_space<vmem>>, %arg3: memref<256x128xbf16, #tpu.memory_space<vmem>>, %arg4: memref<5x640x128xbf16, #tpu.memory_space<vmem>>, %arg5: memref<1x8x16x128xf32, #tpu.memory_space<vmem>>, %arg6: memref<12x16x640xbf16, #tpu.memory_space<vmem>>) attributes {dimension_semantics = [#tpu.dimension_semantics<parallel>, #tpu.dimension_semantics<parallel>], iteration_bounds = array<i64: 2, 2>, scalar_prefetch = 0 : i64, scratch_operands = 1 : i64, tpu.core_type = #tpu.core_type<tc>, window_params = [{transform_indices = @transform_0, window_bounds = array<i64: 1, 1, 12, 24, 256>}, {pipeline_mode = #tpu.pipeline_mode<synchronous>, transform_indices = @transform_1, window_bounds = array<i64: 256, 128>}, {pipeline_mode = #tpu.pipeline_mode<synchronous>, transform_indices = @transform_2, window_bounds = array<i64: 5, 640, 128>}, {transform_indices = @transform_3, window_bounds = array<i64: 1, 8, 16, 128>}]} {
    %c0 = arith.constant 0 : index
    %c0_0 = arith.constant 0 : index
    %c0_1 = arith.constant 0 : index
    %c0_2 = arith.constant 0 : index
    %c0_3 = arith.constant 0 : index
    %0 = vector.load %arg2[%c0, %c0_0, %c0_1, %c0_2, %c0_3] : memref<1x1x12x24x256xbf16, #tpu.memory_space<vmem>>, vector<1x1x12x24x256xbf16>
    %1 = vector.shape_cast %0 : vector<1x1x12x24x256xbf16> to vector<288x256xbf16>
    %c0_4 = arith.constant 0 : index
    %c0_5 = arith.constant 0 : index
    %2 = vector.load %arg3[%c0_4, %c0_5] : memref<256x128xbf16, #tpu.memory_space<vmem>>, vector<256x128xbf16>
    %cst = arith.constant dense<0.000000e+00> : vector<288x128xf32>
    %3 = tpu.matmul %1, %2, %cst {dimension_numbers = #tpu.dot_dimension_numbers<[1], [0], [0], [1], [0, 0, 1, 1], [], []>} : vector<288x256xbf16>, vector<256x128xbf16>, vector<288x128xf32> -> vector<288x128xf32>
    %cst_6 = arith.constant 0.000000e+00 : f32
    %4 = vector.broadcast %cst_6 : f32 to vector<288x128xf32>
    %5 = arith.maximumf %3, %4 : vector<288x128xf32>
    %6 = arith.truncf %5 : vector<288x128xf32> to vector<288x128xbf16>
    %7 = vector.shape_cast %6 : vector<288x128xbf16> to vector<12x24x128xbf16>
    %8 = vector.extract_strided_slice %7 {offsets = [0, 0, 0], sizes = [12, 16, 128], strides = [1, 1, 1]} : vector<12x24x128xbf16> to vector<12x16x128xbf16>
    %c0_7 = arith.constant 0 : index
    %c0_8 = arith.constant 0 : index
    %c0_9 = arith.constant 0 : index
    %9 = vector.load %arg6[%c0_7, %c0_8, %c0_9] : memref<12x16x640xbf16, #tpu.memory_space<vmem>>, vector<12x16x128xbf16>
    tpu.vector_store %arg6[%c0_7, %c0_8, %c0_9], %8 {strides = array<i32>} : memref<12x16x640xbf16, #tpu.memory_space<vmem>>, vector<12x16x128xbf16>,
    %10 = vector.extract_strided_slice %7 {offsets = [0, 1, 0], sizes = [12, 16, 128], strides = [1, 1, 1]} : vector<12x24x128xbf16> to vector<12x16x128xbf16>
    %c0_10 = arith.constant 0 : index
    %c0_11 = arith.constant 0 : index
    %c128 = arith.constant 128 : index
    %11 = vector.load %arg6[%c0_10, %c0_11, %c128] : memref<12x16x640xbf16, #tpu.memory_space<vmem>>, vector<12x16x128xbf16>
    tpu.vector_store %arg6[%c0_10, %c0_11, %c128], %10 {strides = array<i32>} : memref<12x16x640xbf16, #tpu.memory_space<vmem>>, vector<12x16x128xbf16>,
    %12 = vector.extract_strided_slice %7 {offsets = [0, 2, 0], sizes = [12, 16, 128], strides = [1, 1, 1]} : vector<12x24x128xbf16> to vector<12x16x128xbf16>
    %c0_12 = arith.constant 0 : index
    %c0_13 = arith.constant 0 : index
    %c256 = arith.constant 256 : index
    %13 = vector.load %arg6[%c0_12, %c0_13, %c256] : memref<12x16x640xbf16, #tpu.memory_space<vmem>>, vector<12x16x128xbf16>
    tpu.vector_store %arg6[%c0_12, %c0_13, %c256], %12 {strides = array<i32>} : memref<12x16x640xbf16, #tpu.memory_space<vmem>>, vector<12x16x128xbf16>,
    %14 = vector.extract_strided_slice %7 {offsets = [0, 3, 0], sizes = [12, 16, 128], strides = [1, 1, 1]} : vector<12x24x128xbf16> to vector<12x16x128xbf16>
    %c0_14 = arith.constant 0 : index
    %c0_15 = arith.constant 0 : index
    %c384 = arith.constant 384 : index
    %15 = vector.load %arg6[%c0_14, %c0_15, %c384] : memref<12x16x640xbf16, #tpu.memory_space<vmem>>, vector<12x16x128xbf16>
    tpu.vector_store %arg6[%c0_14, %c0_15, %c384], %14 {strides = array<i32>} : memref<12x16x640xbf16, #tpu.memory_space<vmem>>, vector<12x16x128xbf16>,
    %16 = vector.extract_strided_slice %7 {offsets = [0, 4, 0], sizes = [12, 16, 128], strides = [1, 1, 1]} : vector<12x24x128xbf16> to vector<12x16x128xbf16>
    %c0_16 = arith.constant 0 : index
    %c0_17 = arith.constant 0 : index
    %c512 = arith.constant 512 : index
    %17 = vector.load %arg6[%c0_16, %c0_17, %c512] : memref<12x16x640xbf16, #tpu.memory_space<vmem>>, vector<12x16x128xbf16>
    tpu.vector_store %arg6[%c0_16, %c0_17, %c512], %16 {strides = array<i32>} : memref<12x16x640xbf16, #tpu.memory_space<vmem>>, vector<12x16x128xbf16>,
    %c0_18 = arith.constant 0 : index
    %c0_19 = arith.constant 0 : index
    %c0_20 = arith.constant 0 : index
    %18 = vector.load %arg6[%c0_18, %c0_19, %c0_20] : memref<12x16x640xbf16, #tpu.memory_space<vmem>>, vector<8x16x640xbf16>
    %19 = vector.shape_cast %18 : vector<8x16x640xbf16> to vector<128x640xbf16>
    %c0_21 = arith.constant 0 : index
    %c0_22 = arith.constant 0 : index
    %c0_23 = arith.constant 0 : index
    %20 = vector.load %arg4[%c0_21, %c0_22, %c0_23] : memref<5x640x128xbf16, #tpu.memory_space<vmem>>, vector<1x640x128xbf16>
    %21 = vector.shape_cast %20 : vector<1x640x128xbf16> to vector<640x128xbf16>
    %cst_24 = arith.constant dense<0.000000e+00> : vector<128x128xf32>
    %22 = tpu.matmul %19, %21, %cst_24 {dimension_numbers = #tpu.dot_dimension_numbers<[1], [0], [0], [1], [0, 0, 1, 1], [], []>} : vector<128x640xbf16>, vector<640x128xbf16>, vector<128x128xf32> -> vector<128x128xf32>
    %c1 = arith.constant 1 : index
    %c0_25 = arith.constant 0 : index
    %c0_26 = arith.constant 0 : index
    %23 = vector.load %arg6[%c1, %c0_25, %c0_26] : memref<12x16x640xbf16, #tpu.memory_space<vmem>>, vector<8x16x640xbf16>
    %24 = vector.shape_cast %23 : vector<8x16x640xbf16> to vector<128x640xbf16>
    %c1_27 = arith.constant 1 : index
    %c0_28 = arith.constant 0 : index
    %c0_29 = arith.constant 0 : index
    %25 = vector.load %arg4[%c1_27, %c0_28, %c0_29] : memref<5x640x128xbf16, #tpu.memory_space<vmem>>, vector<1x640x128xbf16>
    %26 = vector.shape_cast %25 : vector<1x640x128xbf16> to vector<640x128xbf16>
    %cst_30 = arith.constant dense<0.000000e+00> : vector<128x128xf32>
    %27 = tpu.matmul %24, %26, %cst_30 {dimension_numbers = #tpu.dot_dimension_numbers<[1], [0], [0], [1], [0, 0, 1, 1], [], []>} : vector<128x640xbf16>, vector<640x128xbf16>, vector<128x128xf32> -> vector<128x128xf32>
    %28 = arith.addf %22, %27 : vector<128x128xf32>
    %c2 = arith.constant 2 : index
    %c0_31 = arith.constant 0 : index
    %c0_32 = arith.constant 0 : index
    %29 = vector.load %arg6[%c2, %c0_31, %c0_32] : memref<12x16x640xbf16, #tpu.memory_space<vmem>>, vector<8x16x640xbf16>
    %30 = vector.shape_cast %29 : vector<8x16x640xbf16> to vector<128x640xbf16>
    %c2_33 = arith.constant 2 : index
    %c0_34 = arith.constant 0 : index
    %c0_35 = arith.constant 0 : index
    %31 = vector.load %arg4[%c2_33, %c0_34, %c0_35] : memref<5x640x128xbf16, #tpu.memory_space<vmem>>, vector<1x640x128xbf16>
    %32 = vector.shape_cast %31 : vector<1x640x128xbf16> to vector<640x128xbf16>
    %cst_36 = arith.constant dense<0.000000e+00> : vector<128x128xf32>
    %33 = tpu.matmul %30, %32, %cst_36 {dimension_numbers = #tpu.dot_dimension_numbers<[1], [0], [0], [1], [0, 0, 1, 1], [], []>} : vector<128x640xbf16>, vector<640x128xbf16>, vector<128x128xf32> -> vector<128x128xf32>
    %34 = arith.addf %28, %33 : vector<128x128xf32>
    %c3 = arith.constant 3 : index
    %c0_37 = arith.constant 0 : index
    %c0_38 = arith.constant 0 : index
    %35 = vector.load %arg6[%c3, %c0_37, %c0_38] : memref<12x16x640xbf16, #tpu.memory_space<vmem>>, vector<8x16x640xbf16>
    %36 = vector.shape_cast %35 : vector<8x16x640xbf16> to vector<128x640xbf16>
    %c3_39 = arith.constant 3 : index
    %c0_40 = arith.constant 0 : index
    %c0_41 = arith.constant 0 : index
    %37 = vector.load %arg4[%c3_39, %c0_40, %c0_41] : memref<5x640x128xbf16, #tpu.memory_space<vmem>>, vector<1x640x128xbf16>
    %38 = vector.shape_cast %37 : vector<1x640x128xbf16> to vector<640x128xbf16>
    %cst_42 = arith.constant dense<0.000000e+00> : vector<128x128xf32>
    %39 = tpu.matmul %36, %38, %cst_42 {dimension_numbers = #tpu.dot_dimension_numbers<[1], [0], [0], [1], [0, 0, 1, 1], [], []>} : vector<128x640xbf16>, vector<640x128xbf16>, vector<128x128xf32> -> vector<128x128xf32>
    %40 = arith.addf %34, %39 : vector<128x128xf32>
    %c4 = arith.constant 4 : index
    %c0_43 = arith.constant 0 : index
    %c0_44 = arith.constant 0 : index
    %41 = vector.load %arg6[%c4, %c0_43, %c0_44] : memref<12x16x640xbf16, #tpu.memory_space<vmem>>, vector<8x16x640xbf16>
    %42 = vector.shape_cast %41 : vector<8x16x640xbf16> to vector<128x640xbf16>
    %c4_45 = arith.constant 4 : index
    %c0_46 = arith.constant 0 : index
    %c0_47 = arith.constant 0 : index
    %43 = vector.load %arg4[%c4_45, %c0_46, %c0_47] : memref<5x640x128xbf16, #tpu.memory_space<vmem>>, vector<1x640x128xbf16>
    %44 = vector.shape_cast %43 : vector<1x640x128xbf16> to vector<640x128xbf16>
    %cst_48 = arith.constant dense<0.000000e+00> : vector<128x128xf32>
    %45 = tpu.matmul %42, %44, %cst_48 {dimension_numbers = #tpu.dot_dimension_numbers<[1], [0], [0], [1], [0, 0, 1, 1], [], []>} : vector<128x640xbf16>, vector<640x128xbf16>, vector<128x128xf32> -> vector<128x128xf32>
    %46 = arith.addf %40, %45 : vector<128x128xf32>
    %cst_49 = arith.constant 0.000000e+00 : f32
    %47 = vector.broadcast %cst_49 : f32 to vector<128x128xf32>
    %48 = arith.maximumf %46, %47 : vector<128x128xf32>
    %49 = vector.shape_cast %48 : vector<128x128xf32> to vector<1x8x16x128xf32>
    %c0_50 = arith.constant 0 : index
    %c0_51 = arith.constant 0 : index
    %c0_52 = arith.constant 0 : index
    %c0_53 = arith.constant 0 : index
    %50 = vector.load %arg5[%c0_50, %c0_51, %c0_52, %c0_53] : memref<1x8x16x128xf32, #tpu.memory_space<vmem>>, vector<1x8x16x128xf32>
    tpu.vector_store %arg5[%c0_50, %c0_51, %c0_52, %c0_53], %49 {strides = array<i32>} : memref<1x8x16x128xf32, #tpu.memory_space<vmem>>, vector<1x8x16x128xf32>,
    return
  }
  func.func @transform_0(%arg0: i32, %arg1: i32) -> (i32, i32, i32, i32, i32) {
    %c0_i32 = arith.constant 0 : i32
    %c0_i32_0 = arith.constant 0 : i32
    %c0_i32_1 = arith.constant 0 : i32
    %c0_i32_2 = arith.constant 0 : i32
    return %arg0, %arg1, %c0_i32, %c0_i32_0, %c0_i32_1 : i32, i32, i32, i32, i32
  }
  func.func @transform_1(%arg0: i32, %arg1: i32) -> (i32, i32) {
    %c0_i32 = arith.constant 0 : i32
    %c0_i32_0 = arith.constant 0 : i32
    %c0_i32_1 = arith.constant 0 : i32
    return %c0_i32, %c0_i32_0 : i32, i32
  }
  func.func @transform_2(%arg0: i32, %arg1: i32) -> (i32, i32, i32) {
    %c0_i32 = arith.constant 0 : i32
    %c0_i32_0 = arith.constant 0 : i32
    %c0_i32_1 = arith.constant 0 : i32
    %c0_i32_2 = arith.constant 0 : i32
    return %c0_i32, %c0_i32_0, %c0_i32_1 : i32, i32, i32
  }
  func.func @transform_3(%arg0: i32, %arg1: i32) -> (i32, i32, i32, i32) {
    %c0_i32 = arith.constant 0 : i32
    %c0_i32_0 = arith.constant 0 : i32
    %c0_i32_1 = arith.constant 0 : i32
    return %arg0, %arg1, %c0_i32, %c0_i32_0 : i32, i32, i32, i32
  }
}

</mosaic_0001>

<bundles_post_ra>
// kernel: prep_network2.1
= control target key start
LH: loop header
LB: loop body
LE: loop exit
PB: predicated region body
PF: predicated region fallthrough
CT: control target
= control target key end

     0   :  { %s6776_s12 = smov 0   ;;  %s6778_s13 = smov 0   ;;  %s8546_s0 = inlined_call_operand.vmem [shape: bf16[2,2,12,24,256], index: 0, kind: input, shape index: {}]   ;;  %s8547_s1 = inlined_call_operand.vmem [shape: bf16[256,128], index: 1, kind: input, shape index: {}]   ;;  %s8548_s2 = inlined_call_operand.vmem [shape: bf16[5,640,128], index: 2, kind: input, shape index: {}]   ;;  %s8549_s3 = inlined_call_operand.vmem [shape: f32[2,16,16,128], index: 3, kind: output, shape index: {}]  }
   0x1   :  { %s6780_s14 = smov 0   ;;  %s6782_s15 = smov 0  }
   0x2   :  { %s6784_s16 = smov 0  }
   0x3 LB: > { %s22_s17 = sadd.s32 1, %s6745_s14  ;;  %s25_s18 = sadd.s32 1, %s6749_s15  ;;  %s6753_s16 = sphi %s6784_s16, %s13_s16   ;;  %s6749_s15 = sphi %s6782_s15, %s8641_s15   ;;  %s6745_s14 = sphi %s6780_s14, %s8640_s14   ;;  %s6741_s13 = sphi %s6778_s13, %s8639_s13   ;;  %s6737_s12 = sphi %s6776_s12, %s8638_s12  }
   0x4   : > { %p23_p0 = scmp.ge.s32.totalorder %s22_s17, 2  ;;  %p4758_p1 = scmp.ge.s32.totalorder %s6753_s16, 1 }
   0x5   : > { %p157_p2 = scmp.lt.s32.totalorder %s6753_s16, 5 }
   0x6   : > { %s8643_s17 = smov (%p23_p0, %s22_s17), 0  ;;  %s8645_s18 = smov (!%p23_p0, %s25_s18), %s6749_s15 }
   0x7   : > { %p158_p3 = pnand %p4758_p1, %p157_p2  ;;  %p27_p4 = scmp.ge.s32.totalorder %s8645_s18, 2 }
   0x9   : > { %s8647_s18 = smov (%p27_p4, %s8645_s18), 0  ;;  %161 = sbr.rel (%p158_p3) target bundleno = 1043 (0x413), region = 32 }
  0x10   : > { %v6445_v0 = vld [vmem:[%s8547_s1] sm:$0xff]   ;;  %v6755_v1 = vmov 0   ;;  %p190_p5 = scmp.lt.s32.totalorder %s6741_s13, 1  ;;  %v6446_v2 = vld [vmem:[%s8547_s1 + $0x8] sm:$0xff]   ;;  %p192_p6 = scmp.lt.s32.totalorder %s6737_s12, 1  ;;  %v6447_v3 = vld [vmem:[%s8547_s1 + $0x10] sm:$0xff]  }
  0x11   : > { %555 = vmatprep.subr.bf16.mxu0 %v6755_v1  ;;  %v6448_v4 = vld [vmem:[%s8547_s1 + $0x18] sm:$0xff]   ;;  %v6449_v5 = vld [vmem:[%s8547_s1 + $0x20] sm:$0xff]   ;;  %v6450_v7 = vld [vmem:[%s8547_s1 + $0x28] sm:$0xff]   ;;  %vm888_vm0 = vsmask.f32 7424  ;;  %vm1057_vm2 = vcmask 1046528  }
  0x12   : > { %556 = vmatpush1.bf16.msra.mxu0 %v6445_v0  ;;  %s8649_s13 = smov (!%p190_p5, %s6741_s13), 1  ;;  %v6451_v8 = vld [vmem:[%s8547_s1 + $0x30] sm:$0xff]   ;;  %v6452_v9 = vld [vmem:[%s8547_s1 + $0x38] sm:$0xff]   ;;  %v6453_v10 = vld [vmem:[%s8547_s1 + $0x40] sm:$0xff]   ;;  %vm1118_vm1 = vsmask.f32 6400 }
  0x13   : > { %557 = vmatprep.subr.bf16.mxu0 %v6755_v1  ;;  %s193_s23 = scalar_select %p192_p6, %s6737_s12, 1  ;;  %v6454_v11 = vld [vmem:[%s8547_s1 + $0x48] sm:$0xff]   ;;  %v6455_v12 = vld [vmem:[%s8547_s1 + $0x50] sm:$0xff]   ;;  %v6456_v13 = vld [vmem:[%s8547_s1 + $0x58] sm:$0xff]   ;;  %vm1251_vm3 = vcmask 1045504  }
  0x14   : > { %s6403_s24 = smul.u32 144, %s8649_s13  ;;  %v6457_v14 = vld [vmem:[%s8547_s1 + $0x60] sm:$0xff]   ;;  %v6458_v15 = vld [vmem:[%s8547_s1 + $0x68] sm:$0xff]   ;;  %v6459_v16 = vld [vmem:[%s8547_s1 + $0x70] sm:$0xff]   ;;  %s4762_s25 = sshll.u32 %s8649_s13, 5 }
  0x15   : > { %s6402_s27 = smul.u32 72, %s193_s23  ;;  %v6460_v17 = vld [vmem:[%s8547_s1 + $0x78] sm:$0xff]   ;;  %v6506_v18 = vld [vmem:[%s8548_s2 + $0xc0] sm:$0xff]   ;;  %v6508_v22 = vld [vmem:[%s8548_s2 + $0xc8] sm:$0xff]   ;;  %s4760_s23 = sshll.u32 %s6737_s12, 3 }
  0x16   : > { %558 = vmatpush1.bf16.msra.mxu0 %v6446_v2  ;;  %v6507_v21 = vld [vmem:[%s8548_s2 + $0x80] sm:$0xff]   ;;  %v6509_v23 = vld [vmem:[%s8548_s2 + $0x88] sm:$0xff]   ;;  %v6513_v24 = vld [vmem:[%s8548_s2 + $0xd0] sm:$0xff]   ;;  %p202_p7 = scmp.lt.s32.totalorder %s4760_s23, 15 }
  0x17   : > { %559 = vmatprep.subr.bf16.mxu0 %v6755_v1  ;;  %s196_s28 = sadd.s32 %s6403_s24, %s6402_s27  ;;  %v6514_v27 = vld [vmem:[%s8548_s2 + $0x90] sm:$0xff]   ;;  %v6515_v47 = vld [vmem:[%s8548_s2 + $0xd8] sm:$0xff]   ;;  %v6517_v49 = vld [vmem:[%s8548_s2 + $0x180] sm:$0xff]  }
  0x18   : > { %s4759_s4 = sshll.u32 %s196_s28, 2  ;;  %v6516_v48 = vld [vmem:[%s8548_s2 + $0x98] sm:$0xff]   ;;  %v6520_v51 = vld [vmem:[%s8548_s2 + $0x140] sm:$0xff]   ;;  %5362 = vmatprep.subr.bf16.mxu1 %v6517_v49  ;;  %v6524_v54 = vld [vmem:[%s8548_s2 + $0x188] sm:$0xff]   ;;  %s8651_s23 = smov (!%p202_p7, %s4760_s23), 15 }
  0x19   : > { %s6831_s9 = scalar_lea.vmem %s8546_s0, %s4759_s4  ;;  %v6522_v52 = vld [vmem:[%s8548_s2 + $0xe0] sm:$0xff]   ;;  %5363 = vmatpush3.bf16.msra.mxu1 %v6520_v51  ;;  %v6525_v55 = vld [vmem:[%s8548_s2 + $0x148] sm:$0xff]   ;;  %v6528_v59 = vld [vmem:[%s8548_s2 + $0x190] sm:$0xff]   ;;  %s4761_s24 = sshll.u32 %s8651_s23, 1 }
  0x1a   : > { %560 = vmatpush1.bf16.msra.mxu0 %v6447_v3  ;;  %v6463_v6 = vld [vmem:[%s6831_s9 + $0x4] ss:$8 sps:$4 sm:$0xff]   ;;  %v6461_v19 = vld [vmem:[%s6831_s9] ss:$8 sps:$4 sm:$0xff]   ;;  %v6464_v20 = vld [vmem:[%s6831_s9 + $0x14] ss:$8 sps:$4 sm:$0xff]   ;;  %5364 = vmatprep.subr.bf16.mxu1 %v6524_v54  ;;  %s206_s26 = sadd.s32 %s4762_s25, %s4761_s24 }
  0x1b   : > { %561 = vmatprep.subr.bf16.mxu0 %v6755_v1  ;;  %587 = vmatprep.mubr.bf16.mxu0 %v6463_v6  ;;  %v6466_v25 = vld [vmem:[%s6831_s9 + $0x10] ss:$8 sps:$4 sm:$0xff]   ;;  %v6467_v26 = vld [vmem:[%s6831_s9 + $0x24] ss:$8 sps:$4 sm:$0xff]   ;;  %v6469_v28 = vld [vmem:[%s6831_s9 + $0x20] ss:$8 sps:$4 sm:$0xff]  }
  0x1c   : > { %v6470_v29 = vld [vmem:[%s6831_s9 + $0x34] ss:$8 sps:$4 sm:$0xff]   ;;  %v6472_v30 = vld [vmem:[%s6831_s9 + $0x30] ss:$8 sps:$4 sm:$0xff]   ;;  %v6473_v31 = vld [vmem:[%s6831_s9 + $0x44] ss:$8 sps:$4 sm:$0xff]  }
  0x1d   : > { %v6475_v32 = vld [vmem:[%s6831_s9 + $0x40] ss:$8 sps:$4 sm:$0xff]   ;;  %v6476_v33 = vld [vmem:[%s6831_s9 + $0x54] ss:$8 sps:$4 sm:$0xff]   ;;  %v6478_v34 = vld [vmem:[%s6831_s9 + $0x50] ss:$8 sps:$4 sm:$0xff]   ;;  %5365 = vmatpush3.bf16.msra.mxu1 %v6525_v55 }
  0x1e   : > { %562 = vmatpush1.bf16.msra.mxu0 %v6448_v4  ;;  %v6479_v35 = vld [vmem:[%s6831_s9 + $0x64] ss:$8 sps:$4 sm:$0xff]   ;;  %v6481_v36 = vld [vmem:[%s6831_s9 + $0x60] ss:$8 sps:$4 sm:$0xff]   ;;  %v6482_v37 = vld [vmem:[%s6831_s9 + $0x74] ss:$8 sps:$4 sm:$0xff]   ;;  %5366 = vmatprep.subr.bf16.mxu1 %v6528_v59 }
  0x1f   : > { %563 = vmatprep.subr.bf16.mxu0 %v6755_v1  ;;  %v6484_v38 = vld [vmem:[%s6831_s9 + $0x70] ss:$8 sps:$4 sm:$0xff]   ;;  %v6485_v39 = vld [vmem:[%s6831_s9 + $0x84] ss:$8 sps:$4 sm:$0xff]   ;;  %v6487_v40 = vld [vmem:[%s6831_s9 + $0x80] ss:$8 sps:$4 sm:$0xff]  }
  0x20   : > { %v6488_v41 = vld [vmem:[%s6831_s9 + $0x94] ss:$8 sps:$4 sm:$0xff]   ;;  %v6490_v42 = vld [vmem:[%s6831_s9 + $0x90] ss:$8 sps:$4 sm:$0xff]   ;;  %v6491_v43 = vld [vmem:[%s6831_s9 + $0xa4] ss:$8 sps:$4 sm:$0xff]  }
  0x21   : > { %v6493_v44 = vld [vmem:[%s6831_s9 + $0xa0] ss:$8 sps:$4 sm:$0xff]   ;;  %v6494_v45 = vld [vmem:[%s6831_s9 + $0xb4] ss:$8 sps:$4 sm:$0xff]   ;;  %v6496_v46 = vld [vmem:[%s6831_s9 + $0xb0] ss:$8 sps:$4 sm:$0xff]  }
  0x22   : > { %564 = vmatpush1.bf16.msra.mxu0 %v6449_v5  ;;  %v6497_v50 = vld [vmem:[%s6831_s9 + $0xc4] ss:$8 sps:$4 sm:$0xff]   ;;  %v6499_v56 = vld [vmem:[%s6831_s9 + $0xc0] ss:$8 sps:$4 sm:$0xff]   ;;  %v6500_v60 = vld [vmem:[%s6831_s9 + $0xd4] ss:$8 sps:$4 sm:$0xff]  }
  0x23   : > { %565 = vmatprep.subr.bf16.mxu0 %v6755_v1  ;;  %v6523_v53 = vld [vmem:[%s8548_s2 + $0xa0] sm:$0xff]   ;;  %v6526_v57 = vld [vmem:[%s8548_s2 + $0xe8] sm:$0xff]   ;;  %v6531_v61 = vld [vmem:[%s8548_s2 + $0x150] sm:$0xff]   ;;  %s4763_s27 = sshll.u32 %s206_s26, 3 }
  0x24   : > { %v6527_v58 = vld [vmem:[%s8548_s2 + $0xa8] sm:$0xff]   ;;  %v6533_v62 = vld [vmem:[%s8548_s2 + $0xf0] sm:$0xff]   ;;  %5367 = vmatpush3.bf16.msra.mxu1 %v6531_v61  ;;  %v6535_v0 = vld [vmem:[%s8548_s2 + $0x198] sm:$0xff]   ;;  %s8499_s30 = scalar_lea.vmem %s8549_s3, %s4763_s27 }
  0x25   : > { %v6534_v63 = vld [vmem:[%s8548_s2 + $0xb0] sm:$0xff]   ;;  %5368 = vmatprep.subr.bf16.mxu1 %v6535_v0  ;;  %v6537_v2 = vld [vmem:[%s8548_s2 + $0xf8] sm:$0xff]   ;;  %v6539_v5 = vld [vmem:[%s8548_s2 + $0x1a0] sm:$0xff]  }
  0x26   : > { %566 = vmatpush1.bf16.msra.mxu0 %v6450_v7  ;;  %v6502_v3 = vld [vmem:[%s6831_s9 + $0xd0] ss:$8 sps:$4 sm:$0xff]   ;;  %v6503_v6 = vld [vmem:[%s6831_s9 + $0xe4] ss:$8 sps:$4 sm:$0xff]  }
  0x27   : > { %567 = vmatprep.subr.bf16.mxu0 %v6755_v1  ;;  %v6538_v4 = vld [vmem:[%s8548_s2 + $0xb8] sm:$0xff]   ;;  %v6540_v7 = vld [vmem:[%s8548_s2 + $0x160] sm:$0xff]  }
  0x2a   : > { %568 = vmatpush1.bf16.msra.mxu0 %v6451_v8  ;;  %v6541_v8 = vld [vmem:[%s8548_s2 + $0x1a8] sm:$0xff]  }
  0x2b   : > { %569 = vmatprep.subr.bf16.mxu0 %v6755_v1 }
  0x2e   : > { %570 = vmatpush1.bf16.msra.mxu0 %v6452_v9  ;;  %v6542_v9 = vld [vmem:[%s8548_s2 + $0x168] sm:$0xff]  }
  0x2f   : > { %571 = vmatprep.subr.bf16.mxu0 %v6755_v1 }
  0x32   : > { %572 = vmatpush1.bf16.msra.mxu0 %v6453_v10  ;;  %v6505_v10 = vld [vmem:[%s6831_s9 + $0xe0] ss:$8 sps:$4 sm:$0xff]  }
  0x33   : > { %573 = vmatprep.subr.bf16.mxu0 %v6755_v1 }
  0x36   : > { %574 = vmatpush1.bf16.msra.mxu0 %v6454_v11  ;;  %v6510_v11 = vld [vmem:[%s6831_s9 + $0xf4] ss:$8 sps:$4 sm:$0xff]  }
  0x37   : > { %575 = vmatprep.subr.bf16.mxu0 %v6755_v1 }
  0x3a   : > { %576 = vmatpush1.bf16.msra.mxu0 %v6455_v12  ;;  %v6543_v12 = vld [vmem:[%s8548_s2 + $0x1b0] sm:$0xff]  }
  0x3b   : > { %577 = vmatprep.subr.bf16.mxu0 %v6755_v1 }
  0x3e   : > { %578 = vmatpush1.bf16.msra.mxu0 %v6456_v13  ;;  %v6544_v13 = vld [vmem:[%s8548_s2 + $0x170] sm:$0xff]  }
  0x3f   : > { %579 = vmatprep.subr.bf16.mxu0 %v6755_v1 }
  0x42   : > { %580 = vmatpush1.bf16.msra.mxu0 %v6457_v14  ;;  %v6545_v14 = vld [vmem:[%s8548_s2 + $0x1b8] sm:$0xff]  }
  0x43   : > { %581 = vmatprep.subr.bf16.mxu0 %v6755_v1 }
  0x46   : > { %582 = vmatpush1.bf16.msra.mxu0 %v6458_v15  ;;  %v6546_v15 = vld [vmem:[%s8548_s2 + $0x178] sm:$0xff]  }
  0x47   : > { %583 = vmatprep.subr.bf16.mxu0 %v6755_v1 }
  0x4a   : > { %584 = vmatpush1.bf16.msra.mxu0 %v6459_v16  ;;  %v6512_v16 = vld [vmem:[%s6831_s9 + $0xf0] ss:$8 sps:$4 sm:$0xff]  }
  0x4b   : > { %585 = vmatprep.subr.bf16.mxu0 %v6755_v1  ;;  %v6536_v1 = vld [vmem:[%s8548_s2 + $0x158] sm:$0xff]  }
  0x4c   : > { %5369 = vmatpush3.bf16.msra.mxu1 %v6536_v1 }
  0x4d   : > { %5370 = vmatprep.subr.bf16.mxu1 %v6539_v5 }
  0x4e   : > { %586 = vmatpush1.bf16.msra.mxu0 %v6460_v17  ;;  %v6518_v17 = vld [vmem:[%s6831_s9 + $0x104] ss:$8 sps:$4 sm:$0xff]  }
  0x4f   : > { %5570 = vmatprep.subr.bf16.mxu0 %v6506_v18  ;;  %v6521_v18 = vld [vmem:[%s6831_s9 + $0x100] ss:$8 sps:$4 sm:$0xff]  }
  0x50   : > { %5371 = vmatpush3.bf16.msra.mxu1 %v6540_v7  ;;  %v6561_v7 = vld [vmem:[%s8548_s2 + $0x2d0] sm:$0xff]  }
  0x51   : > { %588 = vmatmul.mubr.bf16.vlgmr.msra.gmra.mrb[0].mxu0 %v6461_v19  ;;  %5372 = vmatprep.subr.bf16.mxu1 %v6541_v8  ;;  %v6529_v19 = vld [vmem:[%s6831_s9 + $0x114] ss:$8 sps:$4 sm:$0xff]  }
  0x52   : > { %595 = vmatprep.mubr.bf16.mxu0 %v6464_v20  ;;  %5571 = vmatpush3.bf16.msra.mxu0 %v6507_v21  ;;  %v6532_v20 = vld [vmem:[%s6831_s9 + $0x110] ss:$8 sps:$4 sm:$0xff]   ;;  %v6547_v21 = vld [vmem:[%s8548_s2 + $0x200] sm:$0xff]  }
  0x53   : > { %5572 = vmatprep.subr.bf16.mxu0 %v6508_v22  ;;  %v6555_v22 = vld [vmem:[%s8548_s2 + $0x2c0] sm:$0xff]  }
  0x54   : > { %5373 = vmatpush3.bf16.msra.mxu1 %v6542_v9 }
  0x55   : > { %5374 = vmatprep.subr.bf16.mxu1 %v6543_v12 }
  0x56   : > { %5573 = vmatpush3.bf16.msra.mxu0 %v6509_v23 }
  0x57   : > { %5574 = vmatprep.subr.bf16.mxu0 %v6513_v24 }
  0x58   : > { %5375 = vmatpush3.bf16.msra.mxu1 %v6544_v13 }
  0x59   : > { %596 = vmatmul.mubr.bf16.gmra.mrb[4].mxu0 %v6466_v25  ;;  %5376 = vmatprep.subr.bf16.mxu1 %v6545_v14  ;;  %v6562_v14 = vld [vmem:[%s8548_s2 + $0x290] sm:$0xff]  }
  0x5a   : > { %603 = vmatprep.mubr.bf16.mxu0 %v6467_v26  ;;  %5575 = vmatpush3.bf16.msra.mxu0 %v6514_v27 }
  0x5b   : > { %5576 = vmatprep.subr.bf16.mxu0 %v6515_v47 }
  0x5c   : > { %5377 = vmatpush3.bf16.msra.mxu1 %v6546_v15 }
  0x5d   : > { %5426 = vmatprep.subr.bf16.mxu1 %v6547_v21 }
  0x5e   : > { %5577 = vmatpush3.bf16.msra.mxu0 %v6516_v48 }
  0x5f   : > { %5578 = vmatprep.subr.bf16.mxu0 %v6522_v52 }
  0x61   : > { %604 = vmatmul.mubr.bf16.gmra.mrb[8].mxu0 %v6469_v28 }
  0x62   : > { %611 = vmatprep.mubr.bf16.mxu0 %v6470_v29  ;;  %5579 = vmatpush3.bf16.msra.mxu0 %v6523_v53 }
  0x63   : > { %5580 = vmatprep.subr.bf16.mxu0 %v6526_v57 }
  0x66   : > { %5581 = vmatpush3.bf16.msra.mxu0 %v6527_v58 }
  0x67   : > { %5582 = vmatprep.subr.bf16.mxu0 %v6533_v62  ;;  %v6557_v62 = vld [vmem:[%s8548_s2 + $0x2c8] sm:$0xff]  }
  0x69   : > { %612 = vmatmul.mubr.bf16.gmra.mrb[12].mxu0 %v6472_v30 }
  0x6a   : > { %619 = vmatprep.mubr.bf16.mxu0 %v6473_v31  ;;  %5583 = vmatpush3.bf16.msra.mxu0 %v6534_v63 }
  0x6b   : > { %5584 = vmatprep.subr.bf16.mxu0 %v6537_v2  ;;  %v6558_v2 = vld [vmem:[%s8548_s2 + $0x288] sm:$0xff]  }
  0x6e   : > { %5585 = vmatpush3.bf16.msra.mxu0 %v6538_v4 }
  0x6f   : > { %5650 = vmatprep.subr.bf16.mxu0 %v6555_v22 }
  0x71   : > { %620 = vmatmul.mubr.bf16.gmra.mrb[16].mxu0 %v6475_v32 }
  0x72   : > { %627 = vmatprep.mubr.bf16.mxu0 %v6476_v33 }
  0x79   : > { %628 = vmatmul.mubr.bf16.gmra.mrb[20].mxu0 %v6478_v34 }
  0x7a   : > { %635 = vmatprep.mubr.bf16.mxu0 %v6479_v35 }
  0x81   : > { %636 = vmatmul.mubr.bf16.gmra.mrb[24].mxu0 %v6481_v36 }
  0x82   : > { %643 = vmatprep.mubr.bf16.mxu0 %v6482_v37 }
  0x89   : > { %644 = vmatmul.mubr.bf16.gmra.mrb[28].mxu0 %v6484_v38 }
  0x8a   : > { %651 = vmatprep.mubr.bf16.mxu0 %v6485_v39 }
  0x91   : > { %652 = vmatmul.mubr.bf16.gmra.mrb[32].mxu0 %v6487_v40 }
  0x92   : > { %659 = vmatprep.mubr.bf16.mxu0 %v6488_v41 }
  0x99   : > { %660 = vmatmul.mubr.bf16.gmra.mrb[36].mxu0 %v6490_v42 }
  0x9a   : > { %667 = vmatprep.mubr.bf16.mxu0 %v6491_v43 }
  0xa1   : > { %668 = vmatmul.mubr.bf16.gmra.mrb[40].mxu0 %v6493_v44 }
  0xa2   : > { %675 = vmatprep.mubr.bf16.mxu0 %v6494_v45 }
  0xa9   : > { %676 = vmatmul.mubr.bf16.gmra.mrb[44].mxu0 %v6496_v46 }
  0xaa   : > { %683 = vmatprep.mubr.bf16.mxu0 %v6497_v50 }
  0xb1   : > { %684 = vmatmul.mubr.bf16.gmra.mrb[48].mxu0 %v6499_v56  ;;  %v6556_v56 = vld [vmem:[%s8548_s2 + $0x280] sm:$0xff]  }
  0xb2   : > { %691 = vmatprep.mubr.bf16.mxu0 %v6500_v60 }
  0xb9   : > { %692 = vmatmul.mubr.bf16.gmra.mrb[52].mxu0 %v6502_v3 }
  0xba   : > { %699 = vmatprep.mubr.bf16.mxu0 %v6503_v6 }
  0xc1   : > { %700 = vmatmul.mubr.bf16.gmra.mrb[56].mxu0 %v6505_v10 }
  0xc2   : > { %707 = vmatprep.mubr.bf16.mxu0 %v6510_v11 }
  0xc9   : > { %708 = vmatmul.mubr.bf16.gmra.mrb[60].mxu0 %v6512_v16 }
  0xca   : > { %715 = vmatprep.mubr.bf16.mxu0 %v6518_v17 }
  0xd1   : > { %716 = vmatmul.mubr.bf16.gmra.mrb[64].mxu0 %v6521_v18 }
  0xd2   : > { %723 = vmatprep.mubr.bf16.mxu0 %v6529_v19 }
  0xd9   : > { %724 = vmatmul.mubr.bf16.gmra.mrb[68].mxu0 %v6532_v20  ;;  %v6563_v20 = vld [vmem:[%s8548_s2 + $0x2d8] sm:$0xff]  }
 0x124   : > { %v589_v23 = vpop.f32.mrb[0].mxu0 }
 0x125   : > { %v591_v24 = vpop.f32.mrb[1].mxu0  ;;  %v732_v26 = vmax.f32 %v589_v23, 0.0 }
 0x126   : > { %v592_v25 = vpop.f32.mrb[2].mxu0 }
 0x127   : > { %v733_v27 = vmax.f32 %v592_v25, 0.0  ;;  %v594_v28 = vpop.f32.mrb[3].mxu0 }
 0x129   : > { %v7004_v29 = vpack.c.bf16 %v733_v27, %v732_v26 }
 0x12b   : > { %v892_v30 = vshll.u32 %v7004_v29, 16  ;;  %v890_v32 = vshrl.u32 %v7004_v29, 16  ;;  %v1058_v55 = vrot.slane %v7004_v29, 1 }
 0x12c   : > { %v597_v31 = vpop.f32.mrb[4].mxu0 }
 0x12d   : > { %v734_v33 = vmax.f32 %v597_v31, 0.0  ;;  %v599_v34 = vpop.f32.mrb[5].mxu0  ;;  %v894_v35 = vrot.slane %v892_v30, 1  ;;  %v1119_v41 = vrot.slane %v890_v32, 1  ;;  %v1120_v44 = vrot.slane %v892_v30, 2 }
 0x12e   : > { %v600_v36 = vpop.f32.mrb[6].mxu0 }
 0x12f   : > { %v7008_v37 = vpack.c.bf16 %v734_v33, %v734_v33  ;;  %v735_v38 = vmax.f32 %v600_v36, 0.0  ;;  %v602_v39 = vpop.f32.mrb[7].mxu0  ;;  %v895_v40 = vor.u32 %v894_v35, %v890_v32  ;;  %v1121_v52 = vor.u32 %v1120_v44, %v1119_v41  ;;  %v6548_v35 = vld [vmem:[%s8548_s2 + $0x1c0] sm:$0xff]   ;;  %v6564_v36 = vld [vmem:[%s8548_s2 + $0x298] sm:$0xff]  }
 0x131   : > { %v769_v42 = vpack.c.bf16 %v735_v38, %v734_v33  ;;  %v897_v43 = vshll.u32 %v7008_v37, 16  ;;  %v1122_v45 = vshrl.u32 %v7008_v37, 16  ;;  %v1059_v49 = vrot.slane %v7008_v37, 1 }
 0x133   : > { %v1124_v46 = vrot.slane %v1122_v45, 1  ;;  %v1125_v47 = vrot.slane %v897_v43, 2  ;;  %v899_v50 = vrot.slane %v897_v43, 1  ;;  %v1060_v63 = vsel %vm1057_vm2, %v1058_v55, %v1059_v49  ;;  %v6567_v43 = vld [vmem:[%s8548_s2 + $0x2e0] sm:$0xff]  }
 0x134   : > { %v605_v48 = vpop.f32.mrb[8].mxu0  ;;  %v807_v3 = vunpack.c.h.b16 %v769_v42  ;;  %v6549_v42 = vld [vmem:[%s8548_s2 + $0x208] sm:$0xff]  }
 0x135   : > { %v607_v51 = vpop.f32.mrb[9].mxu0  ;;  %v1126_v53 = vor.u32 %v1125_v47, %v1124_v46  ;;  %v7018_v57 = vsel %vm888_vm0, %v895_v40, %v899_v50  ;;  %v736_v58 = vmax.f32 %v605_v48, 0.0 }
 0x136   : > { %v608_v54 = vpop.f32.mrb[10].mxu0  ;;  %v6550_v51 = vld [vmem:[%s8548_s2 + $0x1c8] sm:$0xff]  }
 0x137   : > { %v737_v59 = vmax.f32 %v608_v54, 0.0  ;;  %v610_v60 = vpop.f32.mrb[11].mxu0  ;;  %v1127_v61 = vsel %vm1118_vm1, %v1121_v52, %v1126_v53  ;;  %v6568_v52 = vld [vmem:[%s8548_s2 + $0x2a0] sm:$0xff]  }
 0x138   : > { %2454 = vmatprep.mubr.bf16.mxu0 %v1127_v61 }
 0x139   : > { %v770_v0 = vpack.c.bf16 %v737_v59, %v736_v58  ;;  %v7025_v1 = vpack.c.bf16 %v737_v59, %v737_v59  ;;  %2455 = vmatmul.mubr.bf16.vlgmr.msra.gmra.mrb[72].mxu0 %v1060_v63  ;;  %v6551_v58 = vld [vmem:[%s8548_s2 + $0x210] sm:$0xff]   ;;  %v6569_v59 = vld [vmem:[%s8548_s2 + $0x2e8] sm:$0xff]  }
 0x13a   : > { %5651 = vmatpush3.bf16.msra.mxu0 %v6556_v56 }
 0x13b   : > { %v808_v4 = vunpack.c.l.b16 %v770_v0  ;;  %v909_v5 = vshll.u32 %v7025_v1, 16  ;;  %v1131_v6 = vshrl.u32 %v7025_v1, 16  ;;  %5652 = vmatprep.subr.bf16.mxu0 %v6557_v62  ;;  %v1062_v33 = vrot.slane %v7025_v1, 1 }
 0x13c   : > { %v613_v8 = vpop.f32.mrb[12].mxu0 }
 0x13d   : > { %v7035_v9 = vpack.c.b16 %v808_v4, %v807_v3  ;;  %v615_v10 = vpop.f32.mrb[13].mxu0  ;;  %v738_v11 = vmax.f32 %v613_v8, 0.0  ;;  %v1133_v13 = vrot.slane %v1131_v6, 1  ;;  %v1134_v19 = vrot.slane %v909_v5, 2  ;;  %v6552_v3 = vld [vmem:[%s8548_s2 + $0x1d0] sm:$0xff]   ;;  %v6553_v8 = vld [vmem:[%s8548_s2 + $0x218] sm:$0xff]  }
 0x13e   : > { %v616_v12 = vpop.f32.mrb[14].mxu0  ;;  %5653 = vmatpush3.bf16.msra.mxu0 %v6558_v2  ;;  %v911_v25 = vrot.slane %v909_v5, 1 }
 0x13f   : > { %v739_v15 = vmax.f32 %v616_v12, 0.0  ;;  %v618_v16 = vpop.f32.mrb[15].mxu0  ;;  %v902_v17 = vshrl.u32 %v7035_v9, 16  ;;  %v904_v18 = vshll.u32 %v7035_v9, 16  ;;  %5654 = vmatprep.subr.bf16.mxu0 %v6561_v7  ;;  %v1061_v26 = vrot.slane %v7035_v9, 1  ;;  %v6570_v12 = vld [vmem:[%s8548_s2 + $0x2a8] sm:$0xff]  }
 0x140   : > { %v1135_v30 = vor.u32 %v1134_v19, %v1133_v13  ;;  %v6554_v19 = vld [vmem:[%s8548_s2 + $0x1d8] sm:$0xff]  }
 0x141   : > { %v7045_v21 = vpack.c.bf16 %v739_v15, %v738_v11  ;;  %v906_v22 = vrot.slane %v904_v18, 1  ;;  %v1128_v23 = vrot.slane %v902_v17, 1  ;;  %v1129_v24 = vrot.slane %v904_v18, 2 }
 0x142   : > { %5655 = vmatpush3.bf16.msra.mxu0 %v6562_v14  ;;  %v7072_v45 = vsel %vm1057_vm2, %v1061_v26, %v1062_v33 }
 0x143   : > { %v907_v27 = vor.u32 %v906_v22, %v902_v17  ;;  %v1130_v28 = vor.u32 %v1129_v24, %v1128_v23  ;;  %v916_v31 = vshll.u32 %v7045_v21, 16  ;;  %5656 = vmatprep.subr.bf16.mxu0 %v6563_v20  ;;  %v914_v34 = vshrl.u32 %v7045_v21, 16  ;;  %v6573_v17 = vld [vmem:[%s8548_s2 + $0x2f0] sm:$0xff]   ;;  %v6559_v23 = vld [vmem:[%s8548_s2 + $0x220] sm:$0xff]  }
 0x144   : > { %v621_v32 = vpop.f32.mrb[16].mxu0  ;;  %v1064_v11 = vrot.slane %v7045_v21, 1  ;;  %v6574_v24 = vld [vmem:[%s8548_s2 + $0x2b0] sm:$0xff]  }
 0x145   : > { %v740_v38 = vmax.f32 %v621_v32, 0.0  ;;  %v623_v39 = vpop.f32.mrb[17].mxu0  ;;  %v7058_v40 = vsel %vm888_vm0, %v907_v27, %v911_v25  ;;  %v7061_v41 = vsel %vm1118_vm1, %v1130_v28, %v1135_v30  ;;  %v918_v49 = vrot.slane %v916_v31, 1  ;;  %v6575_v30 = vld [vmem:[%s8548_s2 + $0x2f8] sm:$0xff]   ;;  %v6560_v32 = vld [vmem:[%s8548_s2 + $0x1e0] sm:$0xff]  }
 0x146   : > { %v624_v44 = vpop.f32.mrb[18].mxu0  ;;  %1826 = vmatprep.mubr.bf16.mxu1 %v7058_v40  ;;  %2462 = vmatprep.mubr.bf16.mxu0 %v7061_v41  ;;  %v1137_v50 = vrot.slane %v914_v34, 1  ;;  %v1138_v55 = vrot.slane %v916_v31, 2 }
 0x147   : > { %v7074_v46 = vpack.c.bf16 %v740_v38, %v740_v38  ;;  %v741_v47 = vmax.f32 %v624_v44, 0.0  ;;  %v626_v48 = vpop.f32.mrb[19].mxu0  ;;  %1827 = vmatmul.mubr.bf16.vlgmr.msra.gmra.mrb[0].mxu1 %v7035_v9  ;;  %2463 = vmatmul.mubr.bf16.gmra.mrb[76].mxu0 %v7072_v45  ;;  %v919_v60 = vor.u32 %v918_v49, %v914_v34 }
 0x148   : > { %5427 = vmatpush3.bf16.msra.mxu1 %v6548_v35  ;;  %5657 = vmatpush3.bf16.msra.mxu0 %v6564_v36  ;;  %v1139_v6 = vor.u32 %v1138_v55, %v1137_v50  ;;  %v6565_v35 = vld [vmem:[%s8548_s2 + $0x228] sm:$0xff]   ;;  %v6583_v50 = vld [vmem:[%s8548_s2 + $0x400] sm:$0xff]  }
 0x149   : > { %v772_v53 = vpack.c.bf16 %v741_v47, %v740_v38  ;;  %v921_v54 = vshll.u32 %v7074_v46, 16  ;;  %v1140_v56 = vshrl.u32 %v7074_v46, 16  ;;  %5428 = vmatprep.subr.bf16.mxu1 %v6549_v42  ;;  %5658 = vmatprep.subr.bf16.mxu0 %v6567_v43  ;;  %v1065_v2 = vrot.slane %v7074_v46, 1  ;;  %v6576_v42 = vld [vmem:[%s8548_s2 + $0x2b8] sm:$0xff]  }
 0x14b   : > { %v923_v61 = vrot.slane %v921_v54, 1  ;;  %v1142_v62 = vrot.slane %v1140_v56, 1  ;;  %v1143_v63 = vrot.slane %v921_v54, 2  ;;  %v7116_v18 = vsel %vm1057_vm2, %v1064_v11, %v1065_v2  ;;  %v6571_v56 = vld [vmem:[%s8548_s2 + $0x230] sm:$0xff]   ;;  %v6577_v11 = vld [vmem:[%s8548_s2 + $0x238] sm:$0xff]  }
 0x14c   : > { %v629_v0 = vpop.f32.mrb[20].mxu0  ;;  %5429 = vmatpush3.bf16.msra.mxu1 %v6550_v51  ;;  %5659 = vmatpush3.bf16.msra.mxu0 %v6568_v52  ;;  %v813_v25 = vunpack.c.h.b16 %v772_v53  ;;  %v6566_v51 = vld [vmem:[%s8548_s2 + $0x1e8] sm:$0xff]  }
 0x14d   : > { %v631_v4 = vpop.f32.mrb[21].mxu0  ;;  %v7097_v5 = vsel %vm888_vm0, %v919_v60, %v923_v61  ;;  %v1144_v7 = vor.u32 %v1143_v63, %v1142_v62  ;;  %5430 = vmatprep.subr.bf16.mxu1 %v6551_v58  ;;  %5660 = vmatprep.subr.bf16.mxu0 %v6569_v59  ;;  %v742_v13 = vmax.f32 %v629_v0, 0.0 }
 0x14e   : > { %v632_v10 = vpop.f32.mrb[22].mxu0  ;;  %1834 = vmatprep.mubr.bf16.mxu1 %v7097_v5  ;;  %v6572_v4 = vld [vmem:[%s8548_s2 + $0x1f0] sm:$0xff]  }
 0x14f   : > { %v743_v14 = vmax.f32 %v632_v10, 0.0  ;;  %v634_v15 = vpop.f32.mrb[23].mxu0  ;;  %1835 = vmatmul.mubr.bf16.gmra.mrb[4].mxu1 %v7045_v21  ;;  %v7109_v16 = vsel %vm1118_vm1, %v1139_v6, %v1144_v7 }
 0x150   : > { %2470 = vmatprep.mubr.bf16.mxu0 %v7109_v16  ;;  %5431 = vmatpush3.bf16.msra.mxu1 %v6552_v3 }
 0x151   : > { %v773_v20 = vpack.c.bf16 %v743_v14, %v742_v13  ;;  %v7121_v22 = vpack.c.bf16 %v743_v14, %v743_v14  ;;  %2471 = vmatmul.mubr.bf16.gmra.mrb[80].mxu0 %v7116_v18  ;;  %5432 = vmatprep.subr.bf16.mxu1 %v6553_v8 }
 0x152   : > { %5661 = vmatpush3.bf16.msra.mxu0 %v6570_v12 }
 0x153   : > { %v814_v26 = vunpack.c.l.b16 %v773_v20  ;;  %v933_v27 = vshll.u32 %v7121_v22, 16  ;;  %v1149_v28 = vshrl.u32 %v7121_v22, 16  ;;  %5662 = vmatprep.subr.bf16.mxu0 %v6573_v17  ;;  %v1068_v2 = vrot.slane %v7121_v22, 1 }
 0x154   : > { %v637_v31 = vpop.f32.mrb[24].mxu0  ;;  %5433 = vmatpush3.bf16.msra.mxu1 %v6554_v19 }
 0x155   : > { %v7138_v33 = vpack.c.b16 %v814_v26, %v813_v25  ;;  %v639_v34 = vpop.f32.mrb[25].mxu0  ;;  %5434 = vmatprep.subr.bf16.mxu1 %v6559_v23  ;;  %v744_v36 = vmax.f32 %v637_v31, 0.0  ;;  %v1151_v39 = vrot.slane %v1149_v28, 1  ;;  %v1152_v49 = vrot.slane %v933_v27, 2  ;;  %v6578_v23 = vld [vmem:[%s8548_s2 + $0x1f8] sm:$0xff]   ;;  %v7192_v28 = vld [vmem:[%s8548_s2 + $0x240] sm:$0xff]  }
 0x156   : > { %v640_v38 = vpop.f32.mrb[26].mxu0  ;;  %5663 = vmatpush3.bf16.msra.mxu0 %v6574_v24  ;;  %v935_v58 = vrot.slane %v933_v27, 1 }
 0x157   : > { %v745_v43 = vmax.f32 %v640_v38, 0.0  ;;  %v642_v44 = vpop.f32.mrb[27].mxu0  ;;  %v926_v47 = vshrl.u32 %v7138_v33, 16  ;;  %v928_v48 = vshll.u32 %v7138_v33, 16  ;;  %5664 = vmatprep.subr.bf16.mxu0 %v6575_v30  ;;  %v1067_v59 = vrot.slane %v7138_v33, 1 }
 0x158   : > { %5435 = vmatpush3.bf16.msra.mxu1 %v6560_v32  ;;  %v1153_v62 = vor.u32 %v1152_v49, %v1151_v39 }
 0x159   : > { %v7154_v52 = vpack.c.bf16 %v745_v43, %v744_v36  ;;  %v930_v53 = vrot.slane %v928_v48, 1  ;;  %v1146_v54 = vrot.slane %v926_v47, 1  ;;  %v1147_v55 = vrot.slane %v928_v48, 2  ;;  %5436 = vmatprep.subr.bf16.mxu1 %v6565_v35 }
 0x15a   : > { %5665 = vmatpush3.bf16.msra.mxu0 %v6576_v42  ;;  %v7178_v13 = vsel %vm1057_vm2, %v1067_v59, %v1068_v2 }
 0x15b   : > { %v931_v60 = vor.u32 %v930_v53, %v926_v47  ;;  %v1148_v61 = vor.u32 %v1147_v55, %v1146_v54  ;;  %v940_v63 = vshll.u32 %v7154_v52, 16  ;;  %5794 = vmatprep.subr.bf16.mxu0 %v6583_v50  ;;  %v938_v3 = vshrl.u32 %v7154_v52, 16 }
 0x15c   : > { %v645_v0 = vpop.f32.mrb[28].mxu0  ;;  %5437 = vmatpush3.bf16.msra.mxu1 %v6566_v51  ;;  %v1070_v47 = vrot.slane %v7154_v52, 1 }
 0x15d   : > { %v746_v6 = vmax.f32 %v645_v0, 0.0  ;;  %v647_v7 = vpop.f32.mrb[29].mxu0  ;;  %v7167_v8 = vsel %vm888_vm0, %v931_v60, %v935_v58  ;;  %v7170_v10 = vsel %vm1118_vm1, %v1148_v61, %v1153_v62  ;;  %5438 = vmatprep.subr.bf16.mxu1 %v6571_v56  ;;  %v942_v19 = vrot.slane %v940_v63, 1 }
 0x15e   : > { %v648_v12 = vpop.f32.mrb[30].mxu0  ;;  %1842 = vmatprep.mubr.bf16.mxu1 %v7167_v8  ;;  %2478 = vmatprep.mubr.bf16.mxu0 %v7170_v10  ;;  %v1155_v20 = vrot.slane %v938_v3, 1  ;;  %v1156_v27 = vrot.slane %v940_v63, 2 }
 0x15f   : > { %v7180_v14 = vpack.c.bf16 %v746_v6, %v746_v6  ;;  %v747_v15 = vmax.f32 %v648_v12, 0.0  ;;  %v650_v17 = vpop.f32.mrb[31].mxu0  ;;  %1843 = vmatmul.mubr.bf16.gmra.mrb[8].mxu1 %v7138_v33  ;;  %2479 = vmatmul.mubr.bf16.gmra.mrb[84].mxu0 %v7178_v13  ;;  %v943_v31 = vor.u32 %v942_v19, %v938_v3 }
 0x160   : > { %5439 = vmatpush3.bf16.msra.mxu1 %v6572_v4  ;;  %v1157_v42 = vor.u32 %v1156_v27, %v1155_v20 }
 0x161   : > { %v945_v24 = vshll.u32 %v7180_v14, 16  ;;  %v1158_v25 = vshrl.u32 %v7180_v14, 16  ;;  %v775_v26 = vpack.c.bf16 %v747_v15, %v746_v6  ;;  %5440 = vmatprep.subr.bf16.mxu1 %v6577_v11  ;;  %v1071_v36 = vrot.slane %v7180_v14, 1 }
 0x163   : > { %v1160_v30 = vrot.slane %v1158_v25, 1  ;;  %v947_v32 = vrot.slane %v945_v24, 1  ;;  %v1161_v34 = vrot.slane %v945_v24, 2  ;;  %v7207_v53 = vsel %vm1057_vm2, %v1070_v47, %v1071_v36 }
 0x164   : > { %v653_v35 = vpop.f32.mrb[32].mxu0  ;;  %5441 = vmatpush3.bf16.msra.mxu1 %v6578_v23  ;;  %v819_v56 = vunpack.c.h.b16 %v775_v26 }
 0x165   : > { %v655_v38 = vpop.f32.mrb[33].mxu0  ;;  %v7196_v39 = vsel %vm888_vm0, %v943_v31, %v947_v32  ;;  %v1162_v43 = vor.u32 %v1161_v34, %v1160_v30  ;;  %6082 = vmatprep.subr.bf16.mxu1 %v7192_v28  ;;  %v748_v48 = vmax.f32 %v653_v35, 0.0 }
 0x166   : > { %v656_v44 = vpop.f32.mrb[34].mxu0  ;;  %1850 = vmatprep.mubr.bf16.mxu1 %v7196_v39 }
 0x167   : > { %v749_v49 = vmax.f32 %v656_v44, 0.0  ;;  %v658_v50 = vpop.f32.mrb[35].mxu0  ;;  %1851 = vmatmul.mubr.bf16.gmra.mrb[12].mxu1 %v7154_v52  ;;  %v7203_v51 = vsel %vm1118_vm1, %v1157_v42, %v1162_v43 }
 0x168   : > { %2486 = vmatprep.mubr.bf16.mxu0 %v7203_v51 }
 0x169   : > { %v776_v54 = vpack.c.bf16 %v749_v49, %v748_v48  ;;  %v7209_v55 = vpack.c.bf16 %v749_v49, %v749_v49  ;;  %2487 = vmatmul.mubr.bf16.gmra.mrb[88].mxu0 %v7207_v53 }
 0x16b   : > { %v820_v58 = vunpack.c.l.b16 %v776_v54  ;;  %v957_v59 = vshll.u32 %v7209_v55, 16  ;;  %v1167_v60 = vshrl.u32 %v7209_v55, 16  ;;  %v1074_v32 = vrot.slane %v7209_v55, 1 }
 0x16c   : > { %v661_v61 = vpop.f32.mrb[36].mxu0 }
 0x16d   : > { %v7214_v62 = vpack.c.b16 %v820_v58, %v819_v56  ;;  %v663_v63 = vpop.f32.mrb[37].mxu0  ;;  %v1169_v0 = vrot.slane %v1167_v60, 1  ;;  %v750_v2 = vmax.f32 %v661_v61, 0.0  ;;  %v1170_v12 = vrot.slane %v957_v59, 2 }
 0x16e   : > { %v664_v3 = vpop.f32.mrb[38].mxu0  ;;  %v959_v23 = vrot.slane %v957_v59, 1 }
 0x16f   : > { %v751_v4 = vmax.f32 %v664_v3, 0.0  ;;  %v666_v6 = vpop.f32.mrb[39].mxu0  ;;  %v950_v7 = vshrl.u32 %v7214_v62, 16  ;;  %v952_v11 = vshll.u32 %v7214_v62, 16  ;;  %v1073_v24 = vrot.slane %v7214_v62, 1 }
 0x170   : > { %v1171_v27 = vor.u32 %v1170_v12, %v1169_v0 }
 0x171   : > { %v7218_v15 = vpack.c.bf16 %v751_v4, %v750_v2  ;;  %v954_v17 = vrot.slane %v952_v11, 1  ;;  %v1164_v19 = vrot.slane %v950_v7, 1  ;;  %v1165_v20 = vrot.slane %v952_v11, 2 }
 0x172   : > { %v7233_v44 = vsel %vm1057_vm2, %v1073_v24, %v1074_v32 }
 0x173   : > { %v955_v25 = vor.u32 %v954_v17, %v950_v7  ;;  %v1166_v26 = vor.u32 %v1165_v20, %v1164_v19  ;;  %v964_v30 = vshll.u32 %v7218_v15, 16  ;;  %v962_v34 = vshrl.u32 %v7218_v15, 16 }
 0x174   : > { %v669_v31 = vpop.f32.mrb[40].mxu0  ;;  %v1076_v19 = vrot.slane %v7218_v15, 1 }
 0x175   : > { %v752_v35 = vmax.f32 %v669_v31, 0.0  ;;  %v671_v36 = vpop.f32.mrb[41].mxu0  ;;  %v7225_v38 = vsel %vm888_vm0, %v955_v25, %v959_v23  ;;  %v7228_v42 = vsel %vm1118_vm1, %v1166_v26, %v1171_v27  ;;  %v966_v50 = vrot.slane %v964_v30, 1 }
 0x176   : > { %v672_v43 = vpop.f32.mrb[42].mxu0  ;;  %1858 = vmatprep.mubr.bf16.mxu1 %v7225_v38  ;;  %2494 = vmatprep.mubr.bf16.mxu0 %v7228_v42  ;;  %v1173_v54 = vrot.slane %v962_v34, 1  ;;  %v1174_v60 = vrot.slane %v964_v30, 2 }
 0x177   : > { %v7235_v47 = vpack.c.bf16 %v752_v35, %v752_v35  ;;  %v753_v48 = vmax.f32 %v672_v43, 0.0  ;;  %v674_v49 = vpop.f32.mrb[43].mxu0  ;;  %1859 = vmatmul.mubr.bf16.gmra.mrb[16].mxu1 %v7214_v62  ;;  %2495 = vmatmul.mubr.bf16.gmra.mrb[92].mxu0 %v7233_v44  ;;  %v967_v63 = vor.u32 %v966_v50, %v962_v34 }
 0x178   : > { %v1175_v11 = vor.u32 %v1174_v60, %v1173_v54 }
 0x179   : > { %v969_v56 = vshll.u32 %v7235_v47, 16  ;;  %v1176_v58 = vshrl.u32 %v7235_v47, 16  ;;  %v778_v59 = vpack.c.bf16 %v753_v48, %v752_v35  ;;  %v1077_v4 = vrot.slane %v7235_v47, 1 }
 0x17b   : > { %v1178_v61 = vrot.slane %v1176_v58, 1  ;;  %v971_v0 = vrot.slane %v969_v56, 1  ;;  %v1179_v2 = vrot.slane %v969_v56, 2  ;;  %v7253_v26 = vsel %vm1057_vm2, %v1076_v19, %v1077_v4 }
 0x17c   : > { %v677_v3 = vpop.f32.mrb[44].mxu0  ;;  %v825_v31 = vunpack.c.h.b16 %v778_v59 }
 0x17d   : > { %v679_v6 = vpop.f32.mrb[45].mxu0  ;;  %v7243_v7 = vsel %vm888_vm0, %v967_v63, %v971_v0  ;;  %v1180_v12 = vor.u32 %v1179_v2, %v1178_v61  ;;  %v754_v20 = vmax.f32 %v677_v3, 0.0 }
 0x17e   : > { %v680_v17 = vpop.f32.mrb[46].mxu0  ;;  %1866 = vmatprep.mubr.bf16.mxu1 %v7243_v7 }
 0x17f   : > { %v755_v23 = vmax.f32 %v680_v17, 0.0  ;;  %v682_v24 = vpop.f32.mrb[47].mxu0  ;;  %1867 = vmatmul.mubr.bf16.gmra.mrb[20].mxu1 %v7218_v15  ;;  %v7249_v25 = vsel %vm1118_vm1, %v1175_v11, %v1180_v12 }
 0x180   : > { %2502 = vmatprep.mubr.bf16.mxu0 %v7249_v25 }
 0x181   : > { %v779_v27 = vpack.c.bf16 %v755_v23, %v754_v20  ;;  %v7255_v30 = vpack.c.bf16 %v755_v23, %v755_v23  ;;  %2503 = vmatmul.mubr.bf16.gmra.mrb[96].mxu0 %v7253_v26 }
 0x183   : > { %v826_v32 = vunpack.c.l.b16 %v779_v27  ;;  %v981_v34 = vshll.u32 %v7255_v30, 16  ;;  %v1185_v35 = vshrl.u32 %v7255_v30, 16  ;;  %v1080_v23 = vrot.slane %v7255_v30, 1 }
 0x184   : > { %v685_v36 = vpop.f32.mrb[48].mxu0 }
 0x185   : > { %v7260_v43 = vpack.c.b16 %v826_v32, %v825_v31  ;;  %v687_v48 = vpop.f32.mrb[49].mxu0  ;;  %v1187_v49 = vrot.slane %v1185_v35, 1  ;;  %v756_v50 = vmax.f32 %v685_v36, 0.0  ;;  %v1188_v63 = vrot.slane %v981_v34, 2 }
 0x186   : > { %v688_v54 = vpop.f32.mrb[50].mxu0  ;;  %v983_v4 = vrot.slane %v981_v34, 1 }
 0x187   : > { %v757_v56 = vmax.f32 %v688_v54, 0.0  ;;  %v690_v58 = vpop.f32.mrb[51].mxu0  ;;  %v974_v60 = vshrl.u32 %v7260_v43, 16  ;;  %v976_v61 = vshll.u32 %v7260_v43, 16  ;;  %v1079_v6 = vrot.slane %v7260_v43, 1 }
 0x188   : > { %v1189_v17 = vor.u32 %v1188_v63, %v1187_v49 }
 0x189   : > { %v7264_v59 = vpack.c.bf16 %v757_v56, %v756_v50  ;;  %v978_v0 = vrot.slane %v976_v61, 1  ;;  %v1182_v2 = vrot.slane %v974_v60, 1  ;;  %v1183_v3 = vrot.slane %v976_v61, 2 }
 0x18a   : > { %v7278_v34 = vsel %vm1057_vm2, %v1079_v6, %v1080_v23 }
 0x18b   : > { %v979_v11 = vor.u32 %v978_v0, %v974_v60  ;;  %v1184_v12 = vor.u32 %v1183_v3, %v1182_v2  ;;  %v988_v19 = vshll.u32 %v7264_v59, 16  ;;  %v986_v56 = vshrl.u32 %v7264_v59, 16 }
 0x18c   : > { %v693_v20 = vpop.f32.mrb[52].mxu0 }
 0x18d   : > { %v758_v24 = vmax.f32 %v693_v20, 0.0  ;;  %v695_v27 = vpop.f32.mrb[53].mxu0  ;;  %v7270_v31 = vsel %vm888_vm0, %v979_v11, %v983_v4  ;;  %v7273_v32 = vsel %vm1118_vm1, %v1184_v12, %v1189_v17  ;;  %v990_v50 = vrot.slane %v988_v19, 1  ;;  %v6584_v4 = vld [vmem:[%s8548_s2 + $0x3c0] sm:$0xff]   ;;  %v6585_v11 = vld [vmem:[%s8548_s2 + $0x408] sm:$0xff]  }
 0x18e   : > { %v696_v35 = vpop.f32.mrb[54].mxu0  ;;  %1874 = vmatprep.mubr.bf16.mxu1 %v7270_v31  ;;  %2510 = vmatprep.mubr.bf16.mxu0 %v7273_v32  ;;  %v6588_v27 = vld [vmem:[%s8548_s2 + $0x410] sm:$0xff]  }
 0x18f   : > { %v7280_v36 = vpack.c.bf16 %v758_v24, %v758_v24  ;;  %v759_v48 = vmax.f32 %v696_v35, 0.0  ;;  %v698_v49 = vpop.f32.mrb[55].mxu0  ;;  %1875 = vmatmul.mubr.bf16.gmra.mrb[24].mxu1 %v7260_v43  ;;  %2511 = vmatmul.mubr.bf16.gmra.mrb[100].mxu0 %v7278_v34  ;;  %v991_v60 = vor.u32 %v990_v50, %v986_v56 }
 0x190   : > { %3010 = vmatprep.mubr.bf16.mxu0 %v7097_v5 }
 0x191   : > { %v781_v54 = vpack.c.bf16 %v759_v48, %v758_v24  ;;  %v993_v58 = vshll.u32 %v7280_v36, 16  ;;  %v6586_v24 = vld [vmem:[%s8548_s2 + $0x3c8] sm:$0xff]  }
 0x193   : > { %v995_v61 = vrot.slane %v993_v58, 1  ;;  %v831_v35 = vunpack.c.h.b16 %v781_v54  ;;  %v6589_v54 = vld [vmem:[%s8548_s2 + $0x3d0] sm:$0xff]  }
 0x194   : > { %v701_v63 = vpop.f32.mrb[56].mxu0 }
 0x195   : > { %v760_v0 = vmax.f32 %v701_v63, 0.0  ;;  %v703_v2 = vpop.f32.mrb[57].mxu0  ;;  %v7294_v3 = vsel %vm888_vm0, %v991_v60, %v995_v61  ;;  %v6580_v61 = vld [vmem:[%s8548_s2 + $0x248] sm:$0xff]  }
 0x196   : > { %v704_v6 = vpop.f32.mrb[58].mxu0  ;;  %1882 = vmatprep.mubr.bf16.mxu1 %v7294_v3 }
 0x197   : > { %v761_v12 = vmax.f32 %v704_v6, 0.0  ;;  %1883 = vmatmul.mubr.bf16.gmra.mrb[28].mxu1 %v7264_v59  ;;  %3011 = vmatmul.mubr.bf16.vlgmr.msra.gmra.mrb[104].mxu0 %v7045_v21  ;;  %v706_v17 = vpop.f32.mrb[59].mxu0 }
 0x198   : > { %1923 = vmatprep.mubr.bf16.mxu1 %v7061_v41  ;;  %3018 = vmatprep.mubr.bf16.mxu0 %v7167_v8 }
 0x199   : > { %v782_v20 = vpack.c.bf16 %v761_v12, %v760_v0  ;;  %v7307_v23 = vpack.c.bf16 %v761_v12, %v761_v12  ;;  %5795 = vmatpush3.bf16.msra.mxu0 %v6584_v4 }
 0x19a   : > { %5796 = vmatprep.subr.bf16.mxu0 %v6585_v11  ;;  %v6590_v11 = vld [vmem:[%s8548_s2 + $0x418] sm:$0xff]  }
 0x19b   : > { %v832_v48 = vunpack.c.l.b16 %v782_v20  ;;  %v1005_v49 = vshll.u32 %v7307_v23, 16  ;;  %v1203_v41 = vshrl.u32 %v7307_v23, 16 }
 0x19c   : > { %v709_v50 = vpop.f32.mrb[60].mxu0 }
 0x19d   : > { %v7317_v60 = vpack.c.b16 %v832_v48, %v831_v35  ;;  %5797 = vmatpush3.bf16.msra.mxu0 %v6586_v24  ;;  %v762_v63 = vmax.f32 %v709_v50, 0.0  ;;  %v711_v0 = vpop.f32.mrb[61].mxu0  ;;  %v1205_v2 = vrot.slane %v1203_v41, 1  ;;  %v1206_v6 = vrot.slane %v1005_v49, 2 }
 0x19e   : > { %5798 = vmatprep.subr.bf16.mxu0 %v6588_v27  ;;  %v712_v4 = vpop.f32.mrb[62].mxu0 }
 0x19f   : > { %1924 = vmatmul.mubr.bf16.vlgmr.msra.gmra.mrb[32].mxu1 %v7072_v45  ;;  %3019 = vmatmul.mubr.bf16.gmra.mrb[108].mxu0 %v7138_v33  ;;  %v998_v12 = vshrl.u32 %v7317_v60, 16  ;;  %v1000_v17 = vshll.u32 %v7317_v60, 16  ;;  %v763_v20 = vmax.f32 %v712_v4, 0.0  ;;  %v714_v24 = vpop.f32.mrb[63].mxu0  ;;  %v1207_v27 = vor.u32 %v1206_v6, %v1205_v2  ;;  %v6581_v45 = vld [vmem:[%s8548_s2 + $0x250] sm:$0xff]   ;;  %v6594_v6 = vld [vmem:[%s8548_s2 + $0x3e0] sm:$0xff]  }
 0x1a0   : > { %6083 = vmatpush3.bf16.msra.mxu1 %v7192_v28  ;;  %1931 = vmatprep.mubr.bf16.mxu1 %v7109_v16  ;;  %v6591_v28 = vld [vmem:[%s8548_s2 + $0x3d8] sm:$0xff]  }
 0x1a1   : > { %3026 = vmatprep.mubr.bf16.mxu0 %v7196_v39  ;;  %6084 = vmatprep.subr.bf16.mxu1 %v6580_v61  ;;  %v7340_v35 = vpack.c.bf16 %v763_v20, %v762_v63  ;;  %v1200_v48 = vrot.slane %v998_v12, 1  ;;  %v1201_v41 = vrot.slane %v1000_v17, 2  ;;  %v6593_v63 = vld [vmem:[%s8548_s2 + $0x420] sm:$0xff]  }
 0x1a2   : > { %5799 = vmatpush3.bf16.msra.mxu0 %v6589_v54  ;;  %v6582_v54 = vld [vmem:[%s8548_s2 + $0x258] sm:$0xff]  }
 0x1a3   : > { %5800 = vmatprep.subr.bf16.mxu0 %v6590_v11  ;;  %v1202_v50 = vor.u32 %v1201_v41, %v1200_v48  ;;  %v6595_v11 = vld [vmem:[%s8548_s2 + $0x428] sm:$0xff]   ;;  %v6587_v41 = vld [vmem:[%s8548_s2 + $0x260] sm:$0xff]  }
 0x1a4   : > { %6085 = vmatpush3.bf16.msra.mxu1 %v6580_v61  ;;  %v717_v0 = vpop.f32.mrb[64].mxu0 }
 0x1a5   : > { %6086 = vmatprep.subr.bf16.mxu1 %v6581_v45  ;;  %v719_v2 = vpop.f32.mrb[65].mxu0  ;;  %v7353_v4 = vsel %vm1118_vm1, %v1202_v50, %v1207_v27  ;;  %v7366_v20 = vmax.f32 %v717_v0, 0.0 }
 0x1a6   : > { %5801 = vmatpush3.bf16.msra.mxu0 %v6591_v28  ;;  %v720_v61 = vpop.f32.mrb[66].mxu0  ;;  %v6596_v28 = vld [vmem:[%s8548_s2 + $0x3e8] sm:$0xff]  }
 0x1a7   : > { %1932 = vmatmul.mubr.bf16.gmra.mrb[36].mxu1 %v7116_v18  ;;  %3027 = vmatmul.mubr.bf16.gmra.mrb[112].mxu0 %v7154_v52  ;;  %v765_v24 = vmax.f32 %v720_v61, 0.0  ;;  %v722_v27 = vpop.f32.mrb[67].mxu0  ;;  %v6592_v2 = vld [vmem:[%s8548_s2 + $0x268] sm:$0xff]  }
 0x1a8   : > { %1939 = vmatprep.mubr.bf16.mxu1 %v7170_v10  ;;  %3034 = vmatprep.mubr.bf16.mxu0 %v7225_v38 }
 0x1a9   : > { %6087 = vmatpush3.bf16.msra.mxu1 %v6581_v45  ;;  %5802 = vmatprep.subr.bf16.mxu0 %v6593_v63  ;;  %v784_v48 = vpack.c.bf16 %v765_v24, %v7366_v20  ;;  %v6598_v45 = vld [vmem:[%s8548_s2 + $0x430] sm:$0xff]  }
 0x1aa   : > { %6088 = vmatprep.subr.bf16.mxu1 %v6582_v54  ;;  %5803 = vmatpush3.bf16.msra.mxu0 %v6594_v6  ;;  %v6599_v6 = vld [vmem:[%s8548_s2 + $0x3f0] sm:$0xff]  }
 0x1ab   : > { %5804 = vmatprep.subr.bf16.mxu0 %v6595_v11  ;;  %v837_v27 = vunpack.c.h.b16 %v784_v48 }
 0x1ac   : > { %v725_v50 = vpop.f32.mrb[68].mxu0 }
 0x1ad   : > { %6089 = vmatpush3.bf16.msra.mxu1 %v6582_v54  ;;  %v766_v0 = vmax.f32 %v725_v50, 0.0  ;;  %v727_v63 = vpop.f32.mrb[69].mxu0  ;;  %v6600_v54 = vld [vmem:[%s8548_s2 + $0x438] sm:$0xff]   ;;  %v6597_v50 = vld [vmem:[%s8548_s2 + $0x270] sm:$0xff]  }
 0x1ae   : > { %6090 = vmatprep.subr.bf16.mxu1 %v6587_v41  ;;  %5805 = vmatpush3.bf16.msra.mxu0 %v6596_v28  ;;  %v728_v61 = vpop.f32.mrb[70].mxu0  ;;  %v6601_v63 = vld [vmem:[%s8548_s2 + $0x3f8] sm:$0xff]  }
 0x1af   : > { %1940 = vmatmul.mubr.bf16.gmra.mrb[40].mxu1 %v7178_v13  ;;  %3035 = vmatmul.mubr.bf16.gmra.mrb[116].mxu0 %v7214_v62  ;;  %v7391_v11 = vmax.f32 %v728_v61, 0.0  ;;  %v730_v24 = vpop.f32.mrb[71].mxu0 }
 0x1b0   : > { %1947 = vmatprep.mubr.bf16.mxu1 %v7203_v51  ;;  %3042 = vmatprep.mubr.bf16.mxu0 %v7243_v7  ;;  %v1194_v24 = vshrl.u32 %v7280_v36, 16 }
 0x1b1   : > { %6091 = vmatpush3.bf16.msra.mxu1 %v6587_v41  ;;  %5806 = vmatprep.subr.bf16.mxu0 %v6598_v45  ;;  %v785_v28 = vpack.c.bf16 %v7391_v11, %v766_v0  ;;  %v6617_v41 = vld [vmem:[%s8548_s2 + $0x540] sm:$0xff]   ;;  %v6602_v45 = vld [vmem:[%s8548_s2 + $0x278] sm:$0xff]  }
 0x1b2   : > { %6092 = vmatprep.subr.bf16.mxu1 %v6592_v2  ;;  %5807 = vmatpush3.bf16.msra.mxu0 %v6599_v6  ;;  %v6603_v0 = vld [vmem:[%s8548_s2 + $0x40] sm:$0xff]  }
 0x1b3   : > { %5808 = vmatprep.subr.bf16.mxu0 %v6600_v54  ;;  %v838_v61 = vunpack.c.l.b16 %v785_v28  ;;  %v1007_v54 = vrot.slane %v1005_v49, 1  ;;  %v1197_v28 = vrot.slane %v993_v58, 2  ;;  %v1191_v49 = vrot.slane %v986_v56, 1 }
 0x1b4   : > { %v1083_v58 = vrot.slane %v7280_v36, 1  ;;  %v1255_v56 = vrot.slane %v7035_v9, 2 }
 0x1b5   : > { %6093 = vmatpush3.bf16.msra.mxu1 %v6592_v2  ;;  %v7405_v48 = vpack.c.b16 %v838_v61, %v837_v27  ;;  %v1002_v2 = vrot.slane %v1000_v17, 1  ;;  %v1196_v17 = vrot.slane %v1194_v24, 1  ;;  %v6624_v24 = vld [vmem:[%s8548_s2 + $0x550] sm:$0xff]  }
 0x1b6   : > { %6094 = vmatprep.subr.bf16.mxu1 %v6597_v50  ;;  %5809 = vmatpush3.bf16.msra.mxu0 %v6601_v63 }
 0x1b7   : > { %1948 = vmatmul.mubr.bf16.gmra.mrb[44].mxu1 %v7207_v53  ;;  %3043 = vmatmul.mubr.bf16.gmra.mrb[120].mxu0 %v7218_v15  ;;  %v1003_v6 = vor.u32 %v1002_v2, %v998_v12  ;;  %v1192_v12 = vrot.slane %v988_v19, 2  ;;  %v1256_v19 = vrot.slane %v7025_v1, 2  ;;  %v6621_v2 = vld [vmem:[%s8548_s2 + $0x548] sm:$0xff]  }
 0x1b8   : > { %1955 = vmatprep.mubr.bf16.mxu1 %v7228_v42  ;;  %3050 = vmatprep.mubr.bf16.mxu0 %v7270_v31  ;;  %v6622_v1 = vld [vmem:[%s8548_s2 + $0x508] sm:$0xff]  }
 0x1b9   : > { %6095 = vmatpush3.bf16.msra.mxu1 %v6597_v50  ;;  %5938 = vmatprep.subr.bf16.mxu0 %v6617_v41  ;;  %v7431_v27 = vsel %vm888_vm0, %v1003_v6, %v1007_v54  ;;  %v1198_v50 = vor.u32 %v1197_v28, %v1196_v17  ;;  %v1193_v63 = vor.u32 %v1192_v12, %v1191_v49  ;;  %v1082_v41 = vrot.slane %v7264_v59, 1  ;;  %v6604_v49 = vld [vmem:[%s8548_s2] sm:$0xff]  }
 0x1ba   : > { %6096 = vmatprep.subr.bf16.mxu1 %v6602_v45  ;;  %v7464_v6 = vsel %vm1251_vm3, %v1255_v56, %v1256_v19  ;;  %v1259_v54 = vrot.slane %v7074_v46, 2  ;;  %v1261_v17 = vrot.slane %v7138_v33, 2  ;;  %v1258_v28 = vrot.slane %v7045_v21, 2  ;;  %v6606_v56 = vld [vmem:[%s8548_s2 + $0x8] sm:$0xff]  }
 0x1bb   : > { %v7444_v61 = vsel %vm1118_vm1, %v1193_v63, %v1198_v50  ;;  %v1262_v12 = vrot.slane %v7121_v22, 2  ;;  %v6605_v50 = vld [vmem:[%s8548_s2 + $0x48] sm:$0xff]   ;;  %v6625_v63 = vld [vmem:[%s8548_s2 + $0x510] sm:$0xff]   ;;  %v6626_v22 = vld [vmem:[%s8548_s2 + $0x558] sm:$0xff]   ;;  %v1265_v19 = vrot.slane %v7180_v14, 2 }
 0x1bc   : > { %v7485_v46 = vsel %vm1251_vm3, %v1258_v28, %v1259_v54  ;;  %v6608_v54 = vld [vmem:[%s8548_s2 + $0x10] sm:$0xff]   ;;  %v6609_v14 = vld [vmem:[%s8548_s2 + $0x58] sm:$0xff]   ;;  %v6629_v28 = vld [vmem:[%s8548_s2 + $0x560] sm:$0xff]  }
 0x1bd   : > { %6097 = vmatpush3.bf16.msra.mxu1 %v6602_v45  ;;  %v6618_v45 = vld [vmem:[%s8548_s2 + $0x500] sm:$0xff]  }
 0x1be   : > { %5506 = vmatprep.subr.bf16.mxu1 %v6603_v0  ;;  %v7456_v0 = vsel %vm1057_vm2, %v1082_v41, %v1083_v58  ;;  %v7493_v58 = vsel %vm1251_vm3, %v1261_v17, %v1262_v12  ;;  %v6607_v41 = vld [vmem:[%s8548_s2 + $0x50] sm:$0xff]   ;;  %v6610_v12 = vld [vmem:[%s8548_s2 + $0x18] sm:$0xff]  }
 0x1bf   : > { %1956 = vmatmul.mubr.bf16.gmra.mrb[48].mxu1 %v7233_v44  ;;  %3051 = vmatmul.mubr.bf16.gmra.mrb[124].mxu0 %v7260_v43 }
 0x1c0   : > { %1963 = vmatprep.mubr.bf16.mxu1 %v7249_v25  ;;  %3058 = vmatprep.mubr.bf16.mxu0 %v7294_v3 }
 0x1c7   : > { %1964 = vmatmul.mubr.bf16.gmra.mrb[52].mxu1 %v7253_v26  ;;  %3059 = vmatmul.mubr.bf16.gmra.mrb[128].mxu0 %v7264_v59 }
 0x1c8   : > { %1971 = vmatprep.mubr.bf16.mxu1 %v7273_v32  ;;  %3066 = vmatprep.mubr.bf16.mxu0 %v7431_v27 }
 0x1cf   : > { %1972 = vmatmul.mubr.bf16.gmra.mrb[56].mxu1 %v7278_v34  ;;  %3067 = vmatmul.mubr.bf16.gmra.mrb[132].mxu0 %v7317_v60 }
 0x1d0   : > { %1979 = vmatprep.mubr.bf16.mxu1 %v7444_v61  ;;  %3679 = vmatprep.mubr.bf16.mxu0 %v7167_v8 }
 0x1d7   : > { %1980 = vmatmul.mubr.bf16.gmra.mrb[60].mxu1 %v7456_v0  ;;  %3680 = vmatmul.mubr.bf16.vlgmr.msra.gmra.mrb[136].mxu0 %v7138_v33 }
 0x1d8   : > { %6098 = vmatprep.mubr.bf16.mxu1 %v7464_v6  ;;  %3687 = vmatprep.mubr.bf16.mxu0 %v7196_v39 }
 0x1d9   : > { %5939 = vmatpush3.bf16.msra.mxu0 %v6618_v45  ;;  %v6627_v45 = vld [vmem:[%s8548_s2 + $0x518] sm:$0xff]  }
 0x1da   : > { %5940 = vmatprep.subr.bf16.mxu0 %v6621_v2  ;;  %v1267_v2 = vrot.slane %v7214_v62, 2 }
 0x1dd   : > { %5941 = vmatpush3.bf16.msra.mxu0 %v6622_v1  ;;  %v1264_v1 = vrot.slane %v7154_v52, 2 }
 0x1de   : > { %5942 = vmatprep.subr.bf16.mxu0 %v6624_v24  ;;  %v1268_v24 = vrot.slane %v7209_v55, 2  ;;  %v6630_v55 = vld [vmem:[%s8548_s2 + $0x520] sm:$0xff]  }
 0x1df   : > { %6099 = vmatmul.mubr.bf16.vlgmr.msra.gmra.mrb[64].mxu1 %v7485_v46  ;;  %3688 = vmatmul.mubr.bf16.gmra.mrb[140].mxu0 %v7154_v52  ;;  %v7520_v17 = vsel %vm1251_vm3, %v1264_v1, %v1265_v19  ;;  %v6612_v19 = vld [vmem:[%s8548_s2 + $0x20] sm:$0xff]   ;;  %v6632_v1 = vld [vmem:[%s8548_s2 + $0x528] sm:$0xff]  }
 0x1e0   : > { %5507 = vmatpush3.bf16.msra.mxu1 %v6604_v49  ;;  %6102 = vmatprep.mubr.bf16.mxu1 %v7493_v58  ;;  %v7528_v49 = vsel %vm1251_vm3, %v1267_v2, %v1268_v24  ;;  %v6613_v2 = vld [vmem:[%s8548_s2 + $0x68] sm:$0xff]  }
 0x1e1   : > { %3695 = vmatprep.mubr.bf16.mxu0 %v7225_v38  ;;  %5508 = vmatprep.subr.bf16.mxu1 %v6605_v50  ;;  %v6631_v50 = vld [vmem:[%s8548_s2 + $0x568] sm:$0xff]  }
 0x1e2   : > { %5943 = vmatpush3.bf16.msra.mxu0 %v6625_v63  ;;  %v6611_v63 = vld [vmem:[%s8548_s2 + $0x60] sm:$0xff]   ;;  %v6614_v24 = vld [vmem:[%s8548_s2 + $0x28] sm:$0xff]  }
 0x1e3   : > { %5944 = vmatprep.subr.bf16.mxu0 %v6626_v22  ;;  %v1271_v22 = vrot.slane %v7235_v47, 2 }
 0x1e4   : > { %5509 = vmatpush3.bf16.msra.mxu1 %v6606_v56  ;;  %v1273_v56 = vrot.slane %v7260_v43, 2 }
 0x1e5   : > { %5510 = vmatprep.subr.bf16.mxu1 %v6607_v41  ;;  %v1270_v41 = vrot.slane %v7218_v15, 2 }
 0x1e6   : > { %5945 = vmatpush3.bf16.msra.mxu0 %v6627_v45  ;;  %v1274_v45 = vrot.slane %v7255_v30, 2  ;;  %v6634_v30 = vld [vmem:[%s8548_s2 + $0x570] sm:$0xff]  }
 0x1e7   : > { %6103 = vmatmul.mubr.bf16.gmra.mrb[68].mxu1 %v7520_v17  ;;  %3696 = vmatmul.mubr.bf16.gmra.mrb[144].mxu0 %v7214_v62  ;;  %v7555_v47 = vsel %vm1251_vm3, %v1270_v41, %v1271_v22  ;;  %v6636_v22 = vld [vmem:[%s8548_s2 + $0x578] sm:$0xff]  }
 0x1e8   : > { %5511 = vmatpush3.bf16.msra.mxu1 %v6608_v54  ;;  %6106 = vmatprep.mubr.bf16.mxu1 %v7528_v49  ;;  %v7563_v54 = vsel %vm1251_vm3, %v1273_v56, %v1274_v45  ;;  %v6637_v56 = vld [vmem:[%s8548_s2 + $0x538] sm:$0xff]   ;;  %v6623_v45 = vld [vmem:[%s8548_s2 + $0x100] sm:$0xff]  }
 0x1e9   : > { %3703 = vmatprep.mubr.bf16.mxu0 %v7243_v7  ;;  %5512 = vmatprep.subr.bf16.mxu1 %v6609_v14  ;;  %v6615_v14 = vld [vmem:[%s8548_s2 + $0x70] sm:$0xff]   ;;  %v6620_v41 = vld [vmem:[%s8548_s2 + $0x38] sm:$0xff]  }
 0x1ea   : > { %5946 = vmatprep.subr.bf16.mxu0 %v6629_v28  ;;  %v1277_v28 = vrot.slane %v7280_v36, 2 }
 0x1eb   : > { %5947 = vmatpush3.bf16.msra.mxu0 %v6630_v55  ;;  %v6635_v55 = vld [vmem:[%s8548_s2 + $0x530] sm:$0xff]  }
 0x1ec   : > { %5513 = vmatpush3.bf16.msra.mxu1 %v6610_v12  ;;  %5948 = vmatprep.subr.bf16.mxu0 %v6631_v50  ;;  %v1276_v12 = vrot.slane %v7264_v59, 2  ;;  %v6616_v50 = vld [vmem:[%s8548_s2 + $0x30] sm:$0xff]  }
 0x1ed   : > { %5514 = vmatprep.subr.bf16.mxu1 %v6611_v63  ;;  %v6619_v63 = vld [vmem:[%s8548_s2 + $0x78] sm:$0xff]  }
 0x1ee   : > { %v7588_v36 = vsel %vm1251_vm3, %v1276_v12, %v1277_v28 }
 0x1ef   : > { %6107 = vmatmul.mubr.bf16.gmra.mrb[72].mxu1 %v7555_v47  ;;  %3704 = vmatmul.mubr.bf16.gmra.mrb[148].mxu0 %v7218_v15 }
 0x1f0   : > { %5515 = vmatpush3.bf16.msra.mxu1 %v6612_v19  ;;  %6110 = vmatprep.mubr.bf16.mxu1 %v7563_v54  ;;  %v6643_v19 = vld [vmem:[%s8548_s2 + $0x5c0] sm:$0xff]  }
 0x1f1   : > { %3711 = vmatprep.mubr.bf16.mxu0 %v7270_v31  ;;  %5516 = vmatprep.subr.bf16.mxu1 %v6613_v2  ;;  %v7611_v2 = vpack.c.bf16 %v7366_v20, %v7366_v20  ;;  %v6633_v20 = vld [vmem:[%s8548_s2 + $0x110] sm:$0xff]  }
 0x1f2   : > { %5949 = vmatpush3.bf16.msra.mxu0 %v6632_v1  ;;  %v6628_v1 = vld [vmem:[%s8548_s2 + $0x108] sm:$0xff]  }
 0x1f3   : > { %5950 = vmatprep.subr.bf16.mxu0 %v6634_v30  ;;  %v8555_v30 = vshrl.u32 %v7340_v35, 16 }
 0x1f4   : > { %5517 = vmatpush3.bf16.msra.mxu1 %v6614_v24 }
 0x1f5   : > { %5518 = vmatprep.subr.bf16.mxu1 %v6615_v14  ;;  %v8553_v14 = vshll.u32 %v7611_v2, 16 }
 0x1f6   : > { %5951 = vmatpush3.bf16.msra.mxu0 %v6635_v55 }
 0x1f7   : > { %6111 = vmatmul.mubr.bf16.gmra.mrb[76].mxu1 %v7588_v36  ;;  %3712 = vmatmul.mubr.bf16.gmra.mrb[152].mxu0 %v7260_v43  ;;  %v1019_v55 = vrot.slane %v8553_v14, 1 }
 0x1f8   : > { %5519 = vmatpush3.bf16.msra.mxu1 %v6616_v50  ;;  %2357 = vmatprep.mubr.bf16.mxu1 %v7018_v57  ;;  %v8554_v57 = vshll.u32 %v7340_v35, 16  ;;  %v6639_v50 = vld [vmem:[%s8548_s2 + $0x120] sm:$0xff]  }
 0x1f9   : > { %3719 = vmatprep.mubr.bf16.mxu0 %v7294_v3  ;;  %5520 = vmatprep.subr.bf16.mxu1 %v6619_v63 }
 0x1fa   : > { %5952 = vmatprep.subr.bf16.mxu0 %v6636_v22  ;;  %v1014_v24 = vrot.slane %v8554_v57, 1 }
 0x1fb   : > { %5953 = vmatpush3.bf16.msra.mxu0 %v6637_v56 }
 0x1fc   : > { %5521 = vmatpush3.bf16.msra.mxu1 %v6620_v41  ;;  %6002 = vmatprep.subr.bf16.mxu0 %v6643_v19  ;;  %v1015_v28 = vor.u32 %v1014_v24, %v8555_v30  ;;  %v6646_v24 = vld [vmem:[%s8548_s2 + $0x588] sm:$0xff]  }
 0x1fd   : > { %6114 = vmatprep.subr.bf16.mxu1 %v6623_v45 }
 0x1fe   : > { %v7633_v12 = vsel %vm888_vm0, %v1015_v28, %v1019_v55 }
 0x1ff   : > { %2358 = vmatmul.mubr.bf16.vlgmr.msra.gmra.mrb[80].mxu1 %v7004_v29  ;;  %3720 = vmatmul.mubr.bf16.gmra.mrb[156].mxu0 %v7264_v59 }
 0x200   : > { %6115 = vmatpush3.bf16.msra.mxu1 %v6623_v45  ;;  %2365 = vmatprep.mubr.bf16.mxu1 %v7058_v40  ;;  %v6638_v40 = vld [vmem:[%s8548_s2 + $0x118] sm:$0xff]   ;;  %v6641_v45 = vld [vmem:[%s8548_s2 + $0x130] sm:$0xff]  }
 0x201   : > { %3727 = vmatprep.mubr.bf16.mxu0 %v7431_v27  ;;  %6116 = vmatprep.subr.bf16.mxu1 %v6628_v1 }
 0x204   : > { %6117 = vmatpush3.bf16.msra.mxu1 %v6628_v1  ;;  %v6642_v1 = vld [vmem:[%s8548_s2 + $0x138] sm:$0xff]  }
 0x205   : > { %6118 = vmatprep.subr.bf16.mxu1 %v6633_v20 }
 0x207   : > { %2366 = vmatmul.mubr.bf16.gmra.mrb[84].mxu1 %v7035_v9  ;;  %3728 = vmatmul.mubr.bf16.gmra.mrb[160].mxu0 %v7317_v60  ;;  %v6640_v9 = vld [vmem:[%s8548_s2 + $0x128] sm:$0xff]  }
 0x208   : > { %2373 = vmatprep.mubr.bf16.mxu1 %v7097_v5  ;;  %3735 = vmatprep.mubr.bf16.mxu0 %v7633_v12 }
 0x209   : > { %6119 = vmatpush3.bf16.msra.mxu1 %v6633_v20 }
 0x20a   : > { %6120 = vmatprep.subr.bf16.mxu1 %v6638_v40 }
 0x20c   : > { %v5586_v63 = vpop.f32.mrb[72].mxu0 }
 0x20d   : > { %v5587_v22 = vpop.f32.mrb[73].mxu0  ;;  %6121 = vmatpush3.bf16.msra.mxu1 %v6638_v40 }
 0x20e   : > { %v7645_v56 = vadd.f32 %v5587_v22, %v5586_v63  ;;  %v5589_v41 = vpop.f32.mrb[74].mxu0  ;;  %6122 = vmatprep.subr.bf16.mxu1 %v6639_v50 }
 0x20f   : > { %2374 = vmatmul.mubr.bf16.gmra.mrb[88].mxu1 %v7045_v21  ;;  %v5590_v5 = vpop.f32.mrb[75].mxu0  ;;  %3736 = vmatmul.mubr.bf16.gmra.mrb[164].mxu0 %v7340_v35  ;;  %v6644_v21 = vld [vmem:[%s8548_s2 + $0x580] sm:$0xff]  }
 0x210   : > { %8556 = vst [vmem:[#allocation3_spill] sm:$0xff] %v7645_v56  ;;  %v7652_v19 = vadd.f32 %v5590_v5, %v5589_v41  ;;  %2381 = vmatprep.mubr.bf16.mxu1 %v7167_v8  ;;  %4348 = vmatprep.mubr.bf16.mxu0 %v7196_v39  ;;  %v6645_v8 = vld [vmem:[%s8548_s2 + $0x5c8] sm:$0xff]  }
 0x211   : > { %6123 = vmatpush3.bf16.msra.mxu1 %v6639_v50 }
 0x212   : > { %8557 = vst [vmem:[#allocation4_spill] sm:$0xff] %v7652_v19  ;;  %6124 = vmatprep.subr.bf16.mxu1 %v6640_v9 }
 0x215   : > { %6125 = vmatpush3.bf16.msra.mxu1 %v6640_v9 }
 0x216   : > { %6126 = vmatprep.subr.bf16.mxu1 %v6641_v45 }
 0x217   : > { %2382 = vmatmul.mubr.bf16.gmra.mrb[92].mxu1 %v7138_v33  ;;  %4349 = vmatmul.mubr.bf16.vlgmr.msra.gmra.mrb[168].mxu0 %v7154_v52  ;;  %v6647_v33 = vld [vmem:[%s8548_s2 + $0x340] sm:$0xff]  }
 0x218   : > { %2389 = vmatprep.mubr.bf16.mxu1 %v7196_v39  ;;  %4356 = vmatprep.mubr.bf16.mxu0 %v7225_v38  ;;  %v6649_v39 = vld [vmem:[%s8548_s2 + $0x5d0] sm:$0xff]  }
 0x219   : > { %6127 = vmatpush3.bf16.msra.mxu1 %v6641_v45  ;;  %6003 = vmatpush3.bf16.msra.mxu0 %v6644_v21  ;;  %v6650_v45 = vld [vmem:[%s8548_s2 + $0x590] sm:$0xff]  }
 0x21a   : > { %v5378_v20 = vpop.f32.mrb[0].mxu1  ;;  %v5592_v28 = vpop.f32.mrb[76].mxu0  ;;  %6128 = vmatprep.subr.bf16.mxu1 %v6642_v1  ;;  %6004 = vmatprep.subr.bf16.mxu0 %v6645_v8 }
 0x21b   : > { %v5379_v55 = vpop.f32.mrb[1].mxu1  ;;  %v5593_v40 = vpop.f32.mrb[77].mxu0 }
 0x21c   : > { %v7681_v50 = vadd.f32 %v5379_v55, %v5378_v20  ;;  %v7683_v63 = vadd.f32 %v5593_v40, %v5592_v28  ;;  %v5381_v22 = vpop.f32.mrb[2].mxu1  ;;  %v5595_v41 = vpop.f32.mrb[78].mxu0  ;;  %v6653_v20 = vld [vmem:[%s8548_s2 + $0x5d8] sm:$0xff]   ;;  %v6657_v28 = vld [vmem:[%s8548_s2 + $0x5e0] sm:$0xff]  }
 0x21d   : > { %v5382_v9 = vpop.f32.mrb[3].mxu1  ;;  %v5596_v5 = vpop.f32.mrb[79].mxu0  ;;  %6129 = vmatpush3.bf16.msra.mxu1 %v6642_v1  ;;  %6005 = vmatpush3.bf16.msra.mxu0 %v6646_v24  ;;  %v6654_v1 = vld [vmem:[%s8548_s2 + $0x598] sm:$0xff]  }
 0x21e   : > { %8558 = vst [vmem:[#allocation5_spill] sm:$0xff] %v7683_v63  ;;  %v7688_v21 = vadd.f32 %v5382_v9, %v5381_v22  ;;  %v7690_v8 = vadd.f32 %v5596_v5, %v5595_v41  ;;  %5714 = vmatprep.subr.bf16.mxu1 %v6647_v33  ;;  %6006 = vmatprep.subr.bf16.mxu0 %v6649_v39  ;;  %v6658_v22 = vld [vmem:[%s8548_s2 + $0x5a0] sm:$0xff]  }
 0x21f   : > { %2390 = vmatmul.mubr.bf16.gmra.mrb[96].mxu1 %v7154_v52  ;;  %4357 = vmatmul.mubr.bf16.gmra.mrb[172].mxu0 %v7214_v62 }
 0x220   : > { %8559 = vst [vmem:[#allocation6_spill] sm:$0xff] %v7690_v8  ;;  %2397 = vmatprep.mubr.bf16.mxu1 %v7225_v38  ;;  %4364 = vmatprep.mubr.bf16.mxu0 %v7243_v7 }
 0x221   : > { %6007 = vmatpush3.bf16.msra.mxu0 %v6650_v45  ;;  %v6661_v45 = vld [vmem:[%s8548_s2 + $0x5e8] sm:$0xff]  }
 0x222   : > { %v5384_v24 = vpop.f32.mrb[4].mxu1  ;;  %6008 = vmatprep.subr.bf16.mxu0 %v6653_v20 }
 0x223   : > { %v5385_v33 = vpop.f32.mrb[5].mxu1 }
 0x224   : > { %v7705_v39 = vadd.f32 %v5385_v33, %v5384_v24  ;;  %v5387_v52 = vpop.f32.mrb[6].mxu1  ;;  %v5598_v55 = vpop.f32.mrb[80].mxu0  ;;  %v6662_v24 = vld [vmem:[%s8548_s2 + $0x5a8] sm:$0xff]   ;;  %v6670_v33 = vld [vmem:[%s8548_s2 + $0x5b8] sm:$0xff]  }
 0x225   : > { %v5388_v40 = vpop.f32.mrb[7].mxu1  ;;  %v5599_v38 = vpop.f32.mrb[81].mxu0  ;;  %6009 = vmatpush3.bf16.msra.mxu0 %v6654_v1 }
 0x226   : > { %v7710_v41 = vadd.f32 %v5388_v40, %v5387_v52  ;;  %v7712_v9 = vadd.f32 %v5599_v38, %v5598_v55  ;;  %v5601_v5 = vpop.f32.mrb[82].mxu0  ;;  %6010 = vmatprep.subr.bf16.mxu0 %v6657_v28  ;;  %v6665_v28 = vld [vmem:[%s8548_s2 + $0x5f0] sm:$0xff]  }
 0x227   : > { %2398 = vmatmul.mubr.bf16.gmra.mrb[100].mxu1 %v7214_v62  ;;  %v5602_v20 = vpop.f32.mrb[83].mxu0  ;;  %4365 = vmatmul.mubr.bf16.gmra.mrb[176].mxu0 %v7218_v15  ;;  %v6666_v62 = vld [vmem:[%s8548_s2 + $0x5b0] sm:$0xff]  }
 0x228   : > { %8560 = vst [vmem:[#allocation7_spill] sm:$0xff] %v7712_v9  ;;  %v7719_v1 = vadd.f32 %v5602_v20, %v5601_v5  ;;  %2405 = vmatprep.mubr.bf16.mxu1 %v7243_v7  ;;  %4372 = vmatprep.mubr.bf16.mxu0 %v7270_v31  ;;  %v6669_v7 = vld [vmem:[%s8548_s2 + $0x5f8] sm:$0xff]  }
 0x229   : > { %6011 = vmatpush3.bf16.msra.mxu0 %v6658_v22  ;;  %v1253_v22 = vrot.slane %v7008_v37, 2 }
 0x22a   : > { %8561 = vst [vmem:[#allocation8_spill] sm:$0xff] %v7719_v1  ;;  %6012 = vmatprep.subr.bf16.mxu0 %v6661_v45  ;;  %v8577_v1 = vshll.u32 %v7611_v2, 16 }
 0x22c   : > { %v1215_v9 = vrot.slane %v8577_v1, 2 }
 0x22d   : > { %6013 = vmatpush3.bf16.msra.mxu0 %v6662_v24  ;;  %v1252_v24 = vrot.slane %v7004_v29, 2  ;;  %v8551_v29 = vshll.u32 %v7405_v48, 16 }
 0x22e   : > { %6014 = vmatprep.subr.bf16.mxu0 %v6665_v28 }
 0x22f   : > { %2406 = vmatmul.mubr.bf16.gmra.mrb[104].mxu1 %v7218_v15  ;;  %4373 = vmatmul.mubr.bf16.gmra.mrb[180].mxu0 %v7260_v43  ;;  %v1254_v37 = vsel %vm1251_vm3, %v1252_v24, %v1253_v22 }
 0x230   : > { %2413 = vmatprep.mubr.bf16.mxu1 %v7270_v31  ;;  %4380 = vmatprep.mubr.bf16.mxu0 %v7294_v3 }
 0x231   : > { %6015 = vmatpush3.bf16.msra.mxu0 %v6666_v62 }
 0x232   : > { %v5390_v52 = vpop.f32.mrb[8].mxu1  ;;  %v5604_v55 = vpop.f32.mrb[84].mxu0  ;;  %6016 = vmatprep.subr.bf16.mxu0 %v6669_v7  ;;  %v7758_v7 = vpack.c.bf16 %v7391_v11, %v7391_v11  ;;  %v8552_v11 = vshrl.u32 %v7405_v48, 16 }
 0x233   : > { %v5391_v40 = vpop.f32.mrb[9].mxu1  ;;  %v5605_v38 = vpop.f32.mrb[85].mxu0 }
 0x234   : > { %v7743_v5 = vadd.f32 %v5391_v40, %v5390_v52  ;;  %v7745_v15 = vadd.f32 %v5605_v38, %v5604_v55  ;;  %v5393_v45 = vpop.f32.mrb[10].mxu1  ;;  %v5607_v31 = vpop.f32.mrb[86].mxu0  ;;  %v8550_v24 = vshll.u32 %v7758_v7, 16 }
 0x235   : > { %v5394_v20 = vpop.f32.mrb[11].mxu1  ;;  %v5608_v3 = vpop.f32.mrb[87].mxu0  ;;  %6017 = vmatpush3.bf16.msra.mxu0 %v6670_v33 }
 0x236   : > { %8562 = vst [vmem:[#allocation9_spill] sm:$0xff] %v7745_v15  ;;  %v7748_v28 = vadd.f32 %v5394_v20, %v5393_v45  ;;  %v7750_v62 = vadd.f32 %v5608_v3, %v5607_v31  ;;  %v1026_v3 = vrot.slane %v8551_v29, 1 }
 0x237   : > { %2414 = vmatmul.mubr.bf16.gmra.mrb[108].mxu1 %v7260_v43  ;;  %4381 = vmatmul.mubr.bf16.gmra.mrb[184].mxu0 %v7264_v59  ;;  %v6648_v43 = vld [vmem:[%s8548_s2 + $0x300] sm:$0xff]  }
 0x238   : > { %8563 = vst [vmem:[#allocation10_spill] sm:$0xff] %v7750_v62  ;;  %6130 = vmatprep.mubr.bf16.mxu1 %v1254_v37  ;;  %4388 = vmatprep.mubr.bf16.mxu0 %v7431_v27  ;;  %v6651_v27 = vld [vmem:[%s8548_s2 + $0x348] sm:$0xff]  }
 0x23a   : > { %v5396_v52 = vpop.f32.mrb[12].mxu1 }
 0x23b   : > { %v5397_v33 = vpop.f32.mrb[13].mxu1 }
 0x23c   : > { %v7761_v55 = vadd.f32 %v5397_v33, %v5396_v52  ;;  %v5399_v40 = vpop.f32.mrb[14].mxu1  ;;  %v5610_v38 = vpop.f32.mrb[88].mxu0  ;;  %v6652_v33 = vld [vmem:[%s8548_s2 + $0x308] sm:$0xff]  }
 0x23d   : > { %v5400_v59 = vpop.f32.mrb[15].mxu1  ;;  %v5611_v22 = vpop.f32.mrb[89].mxu0 }
 0x23e   : > { %v7770_v45 = vadd.f32 %v5400_v59, %v5399_v40  ;;  %v7772_v31 = vadd.f32 %v5611_v22, %v5610_v38  ;;  %v5613_v20 = vpop.f32.mrb[90].mxu0  ;;  %v6655_v40 = vld [vmem:[%s8548_s2 + $0x350] sm:$0xff]   ;;  %v1031_v38 = vrot.slane %v8550_v24, 1  ;;  %v6659_v59 = vld [vmem:[%s8548_s2 + $0x358] sm:$0xff]  }
 0x23f   : > { %v5614_v37 = vpop.f32.mrb[91].mxu0  ;;  %6131 = vmatmul.mubr.bf16.vlgmr.msra.gmra.mrb[64].mxu1 %v7464_v6  ;;  %4389 = vmatmul.mubr.bf16.gmra.mrb[188].mxu0 %v7317_v60  ;;  %v1027_v6 = vor.u32 %v1026_v3, %v8552_v11 }
 0x240   : > { %8564 = vst [vmem:[#allocation11_spill] sm:$0xff] %v7772_v31  ;;  %v7779_v52 = vadd.f32 %v5614_v37, %v5613_v20  ;;  %5715 = vmatpush3.bf16.msra.mxu1 %v6648_v43  ;;  %6134 = vmatprep.mubr.bf16.mxu1 %v7485_v46  ;;  %v6656_v43 = vld [vmem:[%s8548_s2 + $0x310] sm:$0xff]  }
 0x241   : > { %5716 = vmatprep.subr.bf16.mxu1 %v6651_v27  ;;  %4396 = vmatprep.mubr.bf16.mxu0 %v7633_v12  ;;  %v1032_v22 = vsel %vm888_vm0, %v1027_v6, %v1031_v38  ;;  %v6660_v12 = vld [vmem:[%s8548_s2 + $0x318] sm:$0xff]   ;;  %v6663_v27 = vld [vmem:[%s8548_s2 + $0x360] sm:$0xff]  }
 0x242   : > { %8565 = vst [vmem:[#allocation12_spill] sm:$0xff] %v7779_v52  ;;  %v6680_v52 = vld [vmem:[%s8548_s2 + $0x3a8] sm:$0xff]  }
 0x244   : > { %5717 = vmatpush3.bf16.msra.mxu1 %v6652_v33 }
 0x245   : > { %5718 = vmatprep.subr.bf16.mxu1 %v6655_v40 }
 0x247   : > { %6135 = vmatmul.mubr.bf16.gmra.mrb[68].mxu1 %v7493_v58  ;;  %4397 = vmatmul.mubr.bf16.gmra.mrb[192].mxu0 %v7340_v35 }
 0x248   : > { %5719 = vmatpush3.bf16.msra.mxu1 %v6656_v43  ;;  %6138 = vmatprep.mubr.bf16.mxu1 %v7520_v17 }
 0x249   : > { %5720 = vmatprep.subr.bf16.mxu1 %v6659_v59  ;;  %4404 = vmatprep.mubr.bf16.mxu0 %v1032_v22  ;;  %v6664_v59 = vld [vmem:[%s8548_s2 + $0x320] sm:$0xff]   ;;  %v6667_v22 = vld [vmem:[%s8548_s2 + $0x368] sm:$0xff]  }
 0x24a   : > { %v5402_v20 = vpop.f32.mrb[16].mxu1  ;;  %v5616_v3 = vpop.f32.mrb[92].mxu0 }
 0x24b   : > { %v5403_v37 = vpop.f32.mrb[17].mxu1  ;;  %v5617_v33 = vpop.f32.mrb[93].mxu0 }
 0x24c   : > { %v7809_v40 = vadd.f32 %v5403_v37, %v5402_v20  ;;  %v7811_v6 = vadd.f32 %v5617_v33, %v5616_v3  ;;  %5721 = vmatpush3.bf16.msra.mxu1 %v6660_v12  ;;  %v5405_v38 = vpop.f32.mrb[18].mxu1  ;;  %v5619_v43 = vpop.f32.mrb[94].mxu0  ;;  %v6668_v12 = vld [vmem:[%s8548_s2 + $0x328] sm:$0xff]  }
 0x24d   : > { %v5406_v24 = vpop.f32.mrb[19].mxu1  ;;  %v5620_v29 = vpop.f32.mrb[95].mxu0  ;;  %5722 = vmatprep.subr.bf16.mxu1 %v6663_v27 }
 0x24e   : > { %8566 = vst [vmem:[#allocation13_spill] sm:$0xff] %v7811_v6  ;;  %v7819_v11 = vadd.f32 %v5406_v24, %v5405_v38  ;;  %v7821_v20 = vadd.f32 %v5620_v29, %v5619_v43  ;;  %v6671_v24 = vld [vmem:[%s8548_s2 + $0x370] sm:$0xff]  }
 0x24f   : > { %6139 = vmatmul.mubr.bf16.gmra.mrb[72].mxu1 %v7528_v49  ;;  %4405 = vmatmul.mubr.bf16.gmra.mrb[196].mxu0 %v7405_v48  ;;  %v6672_v38 = vld [vmem:[%s8548_s2 + $0x330] sm:$0xff]  }
 0x250   : > { %8567 = vst [vmem:[#allocation14_spill] sm:$0xff] %v7821_v20  ;;  %5723 = vmatpush3.bf16.msra.mxu1 %v6664_v59  ;;  %6142 = vmatprep.mubr.bf16.mxu1 %v7555_v47  ;;  %v6678_v20 = vld [vmem:[%s8548_s2 + $0x398] sm:$0xff]  }
 0x251   : > { %4445 = vmatprep.mubr.bf16.mxu0 %v7203_v51  ;;  %5724 = vmatprep.subr.bf16.mxu1 %v6667_v22  ;;  %v6673_v22 = vld [vmem:[%s8548_s2 + $0x378] sm:$0xff]  }
 0x252   : > { %v5408_v29 = vpop.f32.mrb[20].mxu1 }
 0x253   : > { %v5409_v27 = vpop.f32.mrb[21].mxu1 }
 0x254   : > { %v7833_v3 = vadd.f32 %v5409_v27, %v5408_v29  ;;  %5725 = vmatpush3.bf16.msra.mxu1 %v6668_v12  ;;  %v5411_v37 = vpop.f32.mrb[22].mxu1  ;;  %v5622_v33 = vpop.f32.mrb[96].mxu0 }
 0x255   : > { %v5412_v43 = vpop.f32.mrb[23].mxu1  ;;  %v5623_v59 = vpop.f32.mrb[97].mxu0  ;;  %5726 = vmatprep.subr.bf16.mxu1 %v6671_v24  ;;  %v6674_v24 = vld [vmem:[%s8548_s2 + $0x338] sm:$0xff]  }
 0x256   : > { %v7841_v14 = vadd.f32 %v5412_v43, %v5411_v37  ;;  %v7843_v57 = vadd.f32 %v5623_v59, %v5622_v33  ;;  %v5625_v29 = vpop.f32.mrb[98].mxu0  ;;  %v6675_v37 = vld [vmem:[%s8548_s2 + $0x380] sm:$0xff]   ;;  %v6676_v33 = vld [vmem:[%s8548_s2 + $0x388] sm:$0xff]  }
 0x257   : > { %v5626_v27 = vpop.f32.mrb[99].mxu0  ;;  %6143 = vmatmul.mubr.bf16.gmra.mrb[76].mxu1 %v7563_v54  ;;  %4446 = vmatmul.mubr.bf16.vlgmr.msra.gmra.mrb[200].mxu0 %v7207_v53 }
 0x258   : > { %8568 = vst [vmem:[#allocation15_spill] sm:$0xff] %v7843_v57  ;;  %v7847_v12 = vadd.f32 %v5626_v27, %v5625_v29  ;;  %5727 = vmatpush3.bf16.msra.mxu1 %v6672_v38  ;;  %3107 = vmatprep.mubr.bf16.mxu1 %v7109_v16  ;;  %v6677_v16 = vld [vmem:[%s8548_s2 + $0x390] sm:$0xff]  }
 0x259   : > { %4453 = vmatprep.mubr.bf16.mxu0 %v7228_v42  ;;  %5728 = vmatprep.subr.bf16.mxu1 %v6673_v22 }
 0x25a   : > { %8569 = vst [vmem:[#allocation16_spill] sm:$0xff] %v7847_v12 }
 0x25c   : > { %5729 = vmatpush3.bf16.msra.mxu1 %v6674_v24 }
 0x25d   : > { %6146 = vmatprep.subr.bf16.mxu1 %v6675_v37 }
 0x25f   : > { %3108 = vmatmul.mubr.bf16.vlgmr.msra.gmra.mrb[112].mxu1 %v7116_v18  ;;  %4454 = vmatmul.mubr.bf16.gmra.mrb[204].mxu0 %v7233_v44 }
 0x260   : > { %6147 = vmatpush3.bf16.msra.mxu1 %v6675_v37  ;;  %3115 = vmatprep.mubr.bf16.mxu1 %v7170_v10 }
 0x261   : > { %4461 = vmatprep.mubr.bf16.mxu0 %v7249_v25  ;;  %6148 = vmatprep.subr.bf16.mxu1 %v6676_v33 }
 0x262   : > { %v5414_v38 = vpop.f32.mrb[24].mxu1  ;;  %v5628_v43 = vpop.f32.mrb[100].mxu0 }
 0x263   : > { %v5415_v59 = vpop.f32.mrb[25].mxu1  ;;  %v5629_v22 = vpop.f32.mrb[101].mxu0 }
 0x264   : > { %v7867_v29 = vadd.f32 %v5415_v59, %v5414_v38  ;;  %v7869_v27 = vadd.f32 %v5629_v22, %v5628_v43  ;;  %v5417_v18 = vpop.f32.mrb[26].mxu1  ;;  %v5631_v24 = vpop.f32.mrb[102].mxu0  ;;  %6149 = vmatpush3.bf16.msra.mxu1 %v6676_v33 }
 0x265   : > { %v5418_v37 = vpop.f32.mrb[27].mxu1  ;;  %v5632_v30 = vpop.f32.mrb[103].mxu0  ;;  %6150 = vmatprep.subr.bf16.mxu1 %v6677_v16 }
 0x266   : > { %8570 = vst [vmem:[#allocation17_spill] sm:$0xff] %v7869_v27  ;;  %v7871_v12 = vadd.f32 %v5418_v37, %v5417_v18  ;;  %v7873_v57 = vadd.f32 %v5632_v30, %v5631_v24  ;;  %v6679_v30 = vld [vmem:[%s8548_s2 + $0x3a0] sm:$0xff]  }
 0x267   : > { %3116 = vmatmul.mubr.bf16.gmra.mrb[116].mxu1 %v7178_v13  ;;  %4462 = vmatmul.mubr.bf16.gmra.mrb[208].mxu0 %v7253_v26 }
 0x268   : > { %8571 = vst [vmem:[#allocation18_spill] sm:$0xff] %v7873_v57  ;;  %3123 = vmatprep.mubr.bf16.mxu1 %v7203_v51  ;;  %4469 = vmatprep.mubr.bf16.mxu0 %v7273_v32 }
 0x269   : > { %6151 = vmatpush3.bf16.msra.mxu1 %v6677_v16 }
 0x26a   : > { %v5420_v33 = vpop.f32.mrb[28].mxu1  ;;  %v5666_v38 = vpop.f32.mrb[104].mxu0  ;;  %6152 = vmatprep.subr.bf16.mxu1 %v6678_v20 }
 0x26b   : > { %v5421_v43 = vpop.f32.mrb[29].mxu1  ;;  %v5667_v59 = vpop.f32.mrb[105].mxu0 }
 0x26c   : > { %v7885_v22 = vadd.f32 %v5421_v43, %v5420_v33  ;;  %v7887_v18 = vadd.f32 %v5667_v59, %v5666_v38  ;;  %v5423_v24 = vpop.f32.mrb[30].mxu1  ;;  %v5669_v37 = vpop.f32.mrb[106].mxu0  ;;  %v1212_v33 = vshrl.u32 %v7611_v2, 16  ;;  %v8574_v59 = vshrl.u32 %v7340_v35, 16 }
 0x26d   : > { %v5424_v57 = vpop.f32.mrb[31].mxu1  ;;  %v5670_v27 = vpop.f32.mrb[107].mxu0  ;;  %6153 = vmatpush3.bf16.msra.mxu1 %v6678_v20 }
 0x26e   : > { %8572 = vst [vmem:[#allocation19_spill] sm:$0xff] %v7887_v18  ;;  %v7889_v6 = vadd.f32 %v5424_v57, %v5423_v24  ;;  %v7891_v16 = vadd.f32 %v5670_v27, %v5669_v37  ;;  %6154 = vmatprep.subr.bf16.mxu1 %v6679_v30  ;;  %v6681_v27 = vld [vmem:[%s8548_s2 + $0x3b0] sm:$0xff]   ;;  %v1209_v24 = vrot.slane %v8574_v59, 1  ;;  %v8575_v37 = vshll.u32 %v7340_v35, 16 }
 0x26f   : > { %3124 = vmatmul.mubr.bf16.gmra.mrb[120].mxu1 %v7207_v53  ;;  %4470 = vmatmul.mubr.bf16.gmra.mrb[212].mxu0 %v7278_v34  ;;  %v1214_v15 = vrot.slane %v1212_v33, 1  ;;  %v1086_v33 = vrot.slane %v7307_v23, 1 }
 0x270   : > { %8573 = vst [vmem:[#allocation20_spill] sm:$0xff] %v7891_v16  ;;  %3131 = vmatprep.mubr.bf16.mxu1 %v7228_v42  ;;  %4477 = vmatprep.mubr.bf16.mxu0 %v7444_v61  ;;  %v1210_v16 = vrot.slane %v8575_v37, 2  ;;  %v8581_v37 = vshrl.u32 %v7405_v48, 16 }
 0x271   : > { %6155 = vmatpush3.bf16.msra.mxu1 %v6679_v30 }
 0x272   : > { %v5442_v57 = vpop.f32.mrb[32].mxu1  ;;  %v5672_v20 = vpop.f32.mrb[108].mxu0  ;;  %6156 = vmatprep.subr.bf16.mxu1 %v6680_v52 }
 0x273   : > { %v5443_v38 = vpop.f32.mrb[33].mxu1  ;;  %v5673_v43 = vpop.f32.mrb[109].mxu0 }
 0x274   : > { %v5444_v18 = vadd.f32 %v5443_v38, %v5442_v57  ;;  %v7908_v31 = vadd.f32 %v5673_v43, %v5672_v20  ;;  %v5445_v62 = vpop.f32.mrb[34].mxu1  ;;  %v5675_v30 = vpop.f32.mrb[110].mxu0  ;;  %v6682_v57 = vld [vmem:[%s8548_s2 + $0x3b8] sm:$0xff]  }
 0x275   : > { %v5446_v8 = vpop.f32.mrb[35].mxu1  ;;  %v5676_v63 = vpop.f32.mrb[111].mxu0  ;;  %6157 = vmatpush3.bf16.msra.mxu1 %v6680_v52 }
 0x276   : > { %8576 = vst [vmem:[#allocation21_spill] sm:$0xff] %v7908_v31  ;;  %v7913_v19 = vadd.f32 %v5444_v18, %v7681_v50  ;;  %v5447_v56 = vadd.f32 %v5446_v8, %v5445_v62  ;;  %v7915_v59 = vadd.f32 %v5676_v63, %v5675_v30  ;;  %6158 = vmatprep.subr.bf16.mxu1 %v6681_v27  ;;  %v1221_v63 = vshrl.u32 %v7758_v7, 16 }
 0x277   : > { %3132 = vmatmul.mubr.bf16.gmra.mrb[124].mxu1 %v7233_v44  ;;  %4478 = vmatmul.mubr.bf16.gmra.mrb[216].mxu0 %v7456_v0  ;;  %v1211_v50 = vor.u32 %v1210_v16, %v1209_v24  ;;  %v1216_v8 = vor.u32 %v1215_v9, %v1214_v15  ;;  %v1085_v18 = vrot.slane %v7317_v60, 1  ;;  %v1218_v30 = vrot.slane %v8581_v37, 1 }
 0x278   : > { %8578 = vst [vmem:[#allocation22_spill] sm:$0xff] %v7913_v19  ;;  %8579 = vst [vmem:[#allocation23_spill] sm:$0xff] %v7915_v59  ;;  %v7923_v1 = vadd.f32 %v5447_v56, %v7688_v21  ;;  %3139 = vmatprep.mubr.bf16.mxu1 %v7249_v25  ;;  %4485 = vmatprep.mubr.bf16.mxu0 %v7353_v4  ;;  %v6683_v56 = vld [vmem:[%s8548_s2 + $0x480] sm:$0xff]   ;;  %v8582_v59 = vshll.u32 %v7405_v48, 16  ;;  %v8583_v19 = vshll.u32 %v7758_v7, 16 }
 0x279   : > { %6159 = vmatpush3.bf16.msra.mxu1 %v6681_v27  ;;  %v7936_v16 = vsel %vm1118_vm1, %v1211_v50, %v1216_v8  ;;  %v7950_v50 = vsel %vm1057_vm2, %v1085_v18, %v1086_v33 }
 0x27a   : > { %8580 = vst [vmem:[#allocation24_spill] sm:$0xff] %v7923_v1  ;;  %v5448_v62 = vpop.f32.mrb[36].mxu1  ;;  %v5678_v52 = vpop.f32.mrb[112].mxu0  ;;  %6160 = vmatprep.subr.bf16.mxu1 %v6682_v57  ;;  %v1219_v31 = vrot.slane %v8582_v59, 2  ;;  %v1223_v1 = vrot.slane %v1221_v63, 1 }
 0x27b   : > { %v5449_v21 = vpop.f32.mrb[37].mxu1  ;;  %v5679_v20 = vpop.f32.mrb[113].mxu0 }
 0x27c   : > { %v5450_v38 = vadd.f32 %v5449_v21, %v5448_v62  ;;  %v7933_v43 = vadd.f32 %v5679_v20, %v5678_v52  ;;  %v5451_v9 = vpop.f32.mrb[38].mxu1  ;;  %v5681_v15 = vpop.f32.mrb[114].mxu0  ;;  %v1224_v62 = vrot.slane %v8583_v19, 2  ;;  %v1088_v19 = vrot.slane %v7340_v35, 1 }
 0x27d   : > { %v5452_v27 = vpop.f32.mrb[39].mxu1  ;;  %v5682_v24 = vpop.f32.mrb[115].mxu0  ;;  %6161 = vmatpush3.bf16.msra.mxu1 %v6682_v57  ;;  %v1220_v57 = vor.u32 %v1219_v31, %v1218_v30 }
 0x27e   : > { %v7945_v52 = vadd.f32 %v5450_v38, %v7705_v39  ;;  %v5453_v21 = vadd.f32 %v5452_v27, %v5451_v9  ;;  %v7947_v20 = vadd.f32 %v5682_v24, %v5681_v15  ;;  %5858 = vmatprep.subr.bf16.mxu1 %v6683_v56  ;;  %v1089_v39 = vrot.slane %v7611_v2, 1 }
 0x27f   : > { %3140 = vmatmul.mubr.bf16.gmra.mrb[128].mxu1 %v7253_v26  ;;  %4486 = vmatmul.mubr.bf16.gmra.mrb[220].mxu0 %v7950_v50  ;;  %v1225_v8 = vor.u32 %v1224_v62, %v1223_v1  ;;  %v1091_v62 = vrot.slane %v7405_v48, 1 }
 0x280   : > { %8584 = vst [vmem:[#allocation25_spill] sm:$0xff] %v7947_v20  ;;  %v7955_v59 = vadd.f32 %v5453_v21, %v7710_v41  ;;  %3147 = vmatprep.mubr.bf16.mxu1 %v7273_v32  ;;  %4493 = vmatprep.mubr.bf16.mxu0 %v7936_v16  ;;  %v7964_v27 = vsel %vm1057_vm2, %v1088_v19, %v1089_v39  ;;  %v1092_v19 = vrot.slane %v7758_v7, 1 }
 0x281   : > { %v1226_v21 = vsel %vm1118_vm1, %v1220_v57, %v1225_v8 }
 0x282   : > { %v5454_v63 = vpop.f32.mrb[40].mxu1  ;;  %v5684_v18 = vpop.f32.mrb[116].mxu0 }
 0x283   : > { %v5455_v33 = vpop.f32.mrb[41].mxu1  ;;  %v5685_v56 = vpop.f32.mrb[117].mxu0 }
 0x284   : > { %v5456_v38 = vadd.f32 %v5455_v33, %v5454_v63  ;;  %v7961_v9 = vadd.f32 %v5685_v56, %v5684_v18  ;;  %v5457_v15 = vpop.f32.mrb[42].mxu1  ;;  %v5687_v41 = vpop.f32.mrb[118].mxu0 }
 0x285   : > { %v5458_v24 = vpop.f32.mrb[43].mxu1  ;;  %v5688_v37 = vpop.f32.mrb[119].mxu0 }
 0x286   : > { %v7968_v20 = vadd.f32 %v5456_v38, %v7743_v5  ;;  %v5459_v31 = vadd.f32 %v5458_v24, %v5457_v15  ;;  %v7970_v1 = vadd.f32 %v5688_v37, %v5687_v41  ;;  %v1093_v38 = vsel %vm1057_vm2, %v1091_v62, %v1092_v19 }
 0x287   : > { %3148 = vmatmul.mubr.bf16.gmra.mrb[132].mxu1 %v7278_v34  ;;  %4494 = vmatmul.mubr.bf16.gmra.mrb[224].mxu0 %v7964_v27 }
 0x288   : > { %v7975_v30 = vadd.f32 %v5459_v31, %v7748_v28  ;;  %3155 = vmatprep.mubr.bf16.mxu1 %v7444_v61  ;;  %4501 = vmatprep.mubr.bf16.mxu0 %v1226_v21 }
 0x28a   : > { %v5460_v39 = vpop.f32.mrb[44].mxu1  ;;  %v5690_v5 = vpop.f32.mrb[120].mxu0 }
 0x28b   : > { %v5461_v57 = vpop.f32.mrb[45].mxu1  ;;  %v5691_v8 = vpop.f32.mrb[121].mxu0 }
 0x28c   : > { %v5462_v63 = vadd.f32 %v5461_v57, %v5460_v39  ;;  %v7980_v18 = vadd.f32 %v5691_v8, %v5690_v5  ;;  %v5463_v33 = vpop.f32.mrb[46].mxu1  ;;  %v5693_v56 = vpop.f32.mrb[122].mxu0 }
 0x28d   : > { %v5464_v28 = vpop.f32.mrb[47].mxu1  ;;  %v5694_v15 = vpop.f32.mrb[123].mxu0 }
 0x28e   : > { %v7984_v41 = vadd.f32 %v5462_v63, %v7761_v55  ;;  %v5465_v24 = vadd.f32 %v5464_v28, %v5463_v33  ;;  %v7986_v37 = vadd.f32 %v5694_v15, %v5693_v56 }
 0x28f   : > { %3156 = vmatmul.mubr.bf16.gmra.mrb[136].mxu1 %v7456_v0  ;;  %4502 = vmatmul.mubr.bf16.gmra.mrb[228].mxu0 %v1093_v38 }
 0x290   : > { %v7990_v21 = vadd.f32 %v5465_v24, %v7770_v45  ;;  %3163 = vmatprep.mubr.bf16.mxu1 %v7353_v4 }
 0x292   : > { %v5466_v31 = vpop.f32.mrb[48].mxu1  ;;  %v5696_v39 = vpop.f32.mrb[124].mxu0 }
 0x293   : > { %v5467_v5 = vpop.f32.mrb[49].mxu1  ;;  %v5697_v62 = vpop.f32.mrb[125].mxu0 }
 0x294   : > { %v5468_v19 = vadd.f32 %v5467_v5, %v5466_v31  ;;  %v7993_v57 = vadd.f32 %v5697_v62, %v5696_v39  ;;  %v5469_v55 = vpop.f32.mrb[50].mxu1  ;;  %v5699_v8 = vpop.f32.mrb[126].mxu0 }
 0x295   : > { %v5470_v63 = vpop.f32.mrb[51].mxu1  ;;  %v5700_v33 = vpop.f32.mrb[127].mxu0 }
 0x296   : > { %8585 = vst [vmem:[#allocation26_spill] sm:$0xff] %v7993_v57  ;;  %v7996_v56 = vadd.f32 %v5468_v19, %v7809_v40  ;;  %v5471_v38 = vadd.f32 %v5470_v63, %v5469_v55  ;;  %v7998_v28 = vadd.f32 %v5700_v33, %v5699_v8  ;;  %v6684_v19 = vld [vmem:[%s8548_s2 + $0x440] sm:$0xff]  }
 0x297   : > { %3164 = vmatmul.mubr.bf16.gmra.mrb[140].mxu1 %v7950_v50 }
 0x298   : > { %v8002_v45 = vadd.f32 %v5471_v38, %v7819_v11  ;;  %6162 = vmatprep.mubr.bf16.mxu1 %v7485_v46  ;;  %v6685_v11 = vld [vmem:[%s8548_s2 + $0x488] sm:$0xff]  }
 0x29a   : > { %v5472_v15 = vpop.f32.mrb[52].mxu1  ;;  %v5702_v24 = vpop.f32.mrb[128].mxu0 }
 0x29b   : > { %v5473_v31 = vpop.f32.mrb[53].mxu1  ;;  %v5703_v39 = vpop.f32.mrb[129].mxu0 }
 0x29c   : > { %v5474_v5 = vadd.f32 %v5473_v31, %v5472_v15  ;;  %v8005_v62 = vadd.f32 %v5703_v39, %v5702_v24  ;;  %v5475_v57 = vpop.f32.mrb[54].mxu1  ;;  %v5705_v40 = vpop.f32.mrb[130].mxu0  ;;  %v6686_v15 = vld [vmem:[%s8548_s2 + $0x448] sm:$0xff]  }
 0x29d   : > { %v5476_v55 = vpop.f32.mrb[55].mxu1  ;;  %v5706_v8 = vpop.f32.mrb[131].mxu0 }
 0x29e   : > { %v8014_v46 = vadd.f32 %v5474_v5, %v7833_v3  ;;  %v5477_v63 = vadd.f32 %v5476_v55, %v5475_v57  ;;  %v8016_v33 = vadd.f32 %v5706_v8, %v5705_v40  ;;  %v6687_v3 = vld [vmem:[%s8548_s2 + $0x490] sm:$0xff]  }
 0x29f   : > { %6163 = vmatmul.mubr.bf16.vlgmr.msra.gmra.mrb[64].mxu1 %v7493_v58  ;;  %v6688_v55 = vld [vmem:[%s8548_s2 + $0x450] sm:$0xff]  }
 0x2a0   : > { %8586 = vst [vmem:[#allocation27_spill] sm:$0xff] %v8016_v33  ;;  %v8020_v38 = vadd.f32 %v5477_v63, %v7841_v14  ;;  %5859 = vmatpush3.bf16.msra.mxu1 %v6684_v19  ;;  %6166 = vmatprep.mubr.bf16.mxu1 %v7520_v17  ;;  %v6689_v63 = vld [vmem:[%s8548_s2 + $0x498] sm:$0xff]  }
 0x2a1   : > { %5860 = vmatprep.subr.bf16.mxu1 %v6685_v11 }
 0x2a2   : > { %v5478_v57 = vpop.f32.mrb[56].mxu1  ;;  %v5708_v24 = vpop.f32.mrb[132].mxu0 }
 0x2a3   : > { %v5479_v31 = vpop.f32.mrb[57].mxu1  ;;  %v5709_v39 = vpop.f32.mrb[133].mxu0 }
 0x2a4   : > { %v5480_v5 = vadd.f32 %v5479_v31, %v5478_v57  ;;  %v8029_v40 = vadd.f32 %v5709_v39, %v5708_v24  ;;  %5861 = vmatpush3.bf16.msra.mxu1 %v6686_v15  ;;  %v5481_v14 = vpop.f32.mrb[58].mxu1  ;;  %v5711_v19 = vpop.f32.mrb[134].mxu0 }
 0x2a5   : > { %v5482_v8 = vpop.f32.mrb[59].mxu1  ;;  %v5712_v11 = vpop.f32.mrb[135].mxu0  ;;  %5862 = vmatprep.subr.bf16.mxu1 %v6687_v3  ;;  %v6690_v3 = vld [vmem:[%s8548_s2 + $0x458] sm:$0xff]  }
 0x2a6   : > { %8587 = vst [vmem:[#allocation28_spill] sm:$0xff] %v8029_v40  ;;  %v8038_v33 = vadd.f32 %v5480_v5, %v7867_v29  ;;  %v5483_v57 = vadd.f32 %v5482_v8, %v5481_v14  ;;  %v8040_v24 = vadd.f32 %v5712_v11, %v5711_v19  ;;  %v6691_v29 = vld [vmem:[%s8548_s2 + $0x4a0] sm:$0xff]  }
 0x2a7   : > { %6167 = vmatmul.mubr.bf16.gmra.mrb[68].mxu1 %v7528_v49  ;;  %v6692_v11 = vld [vmem:[%s8548_s2 + $0x460] sm:$0xff]  }
 0x2a8   : > { %8588 = vst [vmem:[#allocation29_spill] sm:$0xff] %v8040_v24  ;;  %v8044_v15 = vadd.f32 %v5483_v57, %v7871_v12  ;;  %5863 = vmatpush3.bf16.msra.mxu1 %v6688_v55  ;;  %6170 = vmatprep.mubr.bf16.mxu1 %v7555_v47  ;;  %v6693_v24 = vld [vmem:[%s8548_s2 + $0x4a8] sm:$0xff]  }
 0x2a9   : > { %5864 = vmatprep.subr.bf16.mxu1 %v6689_v63 }
 0x2aa   : > { %v5484_v31 = vpop.f32.mrb[60].mxu1  ;;  %v5810_v39 = vpop.f32.mrb[136].mxu0 }
 0x2ab   : > { %v5485_v5 = vpop.f32.mrb[61].mxu1  ;;  %v5811_v14 = vpop.f32.mrb[137].mxu0 }
 0x2ac   : > { %v5486_v19 = vadd.f32 %v5485_v5, %v5484_v31  ;;  %v8053_v8 = vadd.f32 %v5811_v14, %v5810_v39  ;;  %5865 = vmatpush3.bf16.msra.mxu1 %v6690_v3  ;;  %v5487_v12 = vpop.f32.mrb[62].mxu1  ;;  %v5813_v55 = vpop.f32.mrb[138].mxu0  ;;  %v1279_v14 = vrot.slane %v7317_v60, 2 }
 0x2ad   : > { %v5488_v57 = vpop.f32.mrb[63].mxu1  ;;  %v5814_v63 = vpop.f32.mrb[139].mxu0  ;;  %5866 = vmatprep.subr.bf16.mxu1 %v6691_v29  ;;  %v6694_v29 = vld [vmem:[%s8548_s2 + $0x468] sm:$0xff]  }
 0x2ae   : > { %v8062_v40 = vadd.f32 %v5486_v19, %v7885_v22  ;;  %v5489_v31 = vadd.f32 %v5488_v57, %v5487_v12  ;;  %v8064_v39 = vadd.f32 %v5814_v63, %v5813_v55  ;;  %v6695_v22 = vld [vmem:[%s8548_s2 + $0x4b0] sm:$0xff]   ;;  %v1280_v19 = vrot.slane %v7307_v23, 2  ;;  %v6698_v23 = vld [vmem:[%s8548_s2 + $0x478] sm:$0xff]  }
 0x2af   : > { %6171 = vmatmul.mubr.bf16.gmra.mrb[72].mxu1 %v7563_v54 }
 0x2b0   : > { %v8068_v3 = vadd.f32 %v5489_v31, %v7889_v6  ;;  %5867 = vmatpush3.bf16.msra.mxu1 %v6692_v11  ;;  %6174 = vmatprep.mubr.bf16.mxu1 %v7588_v36  ;;  %v6696_v11 = vld [vmem:[%s8548_s2 + $0x470] sm:$0xff]   ;;  %v8090_v60 = vsel %vm1251_vm3, %v1279_v14, %v1280_v19  ;;  %v6699_v31 = vld [vmem:[%s8548_s2 + $0x4c0] sm:$0xff]  }
 0x2b1   : > { %5868 = vmatprep.subr.bf16.mxu1 %v6693_v24  ;;  %v6697_v24 = vld [vmem:[%s8548_s2 + $0x4b8] sm:$0xff]  }
 0x2b2   : > { %v5816_v5 = vpop.f32.mrb[140].mxu0 }
 0x2b3   : > { %v5817_v12 = vpop.f32.mrb[141].mxu0 }
 0x2b4   : > { %v8079_v6 = vadd.f32 %v5817_v12, %v5816_v5  ;;  %5869 = vmatpush3.bf16.msra.mxu1 %v6694_v29  ;;  %v5819_v55 = vpop.f32.mrb[142].mxu0 }
 0x2b5   : > { %v5820_v57 = vpop.f32.mrb[143].mxu0  ;;  %5870 = vmatprep.subr.bf16.mxu1 %v6695_v22 }
 0x2b6   : > { %v8087_v63 = vadd.f32 %v5820_v57, %v5819_v55  ;;  %v6701_v55 = vld [vmem:[%s8548_s2 + $0x4d0] sm:$0xff]  }
 0x2b7   : > { %6175 = vmatmul.mubr.bf16.gmra.mrb[76].mxu1 %v8090_v60 }
 0x2b8   : > { %5871 = vmatpush3.bf16.msra.mxu1 %v6696_v11  ;;  %3776 = vmatprep.mubr.bf16.mxu1 %v7170_v10  ;;  %v6700_v10 = vld [vmem:[%s8548_s2 + $0x4c8] sm:$0xff]  }
 0x2b9   : > { %5872 = vmatprep.subr.bf16.mxu1 %v6697_v24 }
 0x2ba   : > { %v5822_v29 = vpop.f32.mrb[144].mxu0 }
 0x2bb   : > { %v5823_v22 = vpop.f32.mrb[145].mxu0 }
 0x2bc   : > { %v8100_v5 = vadd.f32 %v5823_v22, %v5822_v29  ;;  %5873 = vmatpush3.bf16.msra.mxu1 %v6698_v23  ;;  %v5825_v14 = vpop.f32.mrb[146].mxu0 }
 0x2bd   : > { %v5826_v19 = vpop.f32.mrb[147].mxu0  ;;  %6178 = vmatprep.subr.bf16.mxu1 %v6699_v31 }
 0x2be   : > { %v8105_v12 = vadd.f32 %v5826_v19, %v5825_v14 }
 0x2bf   : > { %3777 = vmatmul.mubr.bf16.vlgmr.msra.gmra.mrb[144].mxu1 %v7178_v13  ;;  %v6702_v13 = vld [vmem:[%s8548_s2 + $0x4d8] sm:$0xff]  }
 0x2c0   : > { %8589 = vst [vmem:[#allocation30_spill] sm:$0xff] %v8105_v12  ;;  %6179 = vmatpush3.bf16.msra.mxu1 %v6699_v31  ;;  %3784 = vmatprep.mubr.bf16.mxu1 %v7203_v51  ;;  %v6703_v51 = vld [vmem:[%s8548_s2 + $0x4e0] sm:$0xff]  }
 0x2c1   : > { %6180 = vmatprep.subr.bf16.mxu1 %v6700_v10 }
 0x2c2   : > { %v5828_v11 = vpop.f32.mrb[148].mxu0 }
 0x2c3   : > { %v5829_v57 = vpop.f32.mrb[149].mxu0 }
 0x2c4   : > { %v8112_v24 = vadd.f32 %v5829_v57, %v5828_v11  ;;  %v5831_v23 = vpop.f32.mrb[150].mxu0  ;;  %6181 = vmatpush3.bf16.msra.mxu1 %v6700_v10 }
 0x2c5   : > { %v5832_v29 = vpop.f32.mrb[151].mxu0  ;;  %6182 = vmatprep.subr.bf16.mxu1 %v6701_v55 }
 0x2c6   : > { %8590 = vst [vmem:[#allocation31_spill] sm:$0xff] %v8112_v24  ;;  %v8117_v31 = vadd.f32 %v5832_v29, %v5831_v23 }
 0x2c7   : > { %3785 = vmatmul.mubr.bf16.gmra.mrb[148].mxu1 %v7207_v53  ;;  %v6704_v53 = vld [vmem:[%s8548_s2 + $0x4e8] sm:$0xff]  }
 0x2c8   : > { %8591 = vst [vmem:[#allocation32_spill] sm:$0xff] %v8117_v31  ;;  %3792 = vmatprep.mubr.bf16.mxu1 %v7228_v42  ;;  %6183 = vmatpush3.bf16.msra.mxu1 %v6701_v55  ;;  %v6705_v42 = vld [vmem:[%s8548_s2 + $0x4f0] sm:$0xff]  }
 0x2c9   : > { %6184 = vmatprep.subr.bf16.mxu1 %v6702_v13 }
 0x2ca   : > { %v5834_v22 = vpop.f32.mrb[152].mxu0 }
 0x2cb   : > { %v5835_v14 = vpop.f32.mrb[153].mxu0 }
 0x2cc   : > { %v8124_v19 = vadd.f32 %v5835_v14, %v5834_v22  ;;  %v5837_v10 = vpop.f32.mrb[154].mxu0  ;;  %6185 = vmatpush3.bf16.msra.mxu1 %v6702_v13 }
 0x2cd   : > { %v5838_v11 = vpop.f32.mrb[155].mxu0  ;;  %6186 = vmatprep.subr.bf16.mxu1 %v6703_v51 }
 0x2ce   : > { %8592 = vst [vmem:[#allocation33_spill] sm:$0xff] %v8124_v19  ;;  %v8129_v57 = vadd.f32 %v5838_v11, %v5837_v10 }
 0x2cf   : > { %3793 = vmatmul.mubr.bf16.gmra.mrb[152].mxu1 %v7233_v44 }
 0x2d0   : > { %8593 = vst [vmem:[#allocation34_spill] sm:$0xff] %v8129_v57  ;;  %3800 = vmatprep.mubr.bf16.mxu1 %v7249_v25  ;;  %6187 = vmatpush3.bf16.msra.mxu1 %v6703_v51  ;;  %v6706_v25 = vld [vmem:[%s8548_s2 + $0x4f8] sm:$0xff]  }
 0x2d1   : > { %6188 = vmatprep.subr.bf16.mxu1 %v6704_v53  ;;  %v8595_v51 = vld [vmem:[#allocation22_spill] sm:$0xff] }
 0x2d2   : > { %v5522_v55 = vpop.f32.mrb[80].mxu1  ;;  %v5840_v23 = vpop.f32.mrb[156].mxu0 }
 0x2d3   : > { %v5523_v29 = vpop.f32.mrb[81].mxu1  ;;  %v5841_v13 = vpop.f32.mrb[157].mxu0 }
 0x2d4   : > { %v5524_v22 = vadd.f32 %v5523_v29, %v5522_v55  ;;  %v8136_v14 = vadd.f32 %v5841_v13, %v5840_v23  ;;  %v5525_v19 = vpop.f32.mrb[82].mxu1  ;;  %v5843_v10 = vpop.f32.mrb[158].mxu0  ;;  %6189 = vmatpush3.bf16.msra.mxu1 %v6704_v53  ;;  %v8597_v55 = vld [vmem:[#allocation3_spill] sm:$0xff]  ;;  %v8598_v29 = vld [vmem:[#allocation24_spill] sm:$0xff] }
 0x2d5   : > { %v5526_v11 = vpop.f32.mrb[83].mxu1  ;;  %v5844_v44 = vpop.f32.mrb[159].mxu0  ;;  %6190 = vmatprep.subr.bf16.mxu1 %v6705_v42  ;;  %v8153_v53 = vld [vmem:[%s8548_s2 + $0x600] sm:$0xff]  }
 0x2d6   : > { %8594 = vst [vmem:[#allocation35_spill] sm:$0xff] %v8136_v14  ;;  %v6248_v57 = vadd.f32 %v5524_v22, %v8595_v51  ;;  %v5527_v31 = vadd.f32 %v5526_v11, %v5525_v19  ;;  %v8142_v24 = vadd.f32 %v5844_v44, %v5843_v10  ;;  %v8599_v22 = vld [vmem:[#allocation4_spill] sm:$0xff] }
 0x2d7   : > { %3801 = vmatmul.mubr.bf16.gmra.mrb[156].mxu1 %v7253_v26 }
 0x2d8   : > { %8596 = vst [vmem:[#allocation22_spill] sm:$0xff] %v8142_v24  ;;  %v8146_v23 = vadd.f32 %v6248_v57, %v8597_v55  ;;  %v6260_v13 = vadd.f32 %v5527_v31, %v8598_v29  ;;  %3808 = vmatprep.mubr.bf16.mxu1 %v7273_v32  ;;  %6191 = vmatpush3.bf16.msra.mxu1 %v6705_v42 }
 0x2d9   : > { %6192 = vmatprep.subr.bf16.mxu1 %v6706_v25 }
 0x2da   : > { %v8156_v19 = vadd.f32 %v6260_v13, %v8599_v22  ;;  %v5528_v10 = vpop.f32.mrb[84].mxu1  ;;  %v5846_v11 = vpop.f32.mrb[160].mxu0  ;;  %v8602_v13 = vld [vmem:[#allocation5_spill] sm:$0xff] }
 0x2db   : > { %v5529_v26 = vpop.f32.mrb[85].mxu1  ;;  %v5847_v44 = vpop.f32.mrb[161].mxu0 }
 0x2dc   : > { %v5530_v57 = vadd.f32 %v5529_v26, %v5528_v10  ;;  %v8158_v51 = vadd.f32 %v5847_v44, %v5846_v11  ;;  %v5531_v31 = vpop.f32.mrb[86].mxu1  ;;  %v5849_v55 = vpop.f32.mrb[162].mxu0  ;;  %6193 = vmatpush3.bf16.msra.mxu1 %v6706_v25  ;;  %v8603_v11 = vld [vmem:[#allocation6_spill] sm:$0xff] }
 0x2dd   : > { %v5532_v32 = vpop.f32.mrb[87].mxu1  ;;  %v5850_v42 = vpop.f32.mrb[163].mxu0  ;;  %6210 = vmatprep.subr.bf16.mxu1 %v8153_v53 }
 0x2de   : > { %8600 = vst [vmem:[#allocation3_spill] sm:$0xff] %v8158_v51  ;;  %v6242_v29 = vadd.f32 %v5530_v57, %v7945_v52  ;;  %v5533_v24 = vadd.f32 %v5532_v32, %v5531_v31  ;;  %v8162_v14 = vadd.f32 %v5850_v42, %v5849_v55 }
 0x2df   : > { %3809 = vmatmul.mubr.bf16.gmra.mrb[160].mxu1 %v7278_v34 }
 0x2e0   : > { %8601 = vst [vmem:[#allocation24_spill] sm:$0xff] %v8162_v14  ;;  %v8166_v22 = vadd.f32 %v6242_v29, %v8602_v13  ;;  %v6254_v10 = vadd.f32 %v5533_v24, %v7955_v59  ;;  %3816 = vmatprep.mubr.bf16.mxu1 %v7444_v61  ;;  %v8606_v61 = vld [vmem:[#allocation7_spill] sm:$0xff]  ;;  %v8619_v14 = vld [vmem:[#allocation20_spill] sm:$0xff] }
 0x2e2   : > { %v8171_v25 = vadd.f32 %v6254_v10, %v8603_v11  ;;  %v5534_v26 = vpop.f32.mrb[88].mxu1  ;;  %v5852_v44 = vpop.f32.mrb[164].mxu0 }
 0x2e3   : > { %v5535_v51 = vpop.f32.mrb[89].mxu1  ;;  %v5853_v12 = vpop.f32.mrb[165].mxu0 }
 0x2e4   : > { %v5536_v52 = vadd.f32 %v5535_v51, %v5534_v26  ;;  %v5537_v57 = vpop.f32.mrb[90].mxu1  ;;  %v8173_v31 = vadd.f32 %v5853_v12, %v5852_v44  ;;  %v5855_v55 = vpop.f32.mrb[166].mxu0  ;;  %v8607_v51 = vld [vmem:[#allocation8_spill] sm:$0xff] }
 0x2e5   : > { %v5538_v34 = vpop.f32.mrb[91].mxu1  ;;  %v5856_v32 = vpop.f32.mrb[167].mxu0 }
 0x2e6   : > { %8604 = vst [vmem:[#allocation4_spill] sm:$0xff] %v8173_v31  ;;  %v6272_v42 = vadd.f32 %v5536_v52, %v7968_v20  ;;  %v5539_v29 = vadd.f32 %v5538_v34, %v5537_v57  ;;  %v8176_v59 = vadd.f32 %v5856_v32, %v5855_v55 }
 0x2e7   : > { %3817 = vmatmul.mubr.bf16.gmra.mrb[164].mxu1 %v7456_v0 }
 0x2e8   : > { %8605 = vst [vmem:[#allocation5_spill] sm:$0xff] %v8176_v59  ;;  %v8180_v24 = vadd.f32 %v6272_v42, %v8606_v61  ;;  %v6284_v13 = vadd.f32 %v5539_v29, %v7975_v30  ;;  %3824 = vmatprep.mubr.bf16.mxu1 %v7353_v4  ;;  %v8608_v4 = vld [vmem:[#allocation9_spill] sm:$0xff] }
 0x2ea   : > { %v8185_v12 = vadd.f32 %v6284_v13, %v8607_v51  ;;  %v5540_v10 = vpop.f32.mrb[92].mxu1  ;;  %v5954_v11 = vpop.f32.mrb[168].mxu0  ;;  %v8609_v13 = vld [vmem:[#allocation10_spill] sm:$0xff] }
 0x2eb   : > { %v5541_v26 = vpop.f32.mrb[93].mxu1  ;;  %v5955_v44 = vpop.f32.mrb[169].mxu0 }
 0x2ec   : > { %v5542_v20 = vadd.f32 %v5541_v26, %v5540_v10  ;;  %v8187_v52 = vadd.f32 %v5955_v44, %v5954_v11  ;;  %v5543_v57 = vpop.f32.mrb[94].mxu1  ;;  %v5957_v55 = vpop.f32.mrb[170].mxu0 }
 0x2ed   : > { %v5544_v0 = vpop.f32.mrb[95].mxu1  ;;  %v5958_v34 = vpop.f32.mrb[171].mxu0 }
 0x2ee   : > { %v6266_v32 = vadd.f32 %v5542_v20, %v7984_v41  ;;  %v5545_v42 = vadd.f32 %v5544_v0, %v5543_v57  ;;  %v8190_v30 = vadd.f32 %v5958_v34, %v5957_v55 }
 0x2ef   : > { %3825 = vmatmul.mubr.bf16.gmra.mrb[168].mxu1 %v7950_v50 }
 0x2f0   : > { %v8194_v29 = vadd.f32 %v6266_v32, %v8608_v4  ;;  %v6278_v61 = vadd.f32 %v5545_v42, %v7990_v21  ;;  %3832 = vmatprep.mubr.bf16.mxu1 %v7936_v16  ;;  %v8610_v16 = vld [vmem:[#allocation11_spill] sm:$0xff] }
 0x2f2   : > { %v8199_v51 = vadd.f32 %v6278_v61, %v8609_v13  ;;  %v5546_v10 = vpop.f32.mrb[96].mxu1  ;;  %v5960_v11 = vpop.f32.mrb[172].mxu0  ;;  %v8611_v61 = vld [vmem:[#allocation12_spill] sm:$0xff] }
 0x2f3   : > { %v5547_v26 = vpop.f32.mrb[97].mxu1  ;;  %v5961_v44 = vpop.f32.mrb[173].mxu0 }
 0x2f4   : > { %v5548_v41 = vadd.f32 %v5547_v26, %v5546_v10  ;;  %v8201_v20 = vadd.f32 %v5961_v44, %v5960_v11  ;;  %v5549_v57 = vpop.f32.mrb[98].mxu1  ;;  %v5963_v55 = vpop.f32.mrb[174].mxu0 }
 0x2f5   : > { %v5550_v50 = vpop.f32.mrb[99].mxu1  ;;  %v5964_v0 = vpop.f32.mrb[175].mxu0 }
 0x2f6   : > { %v6296_v34 = vadd.f32 %v5548_v41, %v7996_v56  ;;  %v5551_v32 = vadd.f32 %v5550_v50, %v5549_v57  ;;  %v8204_v21 = vadd.f32 %v5964_v0, %v5963_v55 }
 0x2f7   : > { %3833 = vmatmul.mubr.bf16.gmra.mrb[172].mxu1 %v7964_v27 }
 0x2f8   : > { %v8208_v42 = vadd.f32 %v6296_v34, %v8610_v16  ;;  %v6308_v4 = vadd.f32 %v5551_v32, %v8002_v45  ;;  %6194 = vmatprep.mubr.bf16.mxu1 %v7493_v58  ;;  %v6708_v45 = vld [vmem:[%s8548_s2 + $0x608] sm:$0xff]   ;;  %v8612_v32 = vld [vmem:[#allocation13_spill] sm:$0xff] }
 0x2fa   : > { %v8213_v13 = vadd.f32 %v6308_v4, %v8611_v61  ;;  %v5552_v10 = vpop.f32.mrb[100].mxu1  ;;  %v5966_v11 = vpop.f32.mrb[176].mxu0  ;;  %v6709_v61 = vld [vmem:[%s8548_s2 + $0x610] sm:$0xff]  }
 0x2fb   : > { %v5553_v26 = vpop.f32.mrb[101].mxu1  ;;  %v5967_v44 = vpop.f32.mrb[177].mxu0 }
 0x2fc   : > { %v5554_v56 = vadd.f32 %v5553_v26, %v5552_v10  ;;  %v8215_v41 = vadd.f32 %v5967_v44, %v5966_v11  ;;  %v5555_v57 = vpop.f32.mrb[102].mxu1  ;;  %v5969_v55 = vpop.f32.mrb[178].mxu0 }
 0x2fd   : > { %v5556_v27 = vpop.f32.mrb[103].mxu1  ;;  %v5970_v50 = vpop.f32.mrb[179].mxu0 }
 0x2fe   : > { %v6290_v58 = vadd.f32 %v5554_v56, %v8014_v46  ;;  %v5557_v0 = vadd.f32 %v5556_v27, %v5555_v57  ;;  %v8221_v34 = vadd.f32 %v5970_v50, %v5969_v55  ;;  %v8613_v46 = vld [vmem:[#allocation14_spill] sm:$0xff] }
 0x2ff   : > { %6195 = vmatmul.mubr.bf16.vlgmr.msra.gmra.mrb[64].mxu1 %v7520_v17 }
 0x300   : > { %v8225_v16 = vadd.f32 %v6290_v58, %v8612_v32  ;;  %v6302_v4 = vadd.f32 %v5557_v0, %v8020_v38  ;;  %6211 = vmatpush3.bf16.msra.mxu1 %v8153_v53  ;;  %6198 = vmatprep.mubr.bf16.mxu1 %v7528_v49  ;;  %v6710_v58 = vld [vmem:[%s8548_s2 + $0x618] sm:$0xff]  }
 0x301   : > { %6212 = vmatprep.subr.bf16.mxu1 %v6708_v45 }
 0x302   : > { %v8234_v10 = vadd.f32 %v6302_v4, %v8613_v46  ;;  %v5558_v11 = vpop.f32.mrb[104].mxu1  ;;  %v5972_v26 = vpop.f32.mrb[180].mxu0  ;;  %v8614_v46 = vld [vmem:[#allocation15_spill] sm:$0xff] }
 0x303   : > { %v5559_v44 = vpop.f32.mrb[105].mxu1  ;;  %v5973_v56 = vpop.f32.mrb[181].mxu0 }
 0x304   : > { %v5560_v57 = vadd.f32 %v5559_v44, %v5558_v11  ;;  %v8236_v55 = vadd.f32 %v5973_v56, %v5972_v26  ;;  %6213 = vmatpush3.bf16.msra.mxu1 %v6708_v45  ;;  %v5561_v38 = vpop.f32.mrb[106].mxu1  ;;  %v5975_v53 = vpop.f32.mrb[182].mxu0  ;;  %v6711_v26 = vld [vmem:[%s8548_s2 + $0x620] sm:$0xff]   ;;  %v8615_v44 = vld [vmem:[#allocation16_spill] sm:$0xff] }
 0x305   : > { %v5562_v27 = vpop.f32.mrb[107].mxu1  ;;  %v5976_v50 = vpop.f32.mrb[183].mxu0  ;;  %6214 = vmatprep.subr.bf16.mxu1 %v6709_v61 }
 0x306   : > { %v6320_v0 = vadd.f32 %v5560_v57, %v8038_v33  ;;  %v5563_v32 = vadd.f32 %v5562_v27, %v5561_v38  ;;  %v8242_v4 = vadd.f32 %v5976_v50, %v5975_v53 }
 0x307   : > { %6199 = vmatmul.mubr.bf16.gmra.mrb[68].mxu1 %v7555_v47 }
 0x308   : > { %v8246_v11 = vadd.f32 %v6320_v0, %v8614_v46  ;;  %v6332_v45 = vadd.f32 %v5563_v32, %v8044_v15  ;;  %6215 = vmatpush3.bf16.msra.mxu1 %v6709_v61  ;;  %6202 = vmatprep.mubr.bf16.mxu1 %v7563_v54  ;;  %v6712_v46 = vld [vmem:[%s8548_s2 + $0x628] sm:$0xff]  }
 0x309   : > { %6216 = vmatprep.subr.bf16.mxu1 %v6710_v58 }
 0x30a   : > { %v8254_v33 = vadd.f32 %v6332_v45, %v8615_v44  ;;  %v5564_v56 = vpop.f32.mrb[108].mxu1  ;;  %v5978_v57 = vpop.f32.mrb[184].mxu0 }
 0x30b   : > { %v5565_v38 = vpop.f32.mrb[109].mxu1  ;;  %v5979_v53 = vpop.f32.mrb[185].mxu0 }
 0x30c   : > { %v5566_v27 = vadd.f32 %v5565_v38, %v5564_v56  ;;  %v8256_v50 = vadd.f32 %v5979_v53, %v5978_v57  ;;  %6217 = vmatpush3.bf16.msra.mxu1 %v6710_v58  ;;  %v5567_v15 = vpop.f32.mrb[110].mxu1  ;;  %v5981_v61 = vpop.f32.mrb[186].mxu0  ;;  %v8616_v56 = vld [vmem:[#allocation17_spill] sm:$0xff]  ;;  %v8617_v53 = vld [vmem:[#allocation18_spill] sm:$0xff] }
 0x30d   : > { %v5568_v0 = vpop.f32.mrb[111].mxu1  ;;  %v5982_v32 = vpop.f32.mrb[187].mxu0  ;;  %6218 = vmatprep.subr.bf16.mxu1 %v6711_v26  ;;  %v6713_v38 = vld [vmem:[%s8548_s2 + $0x630] sm:$0xff]  }
 0x30e   : > { %v6314_v45 = vadd.f32 %v5566_v27, %v8062_v40  ;;  %v5569_v44 = vadd.f32 %v5568_v0, %v5567_v15  ;;  %v8262_v59 = vadd.f32 %v5982_v32, %v5981_v61  ;;  %v1282_v15 = vrot.slane %v7340_v35, 2 }
 0x30f   : > { %6203 = vmatmul.mubr.bf16.gmra.mrb[72].mxu1 %v7588_v36  ;;  %v1283_v61 = vrot.slane %v7611_v2, 2 }
 0x310   : > { %v8266_v57 = vadd.f32 %v6314_v45, %v8616_v56  ;;  %v6326_v58 = vadd.f32 %v5569_v44, %v8068_v3  ;;  %6219 = vmatpush3.bf16.msra.mxu1 %v6711_v26  ;;  %6206 = vmatprep.mubr.bf16.mxu1 %v8090_v60  ;;  %v6714_v45 = vld [vmem:[%s8548_s2 + $0x638] sm:$0xff]  }
 0x311   : > { %6220 = vmatprep.subr.bf16.mxu1 %v6712_v46  ;;  %v1284_v56 = vsel %vm1251_vm3, %v1282_v15, %v1283_v61 }
 0x312   : > { %v8274_v40 = vadd.f32 %v6326_v58, %v8617_v53  ;;  %v5984_v27 = vpop.f32.mrb[188].mxu0 }
 0x313   : > { %v5985_v0 = vpop.f32.mrb[189].mxu0 }
 0x314   : > { %v8278_v32 = vadd.f32 %v5985_v0, %v5984_v27  ;;  %6221 = vmatpush3.bf16.msra.mxu1 %v6712_v46  ;;  %v5987_v3 = vpop.f32.mrb[190].mxu0 }
 0x315   : > { %v5988_v26 = vpop.f32.mrb[191].mxu0  ;;  %6222 = vmatprep.subr.bf16.mxu1 %v6713_v38 }
 0x316   : > { %v8283_v44 = vadd.f32 %v5988_v26, %v5987_v3 }
 0x317   : > { %6207 = vmatmul.mubr.bf16.gmra.mrb[76].mxu1 %v1284_v56 }
 0x318   : > { %6223 = vmatpush3.bf16.msra.mxu1 %v6713_v38  ;;  %6226 = vmatprep.mubr.bf16.mxu1 %v7520_v17 }
 0x319   : > { %6224 = vmatprep.subr.bf16.mxu1 %v6714_v45 }
 0x31a   : > { %v5990_v35 = vpop.f32.mrb[192].mxu0 }
 0x31b   : > { %v5991_v2 = vpop.f32.mrb[193].mxu0 }
 0x31c   : > { %6225 = vmatpush3.bf16.msra.mxu1 %v6714_v45  ;;  %v8287_v46 = vadd.f32 %v5991_v2, %v5990_v35  ;;  %v5993_v58 = vpop.f32.mrb[194].mxu0 }
 0x31d   : > { %v5994_v53 = vpop.f32.mrb[195].mxu0 }
 0x31e   : > { %v8289_v27 = vadd.f32 %v5994_v53, %v5993_v58 }
 0x31f   : > { %6227 = vmatmul.mubr.bf16.vlgmr.msra.gmra.mrb[64].mxu1 %v7528_v49 }
 0x320   : > { %6230 = vmatprep.mubr.bf16.mxu1 %v7555_v47 }
 0x322   : > { %v5996_v0 = vpop.f32.mrb[196].mxu0 }
 0x323   : > { %v5997_v15 = vpop.f32.mrb[197].mxu0 }
 0x324   : > { %v8293_v61 = vadd.f32 %v5997_v15, %v5996_v0  ;;  %v5999_v38 = vpop.f32.mrb[198].mxu0  ;;  %v1285_v0 = vrot.slane %v7405_v48, 2 }
 0x325   : > { %v6000_v17 = vpop.f32.mrb[199].mxu0 }
 0x326   : > { %v8295_v3 = vadd.f32 %v6000_v17, %v5999_v38 }
 0x327   : > { %6231 = vmatmul.mubr.bf16.gmra.mrb[68].mxu1 %v7563_v54  ;;  %v1286_v54 = vrot.slane %v7758_v7, 2 }
 0x328   : > { %6234 = vmatprep.mubr.bf16.mxu1 %v7588_v36 }
 0x32a   : > { %v6018_v26 = vpop.f32.mrb[200].mxu0 }
 0x32b   : > { %v6019_v45 = vpop.f32.mrb[201].mxu0 }
 0x32c   : > { %v6020_v35 = vadd.f32 %v6019_v45, %v6018_v26  ;;  %v6021_v2 = vpop.f32.mrb[202].mxu0 }
 0x32d   : > { %v6022_v58 = vpop.f32.mrb[203].mxu0 }
 0x32e   : > { %v8300_v49 = vadd.f32 %v6020_v35, %v8187_v52  ;;  %v6023_v47 = vadd.f32 %v6022_v58, %v6021_v2  ;;  %v8618_v58 = vld [vmem:[#allocation19_spill] sm:$0xff] }
 0x32f   : > { %6235 = vmatmul.mubr.bf16.gmra.mrb[72].mxu1 %v8090_v60  ;;  %v1287_v60 = vsel %vm1251_vm3, %v1285_v0, %v1286_v54 }
 0x330   : > { %v8304_v53 = vadd.f32 %v6023_v47, %v8190_v30  ;;  %6238 = vmatprep.mubr.bf16.mxu1 %v1284_v56 }
 0x332   : > { %v5730_v36 = vpop.f32.mrb[112].mxu1  ;;  %v6024_v15 = vpop.f32.mrb[204].mxu0 }
 0x333   : > { %v5731_v38 = vpop.f32.mrb[113].mxu1  ;;  %v6025_v17 = vpop.f32.mrb[205].mxu0 }
 0x334   : > { %v5732_v26 = vadd.f32 %v5731_v38, %v5730_v36  ;;  %v6026_v45 = vadd.f32 %v6025_v17, %v6024_v15  ;;  %v5733_v31 = vpop.f32.mrb[114].mxu1  ;;  %v6027_v52 = vpop.f32.mrb[206].mxu0 }
 0x335   : > { %v5734_v35 = vpop.f32.mrb[115].mxu1  ;;  %v6028_v2 = vpop.f32.mrb[207].mxu0 }
 0x336   : > { %v3110_v30 = vadd.f32 %v5732_v26, %v8618_v58  ;;  %v8311_v56 = vadd.f32 %v6026_v45, %v8201_v20  ;;  %v5735_v48 = vadd.f32 %v5734_v35, %v5733_v31  ;;  %v6029_v47 = vadd.f32 %v6028_v2, %v6027_v52 }
 0x337   : > { %6239 = vmatmul.mubr.bf16.gmra.mrb[76].mxu1 %v1287_v60 }
 0x338   : > { %v8314_v7 = vadd.f32 %v8146_v23, %v3110_v30  ;;  %v3113_v36 = vadd.f32 %v5735_v48, %v8619_v14  ;;  %v8318_v15 = vadd.f32 %v6029_v47, %v8204_v21  ;;  %v8620_v23 = vld [vmem:[#allocation21_spill] sm:$0xff]  ;;  %v8621_v30 = vld [vmem:[#allocation23_spill] sm:$0xff] }
 0x33a   : > { %v8321_v38 = vadd.f32 %v8156_v19, %v3113_v36  ;;  %v5736_v0 = vpop.f32.mrb[116].mxu1  ;;  %v6030_v54 = vpop.f32.mrb[208].mxu0 }
 0x33b   : > { %v5737_v17 = vpop.f32.mrb[117].mxu1  ;;  %v6031_v26 = vpop.f32.mrb[209].mxu0 }
 0x33c   : > { %v5738_v20 = vadd.f32 %v5737_v17, %v5736_v0  ;;  %v6032_v45 = vadd.f32 %v6031_v26, %v6030_v54  ;;  %v5739_v31 = vpop.f32.mrb[118].mxu1  ;;  %v6033_v52 = vpop.f32.mrb[210].mxu0 }
 0x33d   : > { %v5740_v35 = vpop.f32.mrb[119].mxu1  ;;  %v6034_v2 = vpop.f32.mrb[211].mxu0 }
 0x33e   : > { %v3118_v60 = vadd.f32 %v5738_v20, %v8620_v23  ;;  %v8325_v14 = vadd.f32 %v6032_v45, %v8215_v41  ;;  %v5741_v21 = vadd.f32 %v5740_v35, %v5739_v31  ;;  %v6035_v58 = vadd.f32 %v6034_v2, %v6033_v52 }
 0x340   : > { %v8328_v19 = vadd.f32 %v8166_v22, %v3118_v60  ;;  %v3121_v48 = vadd.f32 %v5741_v21, %v8621_v30  ;;  %v8332_v47 = vadd.f32 %v6035_v58, %v8221_v34  ;;  %v8622_v60 = vld [vmem:[#allocation25_spill] sm:$0xff] }
 0x342   : > { %v8335_v36 = vadd.f32 %v8171_v25, %v3121_v48  ;;  %v5742_v0 = vpop.f32.mrb[120].mxu1  ;;  %v6036_v54 = vpop.f32.mrb[212].mxu0 }
 0x343   : > { %v5743_v17 = vpop.f32.mrb[121].mxu1  ;;  %v6037_v26 = vpop.f32.mrb[213].mxu0 }
 0x344   : > { %v5744_v20 = vadd.f32 %v5743_v17, %v5742_v0  ;;  %v6038_v41 = vadd.f32 %v6037_v26, %v6036_v54  ;;  %v5745_v45 = vpop.f32.mrb[122].mxu1  ;;  %v6039_v31 = vpop.f32.mrb[214].mxu0 }
 0x345   : > { %v5746_v52 = vpop.f32.mrb[123].mxu1  ;;  %v6040_v35 = vpop.f32.mrb[215].mxu0 }
 0x346   : > { %v3126_v22 = vadd.f32 %v5744_v20, %v7933_v43  ;;  %v8339_v2 = vadd.f32 %v6038_v41, %v8236_v55  ;;  %v5747_v34 = vadd.f32 %v5746_v52, %v5745_v45  ;;  %v6041_v23 = vadd.f32 %v6040_v35, %v6039_v31 }
 0x348   : > { %v8342_v25 = vadd.f32 %v8180_v24, %v3126_v22  ;;  %v3129_v21 = vadd.f32 %v5747_v34, %v8622_v60  ;;  %v8346_v58 = vadd.f32 %v6041_v23, %v8242_v4 }
 0x34a   : > { %v8349_v30 = vadd.f32 %v8185_v12, %v3129_v21  ;;  %v5748_v48 = vpop.f32.mrb[124].mxu1  ;;  %v6042_v0 = vpop.f32.mrb[216].mxu0 }
 0x34b   : > { %v5749_v54 = vpop.f32.mrb[125].mxu1  ;;  %v6043_v43 = vpop.f32.mrb[217].mxu0 }
 0x34c   : > { %v5750_v17 = vadd.f32 %v5749_v54, %v5748_v48  ;;  %v6044_v55 = vadd.f32 %v6043_v43, %v6042_v0  ;;  %v5751_v26 = vpop.f32.mrb[126].mxu1  ;;  %v6045_v20 = vpop.f32.mrb[218].mxu0 }
 0x34d   : > { %v5752_v41 = vpop.f32.mrb[127].mxu1  ;;  %v6046_v45 = vpop.f32.mrb[219].mxu0 }
 0x34e   : > { %v3134_v24 = vadd.f32 %v5750_v17, %v7961_v9  ;;  %v8353_v31 = vadd.f32 %v6044_v55, %v8256_v50  ;;  %v5753_v4 = vadd.f32 %v5752_v41, %v5751_v26  ;;  %v6047_v52 = vadd.f32 %v6046_v45, %v6045_v20 }
 0x350   : > { %v8356_v12 = vadd.f32 %v8194_v29, %v3134_v24  ;;  %v3137_v35 = vadd.f32 %v5753_v4, %v7970_v1  ;;  %v8360_v22 = vadd.f32 %v6047_v52, %v8262_v59 }
 0x352   : > { %v8363_v34 = vadd.f32 %v8199_v51, %v3137_v35  ;;  %v5754_v23 = vpop.f32.mrb[128].mxu1  ;;  %v6048_v60 = vpop.f32.mrb[220].mxu0 }
 0x353   : > { %v5755_v21 = vpop.f32.mrb[129].mxu1  ;;  %v6049_v9 = vpop.f32.mrb[221].mxu0 }
 0x354   : > { %v5756_v48 = vadd.f32 %v5755_v21, %v5754_v23  ;;  %v6050_v50 = vadd.f32 %v6049_v9, %v6048_v60  ;;  %v5757_v0 = vpop.f32.mrb[130].mxu1  ;;  %v6051_v54 = vpop.f32.mrb[222].mxu0 }
 0x355   : > { %v5758_v43 = vpop.f32.mrb[131].mxu1  ;;  %v6052_v17 = vpop.f32.mrb[223].mxu0 }
 0x356   : > { %v3142_v29 = vadd.f32 %v5756_v48, %v7980_v18  ;;  %v8367_v1 = vadd.f32 %v6050_v50, %v8278_v32  ;;  %v5759_v59 = vadd.f32 %v5758_v43, %v5757_v0  ;;  %v6053_v55 = vadd.f32 %v6052_v17, %v6051_v54 }
 0x358   : > { %v8370_v51 = vadd.f32 %v8208_v42, %v3142_v29  ;;  %v3145_v26 = vadd.f32 %v5759_v59, %v7986_v37  ;;  %v8374_v20 = vadd.f32 %v6053_v55, %v8283_v44  ;;  %v8623_v42 = vld [vmem:[#allocation26_spill] sm:$0xff] }
 0x35a   : > { %v8377_v41 = vadd.f32 %v8213_v13, %v3145_v26  ;;  %v5760_v45 = vpop.f32.mrb[132].mxu1  ;;  %v6054_v24 = vpop.f32.mrb[224].mxu0 }
 0x35b   : > { %v5761_v4 = vpop.f32.mrb[133].mxu1  ;;  %v6055_v18 = vpop.f32.mrb[225].mxu0 }
 0x35c   : > { %v5762_v52 = vadd.f32 %v5761_v4, %v5760_v45  ;;  %v5763_v32 = vpop.f32.mrb[134].mxu1  ;;  %v6056_v35 = vadd.f32 %v6055_v18, %v6054_v24  ;;  %v6057_v23 = vpop.f32.mrb[226].mxu0 }
 0x35d   : > { %v5764_v60 = vpop.f32.mrb[135].mxu1  ;;  %v6058_v21 = vpop.f32.mrb[227].mxu0 }
 0x35e   : > { %v3150_v9 = vadd.f32 %v5762_v52, %v8623_v42  ;;  %v5765_v48 = vadd.f32 %v5764_v60, %v5763_v32  ;;  %v8381_v37 = vadd.f32 %v6056_v35, %v8287_v46  ;;  %v6059_v44 = vadd.f32 %v6058_v21, %v6057_v23  ;;  %v8624_v52 = vld [vmem:[#allocation27_spill] sm:$0xff] }
 0x360   : > { %v8384_v13 = vadd.f32 %v8225_v16, %v3150_v9  ;;  %v3153_v50 = vadd.f32 %v5765_v48, %v7998_v28  ;;  %v8388_v0 = vadd.f32 %v6059_v44, %v8289_v27  ;;  %v8625_v48 = vld [vmem:[#allocation28_spill] sm:$0xff] }
 0x362   : > { %v8391_v54 = vadd.f32 %v8234_v10, %v3153_v50  ;;  %v5766_v43 = vpop.f32.mrb[136].mxu1  ;;  %v6060_v17 = vpop.f32.mrb[228].mxu0 }
 0x363   : > { %v5767_v29 = vpop.f32.mrb[137].mxu1  ;;  %v6061_v59 = vpop.f32.mrb[229].mxu0 }
 0x364   : > { %v5768_v55 = vadd.f32 %v5767_v29, %v5766_v43  ;;  %v5769_v26 = vpop.f32.mrb[138].mxu1  ;;  %v6062_v46 = vadd.f32 %v6061_v59, %v6060_v17  ;;  %v6063_v45 = vpop.f32.mrb[230].mxu0 }
 0x365   : > { %v5770_v24 = vpop.f32.mrb[139].mxu1  ;;  %v6064_v4 = vpop.f32.mrb[231].mxu0 }
 0x366   : > { %v3158_v16 = vadd.f32 %v5768_v55, %v8005_v62  ;;  %v5771_v18 = vadd.f32 %v5770_v24, %v5769_v26  ;;  %v8395_v28 = vadd.f32 %v6062_v46, %v8293_v61  ;;  %v6065_v27 = vadd.f32 %v6064_v4, %v6063_v45 }
 0x368   : > { %v8398_v10 = vadd.f32 %v8246_v11, %v3158_v16  ;;  %v3161_v32 = vadd.f32 %v5771_v18, %v8624_v52  ;;  %v8402_v35 = vadd.f32 %v6065_v27, %v8295_v3  ;;  %v8626_v11 = vld [vmem:[#allocation29_spill] sm:$0xff] }
 0x36a   : > { %v8405_v23 = vadd.f32 %v8254_v33, %v3161_v32  ;;  %v5772_v60 = vpop.f32.mrb[140].mxu1 }
 0x36b   : > { %v5773_v21 = vpop.f32.mrb[141].mxu1 }
 0x36c   : > { %v5774_v42 = vadd.f32 %v5773_v21, %v5772_v60  ;;  %v5775_v62 = vpop.f32.mrb[142].mxu1 }
 0x36d   : > { %v5776_v9 = vpop.f32.mrb[143].mxu1 }
 0x36e   : > { %v3166_v61 = vadd.f32 %v5774_v42, %v8625_v48  ;;  %v5777_v44 = vadd.f32 %v5776_v9, %v5775_v62 }
 0x370   : > { %v8409_v50 = vadd.f32 %v8266_v57, %v3166_v61  ;;  %v3169_v43 = vadd.f32 %v5777_v44, %v8626_v11  ;;  %v8627_v44 = vld [vmem:[#allocation30_spill] sm:$0xff] }
 0x372   : > { %v8413_v17 = vadd.f32 %v8274_v40, %v3169_v43 }
 0x392   : > { %v5874_v3 = vpop.f32.mrb[144].mxu1 }
 0x393   : > { %v5875_v29 = vpop.f32.mrb[145].mxu1 }
 0x394   : > { %v5876_v33 = vadd.f32 %v5875_v29, %v5874_v3  ;;  %v5877_v59 = vpop.f32.mrb[146].mxu1 }
 0x395   : > { %v5878_v55 = vpop.f32.mrb[147].mxu1 }
 0x396   : > { %v3779_v26 = vadd.f32 %v5876_v33, %v8053_v8  ;;  %v5879_v46 = vadd.f32 %v5878_v55, %v5877_v59  ;;  %v8628_v59 = vld [vmem:[#allocation31_spill] sm:$0xff] }
 0x398   : > { %v3782_v45 = vadd.f32 %v5879_v46, %v8064_v39  ;;  %v6251_v24 = vadd.f32 %v8314_v7, %v3779_v26  ;;  %v8629_v26 = vld [vmem:[#allocation32_spill] sm:$0xff] }
 0x39a   : > { %v5880_v4 = vpop.f32.mrb[148].mxu1  ;;  %v8419_v57 = vadd.f32 %v6251_v24, %v8300_v49  ;;  %v6263_v16 = vadd.f32 %v8321_v38, %v3782_v45 }
 0x39b   : > { %v5881_v40 = vpop.f32.mrb[149].mxu1 }
 0x39c   : > { %v5882_v18 = vadd.f32 %v5881_v40, %v5880_v4  ;;  %v5883_v27 = vpop.f32.mrb[150].mxu1  ;;  %v8423_v52 = vadd.f32 %v6263_v16, %v8304_v53 }
 0x39d   : > { %v5884_v32 = vpop.f32.mrb[151].mxu1 }
 0x39e   : > { %v3787_v8 = vadd.f32 %v5882_v18, %v8079_v6  ;;  %v5885_v60 = vadd.f32 %v5884_v32, %v5883_v27  ;;  %v8630_v18 = vld [vmem:[#allocation33_spill] sm:$0xff] }
 0x3a0   : > { %v3790_v39 = vadd.f32 %v5885_v60, %v8087_v63  ;;  %v6245_v7 = vadd.f32 %v8328_v19, %v3787_v8  ;;  %v8631_v8 = vld [vmem:[#allocation34_spill] sm:$0xff] }
 0x3a2   : > { %v5886_v21 = vpop.f32.mrb[152].mxu1  ;;  %v8429_v49 = vadd.f32 %v6245_v7, %v8311_v56  ;;  %v6257_v38 = vadd.f32 %v8335_v36, %v3790_v39 }
 0x3a3   : > { %v5887_v42 = vpop.f32.mrb[153].mxu1 }
 0x3a4   : > { %v5888_v62 = vadd.f32 %v5887_v42, %v5886_v21  ;;  %v5889_v9 = vpop.f32.mrb[154].mxu1  ;;  %v8433_v53 = vadd.f32 %v6257_v38, %v8318_v15 }
 0x3a5   : > { %v5890_v48 = vpop.f32.mrb[155].mxu1 }
 0x3a6   : > { %v3795_v6 = vadd.f32 %v5888_v62, %v8100_v5  ;;  %v5891_v61 = vadd.f32 %v5890_v48, %v5889_v9  ;;  %v8632_v62 = vld [vmem:[#allocation35_spill] sm:$0xff] }
 0x3a8   : > { %v3798_v63 = vadd.f32 %v5891_v61, %v8627_v44  ;;  %v6275_v19 = vadd.f32 %v8342_v25, %v3795_v6  ;;  %v8633_v6 = vld [vmem:[#allocation22_spill] sm:$0xff] }
 0x3aa   : > { %v5892_v11 = vpop.f32.mrb[156].mxu1  ;;  %v8439_v56 = vadd.f32 %v6275_v19, %v8325_v14  ;;  %v6287_v36 = vadd.f32 %v8349_v30, %v3798_v63 }
 0x3ab   : > { %v5893_v43 = vpop.f32.mrb[157].mxu1 }
 0x3ac   : > { %v5894_v3 = vadd.f32 %v5893_v43, %v5892_v11  ;;  %v5895_v29 = vpop.f32.mrb[158].mxu1  ;;  %v8443_v15 = vadd.f32 %v6287_v36, %v8332_v47  ;;  %v8634_v43 = vld [vmem:[#allocation3_spill] sm:$0xff] }
 0x3ad   : > { %v5896_v33 = vpop.f32.mrb[159].mxu1 }
 0x3ae   : > { %v3803_v5 = vadd.f32 %v5894_v3, %v8628_v59  ;;  %v5897_v55 = vadd.f32 %v5896_v33, %v5895_v29  ;;  %v8635_v33 = vld [vmem:[#allocation24_spill] sm:$0xff] }
 0x3b0   : > { %v3806_v46 = vadd.f32 %v5897_v55, %v8629_v26  ;;  %v6269_v25 = vadd.f32 %v8356_v12, %v3803_v5 }
 0x3b2   : > { %v5898_v45 = vpop.f32.mrb[160].mxu1  ;;  %v8449_v14 = vadd.f32 %v6269_v25, %v8339_v2  ;;  %v6281_v30 = vadd.f32 %v8363_v34, %v3806_v46 }
 0x3b3   : > { %v5899_v24 = vpop.f32.mrb[161].mxu1 }
 0x3b4   : > { %v5900_v4 = vadd.f32 %v5899_v24, %v5898_v45  ;;  %v5901_v16 = vpop.f32.mrb[162].mxu1  ;;  %v8453_v47 = vadd.f32 %v6281_v30, %v8346_v58  ;;  %v8636_v45 = vld [vmem:[#allocation4_spill] sm:$0xff] }
 0x3b5   : > { %v5902_v40 = vpop.f32.mrb[163].mxu1 }
 0x3b6   : > { %v3811_v27 = vadd.f32 %v5900_v4, %v8630_v18  ;;  %v5903_v32 = vadd.f32 %v5902_v40, %v5901_v16  ;;  %v8637_v4 = vld [vmem:[#allocation5_spill] sm:$0xff] }
 0x3b8   : > { %v3814_v60 = vadd.f32 %v5903_v32, %v8631_v8  ;;  %v6299_v12 = vadd.f32 %v8370_v51, %v3811_v27 }
 0x3ba   : > { %v5904_v39 = vpop.f32.mrb[164].mxu1  ;;  %v8459_v2 = vadd.f32 %v6299_v12, %v8353_v31  ;;  %v6311_v34 = vadd.f32 %v8377_v41, %v3814_v60 }
 0x3bb   : > { %v5905_v7 = vpop.f32.mrb[165].mxu1 }
 0x3bc   : > { %v5906_v21 = vadd.f32 %v5905_v7, %v5904_v39  ;;  %v5907_v38 = vpop.f32.mrb[166].mxu1  ;;  %v8463_v58 = vadd.f32 %v6311_v34, %v8360_v22 }
 0x3bd   : > { %v5908_v42 = vpop.f32.mrb[167].mxu1 }
 0x3be   : > { %v3819_v9 = vadd.f32 %v5906_v21, %v8632_v62  ;;  %v5909_v48 = vadd.f32 %v5908_v42, %v5907_v38 }
 0x3c0   : > { %v3822_v61 = vadd.f32 %v5909_v48, %v8633_v6  ;;  %v6293_v51 = vadd.f32 %v8384_v13, %v3819_v9 }
 0x3c2   : > { %v5910_v44 = vpop.f32.mrb[168].mxu1  ;;  %v8469_v31 = vadd.f32 %v6293_v51, %v8367_v1  ;;  %v6305_v41 = vadd.f32 %v8391_v54, %v3822_v61 }
 0x3c3   : > { %v5911_v63 = vpop.f32.mrb[169].mxu1 }
 0x3c4   : > { %v5912_v19 = vadd.f32 %v5911_v63, %v5910_v44  ;;  %v5913_v11 = vpop.f32.mrb[170].mxu1  ;;  %v8473_v22 = vadd.f32 %v6305_v41, %v8374_v20 }
 0x3c5   : > { %v5914_v36 = vpop.f32.mrb[171].mxu1 }
 0x3c6   : > { %v3827_v3 = vadd.f32 %v5912_v19, %v8634_v43  ;;  %v5915_v29 = vadd.f32 %v5914_v36, %v5913_v11 }
 0x3c8   : > { %v3830_v59 = vadd.f32 %v5915_v29, %v8635_v33  ;;  %v6323_v13 = vadd.f32 %v8398_v10, %v3827_v3 }
 0x3ca   : > { %v5916_v5 = vpop.f32.mrb[172].mxu1  ;;  %v8479_v1 = vadd.f32 %v6323_v13, %v8381_v37  ;;  %v6335_v54 = vadd.f32 %v8405_v23, %v3830_v59 }
 0x3cb   : > { %v5917_v55 = vpop.f32.mrb[173].mxu1 }
 0x3cc   : > { %v5918_v26 = vadd.f32 %v5917_v55, %v5916_v5  ;;  %v5919_v20 = vpop.f32.mrb[174].mxu1  ;;  %v8483_v46 = vadd.f32 %v6335_v54, %v8388_v0 }
 0x3cd   : > { %v5920_v25 = vpop.f32.mrb[175].mxu1 }
 0x3ce   : > { %v3835_v30 = vadd.f32 %v5918_v26, %v8636_v45  ;;  %v5921_v24 = vadd.f32 %v5920_v25, %v5919_v20 }
 0x3d0   : > { %v3838_v10 = vadd.f32 %v5921_v24, %v8637_v4  ;;  %v6317_v16 = vadd.f32 %v8409_v50, %v3835_v30 }
 0x3d2   : > { %v6318_v37 = vadd.f32 %v6317_v16, %v8395_v28  ;;  %v6329_v40 = vadd.f32 %v8413_v17, %v3838_v10 }
 0x3d4   : > { %v8491_v23 = vadd.f32 %v6329_v40, %v8402_v35 }
 0x3f2   : > { %v6228_v0 = vpop.f32.mrb[64].mxu1 }
 0x3f3   : > { %v6247_v18 = vadd.f32 %v8429_v49, %v6228_v0  ;;  %v4544_v27 = vpop.f32.mrb[65].mxu1 }
 0x3f4   : > { %v6253_v28 = vadd.f32 %v8419_v57, %v4544_v27  ;;  %v6229_v35 = vpop.f32.mrb[66].mxu1 }
 0x3f5   : > { %v4625_v50 = vmax.f32 %v6247_v18, 0.0  ;;  %v6259_v17 = vadd.f32 %v8433_v53, %v6229_v35  ;;  %v4547_v32 = vpop.f32.mrb[67].mxu1 }
 0x3f6   : > { %v4623_v8 = vmax.f32 %v6253_v28, 0.0  ;;  %v6265_v49 = vadd.f32 %v8423_v52, %v4547_v32 }
 0x3f7   : > { %4641 = vst [vmem:[%s8499_s30 + $0x10] sm:$0xff] %v4625_v50  ;;  %v4626_v60 = vmax.f32 %v6259_v17, 0.0 }
 0x3f8   : > { %4639 = vst [vmem:[%s8499_s30] sm:$0xff] %v4623_v8  ;;  %v4624_v12 = vmax.f32 %v6265_v49, 0.0 }
 0x3f9   : > { %4642 = vst [vmem:[%s8499_s30 + $0x18] sm:$0xff] %v4626_v60 }
 0x3fa   : > { %4640 = vst [vmem:[%s8499_s30 + $0x8] sm:$0xff] %v4624_v12  ;;  %v6232_v39 = vpop.f32.mrb[68].mxu1 }
 0x3fb   : > { %v6271_v57 = vadd.f32 %v8449_v14, %v6232_v39  ;;  %v4560_v34 = vpop.f32.mrb[69].mxu1 }
 0x3fc   : > { %v6277_v53 = vadd.f32 %v8439_v56, %v4560_v34  ;;  %v6233_v7 = vpop.f32.mrb[70].mxu1 }
 0x3fd   : > { %v4629_v21 = vmax.f32 %v6271_v57, 0.0  ;;  %v6283_v52 = vadd.f32 %v8453_v47, %v6233_v7  ;;  %v4563_v38 = vpop.f32.mrb[71].mxu1 }
 0x3fe   : > { %v4627_v42 = vmax.f32 %v6277_v53, 0.0  ;;  %v6289_v62 = vadd.f32 %v8443_v15, %v4563_v38 }
 0x3ff   : > { %4645 = vst [vmem:[%s8499_s30 + $0x30] sm:$0xff] %v4629_v21  ;;  %v4630_v9 = vmax.f32 %v6283_v52, 0.0 }
 0x400   : > { %4643 = vst [vmem:[%s8499_s30 + $0x20] sm:$0xff] %v4627_v42  ;;  %v4628_v48 = vmax.f32 %v6289_v62, 0.0 }
 0x401   : > { %4646 = vst [vmem:[%s8499_s30 + $0x38] sm:$0xff] %v4630_v9 }
 0x402   : > { %4644 = vst [vmem:[%s8499_s30 + $0x28] sm:$0xff] %v4628_v48  ;;  %v6236_v14 = vpop.f32.mrb[72].mxu1 }
 0x403   : > { %v6295_v56 = vadd.f32 %v8469_v31, %v6236_v14  ;;  %v4576_v6 = vpop.f32.mrb[73].mxu1 }
 0x404   : > { %v6301_v47 = vadd.f32 %v8459_v2, %v4576_v6  ;;  %v6237_v61 = vpop.f32.mrb[74].mxu1 }
 0x405   : > { %v4633_v51 = vmax.f32 %v6295_v56, 0.0  ;;  %v6307_v15 = vadd.f32 %v8473_v22, %v6237_v61  ;;  %v4579_v44 = vpop.f32.mrb[75].mxu1 }
 0x406   : > { %v4631_v41 = vmax.f32 %v6301_v47, 0.0  ;;  %v6313_v63 = vadd.f32 %v8463_v58, %v4579_v44 }
 0x407   : > { %4649 = vst [vmem:[%s8499_s30 + $0x50] sm:$0xff] %v4633_v51  ;;  %v4634_v19 = vmax.f32 %v6307_v15, 0.0 }
 0x408   : > { %4647 = vst [vmem:[%s8499_s30 + $0x40] sm:$0xff] %v4631_v41  ;;  %v4632_v11 = vmax.f32 %v6313_v63, 0.0 }
 0x409   : > { %4650 = vst [vmem:[%s8499_s30 + $0x58] sm:$0xff] %v4634_v19 }
 0x40a   : > { %4648 = vst [vmem:[%s8499_s30 + $0x48] sm:$0xff] %v4632_v11  ;;  %v6240_v31 = vpop.f32.mrb[76].mxu1 }
 0x40b   : > { %v6319_v2 = vadd.f32 %v6318_v37, %v6240_v31  ;;  %v4592_v36 = vpop.f32.mrb[77].mxu1 }
 0x40c   : > { %v6325_v43 = vadd.f32 %v8479_v1, %v4592_v36  ;;  %v6241_v22 = vpop.f32.mrb[78].mxu1 }
 0x40d   : > { %v4637_v3 = vmax.f32 %v6319_v2, 0.0  ;;  %v6331_v29 = vadd.f32 %v8491_v23, %v6241_v22  ;;  %v4595_v58 = vpop.f32.mrb[79].mxu1 }
 0x40e   : > { %v4635_v33 = vmax.f32 %v6325_v43, 0.0  ;;  %v6337_v59 = vadd.f32 %v8483_v46, %v4595_v58 }
 0x40f   : > { %4653 = vst [vmem:[%s8499_s30 + $0x70] sm:$0xff] %v4637_v3  ;;  %v4638_v13 = vmax.f32 %v6331_v29, 0.0 }
 0x410   : > { %4651 = vst [vmem:[%s8499_s30 + $0x60] sm:$0xff] %v4635_v33  ;;  %v4636_v5 = vmax.f32 %v6337_v59, 0.0 }
 0x411   : > { %4654 = vst [vmem:[%s8499_s30 + $0x78] sm:$0xff] %v4638_v13 }
 0x412   : > { %4652 = vst [vmem:[%s8499_s30 + $0x68] sm:$0xff] %v4636_v5 }
 0x413 PF: > { %s13_s16 = sadd.s32 1, %s6753_s16   ;;  %s8638_s12 = smov %s6745_s14 }
 0x414   : > { %p10_p8 = scmp.ge.s32.totalorder %s13_s16, 6   ;;  %s8639_s13 = smov %s6749_s15 }
 0x415   : > { %s8640_s14 = smov %s8643_s17  ;;  %s8641_s15 = smov %s8647_s18 }
 0x416   :  { %12 = sbr.rel (!%p10_p8) target bundleno = 3 (0x3), region = 70 }

</bundles_post_ra>
